<compile_context>
chip_gen: v7x
topology: tpu7x:2x2x1
jax: 0.10.0
libtpu: 0.0.40
codegen_flags: <defaults>
</compile_context>

<pallas_src>
import numpy as np
import jax
import jax.numpy as jnp
from jax.experimental import pallas as pl
from jax.experimental.pallas import tpu as pltpu

# ---- small, forward-consistent config -------------------------------------
B = 2              # batch
C_IMG = 3          # image channels
T = 8              # sequence length (frames)
HW = 16            # spatial H = W
OBS_DIM = 32       # config['obs_dim']; use_language = False -> trajectory_embedding = obs_dim
HIDDEN = 512       # TrajectoryConvolution output dim (hardcoded 512 in the module)
KSIZE = 4          # config['conv']['context_length']
NUM_CLASSES = 10   # config['num_classes']

N_HEAD = 1 + NUM_CLASSES
BT = B * T
IMG_FEAT = C_IMG * HW * HW     # 768

# consolidated-bias layout (128-aligned static lane offsets)
B_OBS_OFF = 0
B1_OFF = 128
B2_OFF = B1_OFF + HIDDEN        # 640
BH_OFF = B2_OFF + HIDDEN        # 1152
BIAS_PAD = 1280


# ---------------------------------------------------------------------------
# Fused kernel: obs encode -> conv1 (im2col) -> gather last timestep -> conv2 -> heads
# ---------------------------------------------------------------------------
def fused_kernel(last_ref,              # SMEM (B,) int32: (obs_length - 1) mod T
                 img_ref,               # VMEM (BT, IMG_FEAT)            bf16
                 wobs_ref,              # VMEM (IMG_FEAT, OBS_DIM)       bf16
                 w1_ref,                # VMEM (KSIZE*OBS_DIM, HIDDEN)   bf16
                 w2_hbm,                # HBM  (KSIZE*HIDDEN, HIDDEN)    bf16 (pl.ANY, manual DMA)
                 wh_ref,                # VMEM (HIDDEN, N_HEAD)          bf16
                 bias_ref,              # VMEM (1, BIAS_PAD)             f32
                 out_ref,               # VMEM (B, N_HEAD) f32 -> [sigmoid(stop) | class logits]
                 w2_vmem,               # scratch VMEM (KSIZE*HIDDEN, HIDDEN) bf16
                 y1_vmem,               # scratch VMEM (BT, HIDDEN) f32
                 w2_sem):               # scratch DMA semaphore
    # --- kick off the big w2 transfer immediately; it overlaps the obs-encoder / conv1
    #     matmuls below and is waited on only right before the layer-2 contraction.
    w2_copy = pltpu.make_async_copy(w2_hbm, w2_vmem, w2_sem)
    w2_copy.start()

    # consolidated bias buffer: one small DMA, 128-aligned static lane slices.
    b_obs = bias_ref[:, B_OBS_OFF:B_OBS_OFF + OBS_DIM]
    b1 = bias_ref[:, B1_OFF:B1_OFF + HIDDEN]
    b2 = bias_ref[:, B2_OFF:B2_OFF + HIDDEN]
    b_head = bias_ref[:, BH_OFF:BH_OFF + N_HEAD]

    # --- obs encoder (synthetic I3D stand-in): mean-pool folded into the weight,
    #     single lane-dense K=768 matmul.
    feat = jnp.dot(img_ref[...], wobs_ref[...],
                   preferred_element_type=jnp.float32) + b_obs          # (BT, OBS_DIM) f32

    # --- layer-1 causal conv via im2col: (BT, KSIZE*OBS_DIM = 128) window, one matmul.
    #     NOTE: pltpu.roll wraps rows across batch boundaries; the (t mod T) >= s mask
    #     zeroes exactly those wrapped rows (causal left pad).  Mask column built once.
    t_col = jax.lax.broadcasted_iota(jnp.int32, (BT, 1), 0) % T          # (BT, 1)
    parts = []
    for k in range(KSIZE):
        s = KSIZE - 1 - k                        # backward time shift for tap k
        if s == 0:
            parts.append(feat)
        else:
            shifted = pltpu.roll(feat, shift=s, axis=0)                  # rolled[t] = feat[t-s]
            parts.append(jnp.where(t_col >= s, shifted, 0.0))
    window = jnp.concatenate(parts, axis=-1).astype(jnp.bfloat16)        # (BT, 128)
    y1 = jax.nn.relu(jnp.dot(window, w1_ref[...],
                             preferred_element_type=jnp.float32) + b1)   # (BT, HIDDEN) f32
    y1_vmem[...] = y1

    # --- layer-2 causal conv evaluated ONLY at the gathered last valid timestep.
    #     Dynamic-row gather of the KSIZE taps from the y1 VMEM scratch (no one-hot
    #     matmuls), K-concatenated and contracted in ONE (B, 2048) @ (2048, 512) matmul.
    rows = []
    for b in range(B):                           # B = 2, unrolled; scalar reads before wait()
        last_b = last_ref[b]
        taps = []
        for k in range(KSIZE):
            s = KSIZE - 1 - k
            tk = last_b - s                      # time index feeding tap k
            idx = b * T + jnp.maximum(tk, 0)
            row = y1_vmem[pl.ds(idx, 1), :]      # (1, HIDDEN) dynamic sublane read
            taps.append(jnp.where(tk >= 0, row, jnp.zeros_like(row)))    # causal zero pad
        rows.append(jnp.concatenate(taps, axis=-1))                      # (1, KSIZE*HIDDEN)
    window2 = jnp.concatenate(rows, axis=0).astype(jnp.bfloat16)         # (B, 2048)

    w2_copy.wait()                               # w2 only needed from here on
    y2 = jax.nn.relu(jnp.dot(window2, w2_vmem[...],
                             preferred_element_type=jnp.float32) + b2)   # (B, HIDDEN) f32

    # --- fused heads: one (B,512)x(512,11) matmul; sigmoid only on column 0 (stop prob).
    head = jnp.dot(y2.astype(jnp.bfloat16), wh_ref[...],
                   preferred_element_type=jnp.float32) + b_head
    cidx = jax.lax.broadcasted_iota(jnp.int32, head.shape, 1)
    out_ref[...] = jnp.where(cidx == 0, jax.nn.sigmoid(head), head).astype(out_ref.dtype)


def _vspec(shape):
    return pl.BlockSpec(shape, lambda i, _n=len(shape): (0,) * _n)


def fused_forward(last_idx, img2, kp):
    return pl.pallas_call(
        fused_kernel,
        out_shape=jax.ShapeDtypeStruct((B, N_HEAD), jnp.float32),
        grid=(1,),
        in_specs=[
            pl.BlockSpec(memory_space=pltpu.MemorySpace.SMEM),     # (obs_length-1) mod T
            _vspec((BT, IMG_FEAT)),
            _vspec((IMG_FEAT, OBS_DIM)),
            _vspec((KSIZE * OBS_DIM, HIDDEN)),
            pl.BlockSpec(memory_space=pl.ANY),                     # w2 stays in HBM; manual DMA
            _vspec((HIDDEN, N_HEAD)),
            _vspec((1, BIAS_PAD)),
        ],
        out_specs=_vspec((B, N_HEAD)),
        scratch_shapes=[
            pltpu.VMEM((KSIZE * HIDDEN, HIDDEN), jnp.bfloat16),    # w2 landing buffer
            pltpu.VMEM((BT, HIDDEN), jnp.float32),                 # y1 (conv1 output)
            pltpu.SemaphoreType.DMA(()),
        ],
        compiler_params=pltpu.CompilerParams(dimension_semantics=("arbitrary",)),
    )(last_idx, img2,
      kp['w_obs'], kp['w1'], kp['w2'], kp['w_head'], kp['bias'])


# ---------------------------------------------------------------------------
# Parameter preparation (host-side, once): fold pooling into w_obs, flatten conv taps,
# fuse head weights, consolidate biases, cast matmul weights to bf16.
# ---------------------------------------------------------------------------
def prepare_params(p):
    inv = 1.0 / float(HW * HW)
    bias = jnp.zeros((1, BIAS_PAD), jnp.float32)
    bias = bias.at[:, B_OBS_OFF:B_OBS_OFF + OBS_DIM].set(p['b_obs'])
    bias = bias.at[:, B1_OFF:B1_OFF + HIDDEN].set(p['b_conv1'])
    bias = bias.at[:, B2_OFF:B2_OFF + HIDDEN].set(p['b_conv2'])
    bias = bias.at[:, BH_OFF:BH_OFF + 1].set(p['b_lin'])
    bias = bias.at[:, BH_OFF + 1:BH_OFF + 1 + NUM_CLASSES].set(p['b_cls'])
    return {
        'w_obs': (jnp.repeat(p['w_obs'], HW * HW, axis=0) * inv).astype(jnp.bfloat16),
        'w1': p['w_conv1'].reshape(KSIZE * OBS_DIM, HIDDEN).astype(jnp.bfloat16),
        'w2': p['w_conv2'].reshape(KSIZE * HIDDEN, HIDDEN).astype(jnp.bfloat16),
        'w_head': jnp.concatenate([p['w_lin'], p['w_cls']], axis=1).astype(jnp.bfloat16),
        'bias': bias,
    }


# ---------------------------------------------------------------------------
# Wrapper reproducing PlaySegmentationModel.forward
# ---------------------------------------------------------------------------
def play_segmentation_forward(kparams, img_obs, obs_length, class_labels):
    # layout plumbing only: present frames as lane-dense (B*T, C*H*W) bf16 rows
    img2 = jnp.transpose(img_obs, (0, 2, 1, 3, 4)).reshape(BT, IMG_FEAT).astype(jnp.bfloat16)
    # (obs_length - 1) with python-style wrap for obs_length == 0 (matches torch indexing);
    # NOTE: silently wraps for obs_length > T — clamp upstream if larger lengths are possible.
    last_idx = ((obs_length.astype(jnp.int32) - 1) % T).astype(jnp.int32)

    out = fused_forward(last_idx, img2, kparams)          # (B, 1 + NUM_CLASSES)
    prob = out[:, 0]                                      # sigmoid(linear).squeeze(-1)
    cls_all = out[:, 1:]                                  # class logits for every batch elem

    # cls_prob = cls_linear(trajectory[cls_mask]) : dynamic-shape boolean gather,
    # done host-side (dynamic output shapes have no Pallas equivalent).
    cls_mask = np.asarray(class_labels) > -1
    cls_prob = cls_all[cls_mask]
    return prob, cls_prob


# ---------------------------------------------------------------------------
# Pure-JAX reference of the same forward (f32), for a numerical sanity check.
# ---------------------------------------------------------------------------
def reference_forward(p, img_obs, obs_length):
    pooled = jnp.mean(img_obs, axis=(3, 4))                                # (B, C, T)
    x = jnp.einsum('bct,cm->btm', pooled, p['w_obs']) + p['b_obs']         # (B, T, OBS_DIM)
    for w, b in ((p['w_conv1'], p['b_conv1']), (p['w_conv2'], p['b_conv2'])):
        ksz = w.shape[0]
        xp = jnp.pad(x, ((0, 0), (ksz - 1, 0), (0, 0)))
        y = sum(jnp.einsum('btd,dh->bth', xp[:, k:k + T, :], w[k]) for k in range(ksz)) + b
        x = jax.nn.relu(y)
    last = (obs_length.astype(jnp.int32) - 1) % T
    traj = x[jnp.arange(B), last]                                          # (B, HIDDEN)
    prob = jax.nn.sigmoid(traj @ p['w_lin'] + p['b_lin'])[:, 0]
    cls = traj @ p['w_cls'] + p['b_cls']
    return prob, cls


def init_params(key):
    ks = jax.random.split(key, 10)
    s = 0.02
    return {
        'w_obs':   jax.random.normal(ks[0], (C_IMG, OBS_DIM), jnp.float32) * s,
        'b_obs':   jax.random.normal(ks[1], (1, OBS_DIM), jnp.float32) * s,
        'w_conv1': jax.random.normal(ks[2], (KSIZE, OBS_DIM, HIDDEN), jnp.float32) * s,
        'b_conv1': jax.random.normal(ks[3], (1, HIDDEN), jnp.float32) * s,
        'w_conv2': jax.random.normal(ks[4], (KSIZE, HIDDEN, HIDDEN), jnp.float32) * s,
        'b_conv2': jax.random.normal(ks[5], (1, HIDDEN), jnp.float32) * s,
        'w_lin':   jax.random.normal(ks[6], (HIDDEN, 1), jnp.float32) * s,
        'b_lin':   jax.random.normal(ks[7], (1, 1), jnp.float32) * s,
        'w_cls':   jax.random.normal(ks[8], (HIDDEN, NUM_CLASSES), jnp.float32) * s,
        'b_cls':   jax.random.normal(ks[9], (1, NUM_CLASSES), jnp.float32) * s,
    }


if __name__ == "__main__":
    key = jax.random.PRNGKey(0)
    k_img, k_param = jax.random.split(key)

    img_obs = jax.random.normal(k_img, (B, C_IMG, T, HW, HW), jnp.float32)
    # second element short (obs_length=2) so the layer-2 causal zero-pad path is exercised
    obs_length = jnp.array([T, 2], dtype=jnp.int32)
    class_labels = np.array([3, -1], dtype=np.int32)          # one masked-out element

    params = init_params(k_param)
    kparams = prepare_params(params)

    prob, cls_prob = play_segmentation_forward(kparams, img_obs, obs_length, class_labels)
    prob, cls_prob = jax.block_until_ready((prob, cls_prob))

    # shape / sanity checks
    assert prob.shape == (B,), prob.shape
    assert cls_prob.shape == (int((class_labels > -1).sum()), NUM_CLASSES), cls_prob.shape
    assert bool(jnp.all(jnp.isfinite(prob))) and bool(jnp.all(jnp.isfinite(cls_prob)))

    # numerical check vs. pure-JAX f32 reference (kernel uses bf16 matmul inputs -> loose tol)
    ref_prob, ref_cls = reference_forward(params, img_obs, obs_length)
    ref_cls_sel = ref_cls[np.asarray(class_labels) > -1]
    np.testing.assert_allclose(np.asarray(prob), np.asarray(ref_prob), atol=5e-3, rtol=0.05)
    np.testing.assert_allclose(np.asarray(cls_prob), np.asarray(ref_cls_sel), atol=5e-3, rtol=0.05)

    print("KERNEL_OK")
</pallas_src>

<mosaic_0001>
module attributes {stable_mosaic.version = 11 : i64} {
  func.func @fused_kernel(%arg0: i32, %arg1: memref<2xi32, #tpu.memory_space<smem>>, %arg2: memref<16x768xbf16, #tpu.memory_space<vmem>>, %arg3: memref<768x32xbf16, #tpu.memory_space<vmem>>, %arg4: memref<128x512xbf16, #tpu.memory_space<vmem>>, %arg5: memref<2048x512xbf16, #tpu.memory_space<any>>, %arg6: memref<512x11xbf16, #tpu.memory_space<vmem>>, %arg7: memref<1x1280xf32, #tpu.memory_space<vmem>>, %arg8: memref<2x11xf32, #tpu.memory_space<vmem>>, %arg9: memref<2048x512xbf16, #tpu.memory_space<vmem>>, %arg10: memref<16x512xf32, #tpu.memory_space<vmem>>, %arg11: memref<!tpu.dma_semaphore, #tpu.memory_space<semaphore_mem>>) attributes {dimension_semantics = [#tpu.dimension_semantics<arbitrary>], iteration_bounds = array<i64: 1>, scalar_prefetch = 0 : i64, scratch_operands = 3 : i64, tpu.core_type = #tpu.core_type<tc>, window_params = [{transform_indices = @transform_0, window_bounds = array<i64: 2>}, {pipeline_mode = #tpu.pipeline_mode<synchronous>, transform_indices = @transform_1, window_bounds = array<i64: 16, 768>}, {pipeline_mode = #tpu.pipeline_mode<synchronous>, transform_indices = @transform_2, window_bounds = array<i64: 768, 32>}, {pipeline_mode = #tpu.pipeline_mode<synchronous>, transform_indices = @transform_3, window_bounds = array<i64: 128, 512>}, {}, {pipeline_mode = #tpu.pipeline_mode<synchronous>, transform_indices = @transform_5, window_bounds = array<i64: 512, 11>}, {pipeline_mode = #tpu.pipeline_mode<synchronous>, transform_indices = @transform_6, window_bounds = array<i64: 1, 1280>}, {pipeline_mode = #tpu.pipeline_mode<synchronous>, transform_indices = @transform_7, window_bounds = array<i64: 2, 11>}]} {
    tpu.enqueue_dma source(%arg5 : memref<2048x512xbf16, #tpu.memory_space<any>>) target(%arg9 : memref<2048x512xbf16, #tpu.memory_space<vmem>>) target_semaphore(%arg11 : memref<!tpu.dma_semaphore, #tpu.memory_space<semaphore_mem>>)
    %c0 = arith.constant 0 : index
    %c0_0 = arith.constant 0 : index
    %0 = vector.load %arg7[%c0, %c0_0] : memref<1x1280xf32, #tpu.memory_space<vmem>>, vector<1x32xf32>
    %c0_1 = arith.constant 0 : index
    %c128 = arith.constant 128 : index
    %1 = vector.load %arg7[%c0_1, %c128] : memref<1x1280xf32, #tpu.memory_space<vmem>>, vector<1x512xf32>
    %c0_2 = arith.constant 0 : index
    %c640 = arith.constant 640 : index
    %2 = vector.load %arg7[%c0_2, %c640] : memref<1x1280xf32, #tpu.memory_space<vmem>>, vector<1x512xf32>
    %c0_3 = arith.constant 0 : index
    %c1152 = arith.constant 1152 : index
    %3 = vector.load %arg7[%c0_3, %c1152] : memref<1x1280xf32, #tpu.memory_space<vmem>>, vector<1x11xf32>
    %c0_4 = arith.constant 0 : index
    %c0_5 = arith.constant 0 : index
    %4 = vector.load %arg2[%c0_4, %c0_5] : memref<16x768xbf16, #tpu.memory_space<vmem>>, vector<16x768xbf16>
    %c0_6 = arith.constant 0 : index
    %c0_7 = arith.constant 0 : index
    %5 = vector.load %arg3[%c0_6, %c0_7] : memref<768x32xbf16, #tpu.memory_space<vmem>>, vector<768x32xbf16>
    %cst = arith.constant dense<0.000000e+00> : vector<16x32xf32>
    %6 = tpu.matmul %4, %5, %cst {dimension_numbers = #tpu.dot_dimension_numbers<[1], [0], [0], [1], [0, 0, 1, 1], [], []>} : vector<16x768xbf16>, vector<768x32xbf16>, vector<16x32xf32> -> vector<16x32xf32>
    %7 = vector.broadcast %0 : vector<1x32xf32> to vector<16x32xf32>
    %8 = arith.addf %6, %7 : vector<16x32xf32>
    %9 = tpu.iota {dimensions = array<i32: 0>} : vector<16x1xi32>
    %c8_i32 = arith.constant 8 : i32
    %c0_i32 = arith.constant 0 : i32
    %10 = arith.cmpi eq, %c8_i32, %c0_i32 : i32
    %c1_i32 = arith.constant 1 : i32
    %11 = arith.select %10, %c1_i32, %c8_i32 : i32
    %12 = vector.broadcast %11 : i32 to vector<16x1xi32>
    %13 = arith.remsi %9, %12 : vector<16x1xi32>
    %c0_i32_8 = arith.constant 0 : i32
    %14 = vector.broadcast %c0_i32_8 : i32 to vector<16x1xi32>
    %15 = arith.cmpi ne, %13, %14 : vector<16x1xi32>
    %c0_i32_9 = arith.constant 0 : i32
    %16 = vector.broadcast %c0_i32_9 : i32 to vector<16x1xi32>
    %17 = arith.cmpi slt, %13, %16 : vector<16x1xi32>
    %c0_i32_10 = arith.constant 0 : i32
    %18 = arith.cmpi slt, %11, %c0_i32_10 : i32
    %19 = vector.broadcast %18 : i1 to vector<16x1xi1>
    %20 = vector.broadcast %19 : vector<16x1xi1> to vector<16x1xi1>
    %21 = arith.xori %17, %20 : vector<16x1xi1>
    %22 = arith.andi %21, %15 : vector<16x1xi1>
    %23 = vector.broadcast %11 : i32 to vector<16x1xi32>
    %24 = arith.addi %13, %23 : vector<16x1xi32>
    %25 = arith.select %22, %24, %13 : vector<16x1xi1>, vector<16x1xi32>
    %c3_i32 = arith.constant 3 : i32
    %26 = tpu.dynamic_rotate %8 by %c3_i32 dim 0 : vector<16x32xf32>, i32 -> vector<16x32xf32>
    %c3_i32_11 = arith.constant 3 : i32
    %27 = vector.broadcast %c3_i32_11 : i32 to vector<16x1xi32>
    %28 = arith.cmpi sge, %25, %27 : vector<16x1xi32>
    %cst_12 = arith.constant 0.000000e+00 : f32
    %29 = vector.shape_cast %28 : vector<16x1xi1> to vector<16x1xi1>
    %30 = vector.broadcast %29 : vector<16x1xi1> to vector<16x32xi1>
    %31 = vector.broadcast %cst_12 : f32 to vector<16x32xf32>
    %32 = arith.select %30, %26, %31 : vector<16x32xi1>, vector<16x32xf32>
    %c2_i32 = arith.constant 2 : i32
    %33 = tpu.dynamic_rotate %8 by %c2_i32 dim 0 : vector<16x32xf32>, i32 -> vector<16x32xf32>
    %c2_i32_13 = arith.constant 2 : i32
    %34 = vector.broadcast %c2_i32_13 : i32 to vector<16x1xi32>
    %35 = arith.cmpi sge, %25, %34 : vector<16x1xi32>
    %cst_14 = arith.constant 0.000000e+00 : f32
    %36 = vector.shape_cast %35 : vector<16x1xi1> to vector<16x1xi1>
    %37 = vector.broadcast %36 : vector<16x1xi1> to vector<16x32xi1>
    %38 = vector.broadcast %cst_14 : f32 to vector<16x32xf32>
    %39 = arith.select %37, %33, %38 : vector<16x32xi1>, vector<16x32xf32>
    %c1_i32_15 = arith.constant 1 : i32
    %40 = tpu.dynamic_rotate %8 by %c1_i32_15 dim 0 : vector<16x32xf32>, i32 -> vector<16x32xf32>
    %c1_i32_16 = arith.constant 1 : i32
    %41 = vector.broadcast %c1_i32_16 : i32 to vector<16x1xi32>
    %42 = arith.cmpi sge, %25, %41 : vector<16x1xi32>
    %cst_17 = arith.constant 0.000000e+00 : f32
    %43 = vector.shape_cast %42 : vector<16x1xi1> to vector<16x1xi1>
    %44 = vector.broadcast %43 : vector<16x1xi1> to vector<16x32xi1>
    %45 = vector.broadcast %cst_17 : f32 to vector<16x32xf32>
    %46 = arith.select %44, %40, %45 : vector<16x32xi1>, vector<16x32xf32>
    %47 = tpu.concatenate %32, %39, %46, %8 in 1 : vector<16x32xf32>, vector<16x32xf32>, vector<16x32xf32>, vector<16x32xf32> -> vector<16x128xf32>
    %48 = arith.truncf %47 : vector<16x128xf32> to vector<16x128xbf16>
    %c0_18 = arith.constant 0 : index
    %c0_19 = arith.constant 0 : index
    %49 = vector.load %arg4[%c0_18, %c0_19] : memref<128x512xbf16, #tpu.memory_space<vmem>>, vector<128x512xbf16>
    %cst_20 = arith.constant dense<0.000000e+00> : vector<16x512xf32>
    %50 = tpu.matmul %48, %49, %cst_20 {dimension_numbers = #tpu.dot_dimension_numbers<[1], [0], [0], [1], [0, 0, 1, 1], [], []>} : vector<16x128xbf16>, vector<128x512xbf16>, vector<16x512xf32> -> vector<16x512xf32>
    %51 = vector.broadcast %1 : vector<1x512xf32> to vector<16x512xf32>
    %52 = arith.addf %50, %51 : vector<16x512xf32>
    %cst_21 = arith.constant 0.000000e+00 : f32
    %53 = vector.broadcast %cst_21 : f32 to vector<16x512xf32>
    %54 = arith.maximumf %52, %53 : vector<16x512xf32>
    %c0_22 = arith.constant 0 : index
    %c0_23 = arith.constant 0 : index
    %55 = vector.load %arg10[%c0_22, %c0_23] : memref<16x512xf32, #tpu.memory_space<vmem>>, vector<16x512xf32>
    tpu.vector_store %arg10[%c0_22, %c0_23], %54 {strides = array<i32>} : memref<16x512xf32, #tpu.memory_space<vmem>>, vector<16x512xf32>,
    %c0_24 = arith.constant 0 : index
    %56 = memref.load %arg1[%c0_24] : memref<2xi32, #tpu.memory_space<smem>>
    %c3_i32_25 = arith.constant 3 : i32
    %57 = arith.subi %56, %c3_i32_25 : i32
    %c0_i32_26 = arith.constant 0 : i32
    %58 = arith.maxsi %57, %c0_i32_26 : i32
    %c0_i32_27 = arith.constant 0 : i32
    %59 = arith.addi %c0_i32_27, %58 : i32
    %60 = arith.index_cast %59 : i32 to index
    %c0_28 = arith.constant 0 : index
    %61 = vector.load %arg10[%60, %c0_28] : memref<16x512xf32, #tpu.memory_space<vmem>>, vector<1x512xf32>
    %c0_i32_29 = arith.constant 0 : i32
    %62 = arith.cmpi sge, %57, %c0_i32_29 : i32
    %cst_30 = arith.constant 0.000000e+00 : f32
    %63 = vector.broadcast %cst_30 : f32 to vector<1x512xf32>
    %64 = arith.select %62, %61, %63 : vector<1x512xf32>
    %c2_i32_31 = arith.constant 2 : i32
    %65 = arith.subi %56, %c2_i32_31 : i32
    %c0_i32_32 = arith.constant 0 : i32
    %66 = arith.maxsi %65, %c0_i32_32 : i32
    %c0_i32_33 = arith.constant 0 : i32
    %67 = arith.addi %c0_i32_33, %66 : i32
    %68 = arith.index_cast %67 : i32 to index
    %c0_34 = arith.constant 0 : index
    %69 = vector.load %arg10[%68, %c0_34] : memref<16x512xf32, #tpu.memory_space<vmem>>, vector<1x512xf32>
    %c0_i32_35 = arith.constant 0 : i32
    %70 = arith.cmpi sge, %65, %c0_i32_35 : i32
    %cst_36 = arith.constant 0.000000e+00 : f32
    %71 = vector.broadcast %cst_36 : f32 to vector<1x512xf32>
    %72 = arith.select %70, %69, %71 : vector<1x512xf32>
    %c1_i32_37 = arith.constant 1 : i32
    %73 = arith.subi %56, %c1_i32_37 : i32
    %c0_i32_38 = arith.constant 0 : i32
    %74 = arith.maxsi %73, %c0_i32_38 : i32
    %c0_i32_39 = arith.constant 0 : i32
    %75 = arith.addi %c0_i32_39, %74 : i32
    %76 = arith.index_cast %75 : i32 to index
    %c0_40 = arith.constant 0 : index
    %77 = vector.load %arg10[%76, %c0_40] : memref<16x512xf32, #tpu.memory_space<vmem>>, vector<1x512xf32>
    %c0_i32_41 = arith.constant 0 : i32
    %78 = arith.cmpi sge, %73, %c0_i32_41 : i32
    %cst_42 = arith.constant 0.000000e+00 : f32
    %79 = vector.broadcast %cst_42 : f32 to vector<1x512xf32>
    %80 = arith.select %78, %77, %79 : vector<1x512xf32>
    %c0_i32_43 = arith.constant 0 : i32
    %81 = arith.subi %56, %c0_i32_43 : i32
    %c0_i32_44 = arith.constant 0 : i32
    %82 = arith.maxsi %81, %c0_i32_44 : i32
    %c0_i32_45 = arith.constant 0 : i32
    %83 = arith.addi %c0_i32_45, %82 : i32
    %84 = arith.index_cast %83 : i32 to index
    %c0_46 = arith.constant 0 : index
    %85 = vector.load %arg10[%84, %c0_46] : memref<16x512xf32, #tpu.memory_space<vmem>>, vector<1x512xf32>
    %c0_i32_47 = arith.constant 0 : i32
    %86 = arith.cmpi sge, %81, %c0_i32_47 : i32
    %cst_48 = arith.constant 0.000000e+00 : f32
    %87 = vector.broadcast %cst_48 : f32 to vector<1x512xf32>
    %88 = arith.select %86, %85, %87 : vector<1x512xf32>
    %89 = tpu.concatenate %64, %72, %80, %88 in 1 : vector<1x512xf32>, vector<1x512xf32>, vector<1x512xf32>, vector<1x512xf32> -> vector<1x2048xf32>
    %c1 = arith.constant 1 : index
    %90 = memref.load %arg1[%c1] : memref<2xi32, #tpu.memory_space<smem>>
    %c3_i32_49 = arith.constant 3 : i32
    %91 = arith.subi %90, %c3_i32_49 : i32
    %c0_i32_50 = arith.constant 0 : i32
    %92 = arith.maxsi %91, %c0_i32_50 : i32
    %c8_i32_51 = arith.constant 8 : i32
    %93 = arith.addi %c8_i32_51, %92 : i32
    %94 = arith.index_cast %93 : i32 to index
    %c0_52 = arith.constant 0 : index
    %95 = vector.load %arg10[%94, %c0_52] : memref<16x512xf32, #tpu.memory_space<vmem>>, vector<1x512xf32>
    %c0_i32_53 = arith.constant 0 : i32
    %96 = arith.cmpi sge, %91, %c0_i32_53 : i32
    %cst_54 = arith.constant 0.000000e+00 : f32
    %97 = vector.broadcast %cst_54 : f32 to vector<1x512xf32>
    %98 = arith.select %96, %95, %97 : vector<1x512xf32>
    %c2_i32_55 = arith.constant 2 : i32
    %99 = arith.subi %90, %c2_i32_55 : i32
    %c0_i32_56 = arith.constant 0 : i32
    %100 = arith.maxsi %99, %c0_i32_56 : i32
    %c8_i32_57 = arith.constant 8 : i32
    %101 = arith.addi %c8_i32_57, %100 : i32
    %102 = arith.index_cast %101 : i32 to index
    %c0_58 = arith.constant 0 : index
    %103 = vector.load %arg10[%102, %c0_58] : memref<16x512xf32, #tpu.memory_space<vmem>>, vector<1x512xf32>
    %c0_i32_59 = arith.constant 0 : i32
    %104 = arith.cmpi sge, %99, %c0_i32_59 : i32
    %cst_60 = arith.constant 0.000000e+00 : f32
    %105 = vector.broadcast %cst_60 : f32 to vector<1x512xf32>
    %106 = arith.select %104, %103, %105 : vector<1x512xf32>
    %c1_i32_61 = arith.constant 1 : i32
    %107 = arith.subi %90, %c1_i32_61 : i32
    %c0_i32_62 = arith.constant 0 : i32
    %108 = arith.maxsi %107, %c0_i32_62 : i32
    %c8_i32_63 = arith.constant 8 : i32
    %109 = arith.addi %c8_i32_63, %108 : i32
    %110 = arith.index_cast %109 : i32 to index
    %c0_64 = arith.constant 0 : index
    %111 = vector.load %arg10[%110, %c0_64] : memref<16x512xf32, #tpu.memory_space<vmem>>, vector<1x512xf32>
    %c0_i32_65 = arith.constant 0 : i32
    %112 = arith.cmpi sge, %107, %c0_i32_65 : i32
    %cst_66 = arith.constant 0.000000e+00 : f32
    %113 = vector.broadcast %cst_66 : f32 to vector<1x512xf32>
    %114 = arith.select %112, %111, %113 : vector<1x512xf32>
    %c0_i32_67 = arith.constant 0 : i32
    %115 = arith.subi %90, %c0_i32_67 : i32
    %c0_i32_68 = arith.constant 0 : i32
    %116 = arith.maxsi %115, %c0_i32_68 : i32
    %c8_i32_69 = arith.constant 8 : i32
    %117 = arith.addi %c8_i32_69, %116 : i32
    %118 = arith.index_cast %117 : i32 to index
    %c0_70 = arith.constant 0 : index
    %119 = vector.load %arg10[%118, %c0_70] : memref<16x512xf32, #tpu.memory_space<vmem>>, vector<1x512xf32>
    %c0_i32_71 = arith.constant 0 : i32
    %120 = arith.cmpi sge, %115, %c0_i32_71 : i32
    %cst_72 = arith.constant 0.000000e+00 : f32
    %121 = vector.broadcast %cst_72 : f32 to vector<1x512xf32>
    %122 = arith.select %120, %119, %121 : vector<1x512xf32>
    %123 = tpu.concatenate %98, %106, %114, %122 in 1 : vector<1x512xf32>, vector<1x512xf32>, vector<1x512xf32>, vector<1x512xf32> -> vector<1x2048xf32>
    %124 = tpu.concatenate %89, %123 in 0 : vector<1x2048xf32>, vector<1x2048xf32> -> vector<2x2048xf32>
    %125 = arith.truncf %124 : vector<2x2048xf32> to vector<2x2048xbf16>
    tpu.wait_dma2 semaphore(%arg11 : memref<!tpu.dma_semaphore, #tpu.memory_space<semaphore_mem>>) src(%arg5 : memref<2048x512xbf16, #tpu.memory_space<any>>) dst(%arg9 : memref<2048x512xbf16, #tpu.memory_space<vmem>>)
    %c0_73 = arith.constant 0 : index
    %c0_74 = arith.constant 0 : index
    %126 = vector.load %arg9[%c0_73, %c0_74] : memref<2048x512xbf16, #tpu.memory_space<vmem>>, vector<2048x512xbf16>
    %cst_75 = arith.constant dense<0.000000e+00> : vector<2x512xf32>
    %127 = tpu.matmul %125, %126, %cst_75 {dimension_numbers = #tpu.dot_dimension_numbers<[1], [0], [0], [1], [0, 0, 1, 1], [], []>} : vector<2x2048xbf16>, vector<2048x512xbf16>, vector<2x512xf32> -> vector<2x512xf32>
    %128 = vector.broadcast %2 : vector<1x512xf32> to vector<2x512xf32>
    %129 = arith.addf %127, %128 : vector<2x512xf32>
    %cst_76 = arith.constant 0.000000e+00 : f32
    %130 = vector.broadcast %cst_76 : f32 to vector<2x512xf32>
    %131 = arith.maximumf %129, %130 : vector<2x512xf32>
    %132 = arith.truncf %131 : vector<2x512xf32> to vector<2x512xbf16>
    %c0_77 = arith.constant 0 : index
    %c0_78 = arith.constant 0 : index
    %133 = vector.load %arg6[%c0_77, %c0_78] : memref<512x11xbf16, #tpu.memory_space<vmem>>, vector<512x11xbf16>
    %cst_79 = arith.constant dense<0.000000e+00> : vector<2x11xf32>
    %134 = tpu.matmul %132, %133, %cst_79 {dimension_numbers = #tpu.dot_dimension_numbers<[1], [0], [0], [1], [0, 0, 1, 1], [], []>} : vector<2x512xbf16>, vector<512x11xbf16>, vector<2x11xf32> -> vector<2x11xf32>
    %135 = vector.broadcast %3 : vector<1x11xf32> to vector<2x11xf32>
    %136 = arith.addf %134, %135 : vector<2x11xf32>
    %137 = tpu.iota {dimensions = array<i32: 1>} : vector<2x11xi32>
    %c0_i32_80 = arith.constant 0 : i32
    %138 = vector.broadcast %c0_i32_80 : i32 to vector<2x11xi32>
    %139 = arith.cmpi eq, %137, %138 : vector<2x11xi32>
    %140 = arith.negf %136 : vector<2x11xf32>
    %141 = math.exp %140 : vector<2x11xf32>
    %cst_81 = arith.constant 1.000000e+00 : f32
    %142 = vector.broadcast %cst_81 : f32 to vector<2x11xf32>
    %143 = arith.addf %142, %141 : vector<2x11xf32>
    %144 = arith.divf %142, %143 : vector<2x11xf32>
    %145 = arith.select %139, %144, %136 : vector<2x11xi1>, vector<2x11xf32>
    %c0_82 = arith.constant 0 : index
    %c0_83 = arith.constant 0 : index
    %146 = vector.load %arg8[%c0_82, %c0_83] : memref<2x11xf32, #tpu.memory_space<vmem>>, vector<2x11xf32>
    tpu.vector_store %arg8[%c0_82, %c0_83], %145 {strides = array<i32>} : memref<2x11xf32, #tpu.memory_space<vmem>>, vector<2x11xf32>,
    return
  }
  func.func @transform_0(%arg0: i32) -> i32 {
    %c0_i32 = arith.constant 0 : i32
    %c0_i32_0 = arith.constant 0 : i32
    return %c0_i32 : i32
  }
  func.func @transform_1(%arg0: i32) -> (i32, i32) {
    %c0_i32 = arith.constant 0 : i32
    %c0_i32_0 = arith.constant 0 : i32
    %c0_i32_1 = arith.constant 0 : i32
    return %c0_i32, %c0_i32_0 : i32, i32
  }
  func.func @transform_2(%arg0: i32) -> (i32, i32) {
    %c0_i32 = arith.constant 0 : i32
    %c0_i32_0 = arith.constant 0 : i32
    %c0_i32_1 = arith.constant 0 : i32
    return %c0_i32, %c0_i32_0 : i32, i32
  }
  func.func @transform_3(%arg0: i32) -> (i32, i32) {
    %c0_i32 = arith.constant 0 : i32
    %c0_i32_0 = arith.constant 0 : i32
    %c0_i32_1 = arith.constant 0 : i32
    return %c0_i32, %c0_i32_0 : i32, i32
  }
  func.func @transform_5(%arg0: i32) -> (i32, i32) {
    %c0_i32 = arith.constant 0 : i32
    %c0_i32_0 = arith.constant 0 : i32
    %c0_i32_1 = arith.constant 0 : i32
    return %c0_i32, %c0_i32_0 : i32, i32
  }
  func.func @transform_6(%arg0: i32) -> (i32, i32) {
    %c0_i32 = arith.constant 0 : i32
    %c0_i32_0 = arith.constant 0 : i32
    %c0_i32_1 = arith.constant 0 : i32
    return %c0_i32, %c0_i32_0 : i32, i32
  }
  func.func @transform_7(%arg0: i32) -> (i32, i32) {
    %c0_i32 = arith.constant 0 : i32
    %c0_i32_0 = arith.constant 0 : i32
    %c0_i32_1 = arith.constant 0 : i32
    return %c0_i32, %c0_i32_0 : i32, i32
  }
}

</mosaic_0001>

<bundles_post_ra>
// kernel: tpu_custom_call.1
= control target key start
LH: loop header
LB: loop body
LE: loop exit
PB: predicated region body
PF: predicated region fallthrough
CT: control target
= control target key end

     0   :  { %12 = vsyncpa [#allocation8], 0  ;;  %s4362_s0 = inlined_call_operand.hbm [shape: s32[2], index: 0, kind: input, shape index: {}]   ;;  %s4363_s1 = inlined_call_operand.hbm [shape: bf16[16,768], index: 1, kind: input, shape index: {}]   ;;  %s4364_s2 = inlined_call_operand.vmem [shape: bf16[768,32], index: 2, kind: input, shape index: {}]   ;;  %s4365_s3 = inlined_call_operand.hbm [shape: bf16[128,512], index: 3, kind: input, shape index: {}]   ;;  %s4366_s4 = inlined_call_operand.hbm [shape: bf16[2048,512], index: 4, kind: input, shape index: {}]   ;;  %s4367_s5 = inlined_call_operand.vmem [shape: bf16[512,11], index: 5, kind: input, shape index: {}]   ;;  %s4368_s6 = inlined_call_operand.hbm [shape: f32[1,1280], index: 6, kind: input, shape index: {}]   ;;  %s4369_s7 = inlined_call_operand.hbm [shape: f32[2,11], index: 7, kind: output, shape index: {}]  }
   0x1   :  { %13 = vsyncpa [#allocation6], 0 }
   0x2   :  { %14 = vsyncpa [#allocation11], 0 }
   0x3   :  { %15 = vsyncpa [#allocation7], 0  ;;  %s3647_s24 = smov [#allocation10]   ;;  %s3539_s28 = scalar_lea.hbm %s4365_s3, 4096 }
   0x4   :  { %s43_s25 = sshll.u32 %s3647_s24, 4  ;;  %p3540_p0 = scmp.ne.s32.totalorder %s4365_s3, %s3539_s28  ;;  %s44_s25 = int_to_ptr.vmem [resolvable:$true] %s43_s25 }
   0x5   :  { %p3543_p1 = scmp.lt.u32.totalorder %s3539_s28, %s4365_s3 }
   0x7   :  { %p3545_p2 = pnand %p3543_p1, %p3540_p0 }
   0x9   :  { %3548 = shalt.err (!%p3545_p2)
}
   0xa   :  { %s3549_s10 = scalar_lea.vmem %s44_s25, 4096  ;;  %p3554_p4 = scmp.lt.s32.totalorder %s44_s25, %s44_s25 }
   0xb   :  { %p3550_p3 = scmp.ne.s32.totalorder %s44_s25, %s3549_s10  ;;  %p3555_p5 = scmp.lt.s32.totalorder %s3549_s10, %s3549_s10 }
   0xd   :  { %p3556_p6 = por %p3555_p5, %p3554_p4 }
   0xf   :  { %p3557_p7 = pnand %p3556_p6, %p3550_p3 }
  0x11   :  { %3560 = shalt.err (!%p3557_p7)
}
  0x12   :  { %s3648_s11 = smov 256   ;;  %s3649_s12 = smov 16  }
  0x13   :  { %49 = dma.hbm_to_vmem [thread:$0]  %s4365_s3, 4096, %s44_s25, [#allocation11], %s3648_s11, %s3648_s11, %s3649_s12  }
  0x14   :  { %s3561_s17 = scalar_lea.hbm %s4362_s0, 16 }
  0x15   :  { %p3562_p8 = scmp.ne.s32.totalorder %s4362_s0, %s3561_s17  ;;  %p3565_p9 = scmp.lt.u32.totalorder %s3561_s17, %s4362_s0 }
  0x17   :  { %p3567_p10 = pnand %p3565_p9, %p3562_p8 }
  0x19   :  { %3570 = shalt.err (!%p3567_p10)
}
  0x1a   :  { %s3650_s22 = smov [#allocation5]   ;;  %s3651_s3 = smov [#allocation9]  }
  0x1b   :  { %23 = dma.hbm_to_smem %s4362_s0, 16, %s3650_s22, [#allocation8]  }
  0x1c   :  { %s29_s25 = sshll.u32 %s3651_s3, 4  ;;  %s3571_s28 = scalar_lea.hbm %s4363_s1, 768  ;;  %s30_s25 = int_to_ptr.vmem [resolvable:$true] %s29_s25 }
  0x1d   :  { %p3572_p11 = scmp.ne.s32.totalorder %s4363_s1, %s3571_s28  ;;  %p3575_p12 = scmp.lt.u32.totalorder %s3571_s28, %s4363_s1 }
  0x1f   :  { %p3577_p13 = pnand %p3575_p12, %p3572_p11 }
  0x21   :  { %3580 = shalt.err (!%p3577_p13)
}
  0x22   :  { %s3581_s10 = scalar_lea.vmem %s30_s25, 768  ;;  %p3586_p1 = scmp.lt.s32.totalorder %s30_s25, %s30_s25 }
  0x23   :  { %p3582_p0 = scmp.ne.s32.totalorder %s30_s25, %s3581_s10  ;;  %p3587_p2 = scmp.lt.s32.totalorder %s3581_s10, %s3581_s10 }
  0x25   :  { %p3588_p3 = por %p3587_p2, %p3586_p1 }
  0x27   :  { %p3589_p4 = pnand %p3588_p3, %p3582_p0 }
  0x29   :  { %3592 = shalt.err (!%p3589_p4)
}
  0x2a   :  { %s3652_s0 = smov 384   ;;  %s3653_s12 = smov 24  }
  0x2b   :  { %35 = dma.hbm_to_vmem [thread:$0]  %s4363_s1, 768, %s30_s25, [#allocation6], %s3652_s0, %s3652_s0, %s3653_s12  }
  0x2c   :  { %s3654_s15 = smov [#allocation12]   ;;  %s3593_s19 = scalar_lea.hbm %s4368_s6, 160 }
  0x2d   :  { %s58_s16 = sshll.u32 %s3654_s15, 4  ;;  %p3594_p5 = scmp.ne.s32.totalorder %s4368_s6, %s3593_s19  ;;  %s59_s16 = int_to_ptr.vmem [resolvable:$true] %s58_s16 }
  0x2e   :  { %p3597_p6 = scmp.lt.u32.totalorder %s3593_s19, %s4368_s6 }
  0x30   :  { %p3599_p7 = pnand %p3597_p6, %p3594_p5 }
  0x32   :  { %3602 = shalt.err (!%p3599_p7)
}
  0x33   :  { %s3603_s24 = scalar_lea.vmem %s59_s16, 160  ;;  %p3608_p9 = scmp.lt.s32.totalorder %s59_s16, %s59_s16 }
  0x34   :  { %p3604_p8 = scmp.ne.s32.totalorder %s59_s16, %s3603_s24  ;;  %p3609_p10 = scmp.lt.s32.totalorder %s3603_s24, %s3603_s24 }
  0x36   :  { %p3610_p11 = por %p3609_p10, %p3608_p9 }
  0x38   :  { %p3611_p12 = pnand %p3610_p11, %p3604_p8 }
  0x3a   :  { %3614 = shalt.err (!%p3611_p12)
}
  0x3b   :  { %61 = dma.hbm_to_vmem [thread:$0]  %s4368_s6, 160, %s59_s16, [#allocation11]  }
  0x3c   :  { %3637 = dma.done.wait [#allocation8], 16  }
  0x3d   :  { %3638 = vsyncadd [#allocation8], 4294967280 }
  0x3e   :  { %3639 = dma.done.wait [#allocation6], 768  }
  0x3f   :  { %3640 = vsyncadd [#allocation6], 4294966528 }
  0x40   :  { %3641 = dma.done.wait [#allocation11], 4256  }
  0x41   :  { %3642 = vsyncadd [#allocation11], 4294963040 }
  0x42   :  { %74 = sfence }
  0x43   :  { %s80_s25 = sld [smem:[#allocation0]]   ;;  %s3655_s26 = smov [#allocation2]   ;;  %vm754_vm9 = vcmask 261120   ;;  %vm757_vm10 = vcmask 523264   ;;  %vm760_vm11 = vcmask 785408  }
  0x44   :  { %s88_s27 = sshll.u32 %s3655_s26, 4  ;;  %s3656_s28 = smov 512   ;;  %s89_s27 = int_to_ptr.vmem [resolvable:$true] %s88_s27 }
  0x45   :  { %92 = sst [smem:[#allocation15]] %s3656_s28  ;;  %s3657_s29 = smov 4  }
  0x46   :  { %94 = sst [smem:[#allocation15 + $0x1]] %s3656_s28  ;;  %s3658_s30 = smov 64  }
  0x47   :  { %96 = sst [smem:[#allocation15 + $0x2]] %s3657_s29  ;;  %s3659_s8 = smov 128  }
  0x48   :  { %98 = sst [smem:[#allocation15 + $0x3]] %s3658_s30  ;;  %s3660_s10 = smov 2  }
  0x49   :  { %s3038_s6 = sshll.u32 %s80_s25, 26  ;;  %100 = sst [smem:[#allocation15 + $0x4]] %s3659_s8 }
  0x4a   :  { %s3039_s9 = sadd.s32 134217728, %s3038_s6  ;;  %102 = sst [smem:[#allocation15 + $0x5]] %s3660_s10 }
  0x4b   :  { %104 = sst [smem:[#allocation15 + $0x6]] %s3648_s11  ;;  %s3661_s0 = smov [#allocation4]  }
  0x4c   :  { %106 = sst [smem:[#allocation15 + $0x7]] %s3658_s30  ;;  %s3662_s12 = smov [#allocation14]  }
  0x4d   :  { %108 = sst [smem:[#allocation15 + $0x8]] %s3657_s29  ;;  %s3665_s26 = smov 32  }
  0x4e   :  { %110 = dma.general %s4366_s4, 65536, %s89_s27, %s3661_s0, %s3662_s12, [#allocation15], %s3039_s9, 0  }
  0x4f   :  { %v3763_v0 = vld [vmem:[#allocation12 + $0x5] sm:$0xf]  ;;  %v3765_v1 = vld [vmem:[#allocation12 + $0x9] ss:$0 sm:$0xff]  ;;  %v3398_v2 = vld [vmem:[%s4364_s2 + $0x40] sm:$0xff]   ;;  %s3944_s12 = sld [smem:[#allocation5 + $0x1]] }
  0x50   :  { %v3399_v3 = vld [vmem:[%s4364_s2] sm:$0xff]   ;;  %3193 = vmatprep.subr.bf16.mxu0 %v3398_v2  ;;  %v3402_v6 = vld [vmem:[%s4364_s2 + $0x48] sm:$0xff]   ;;  %v3406_v10 = vld [vmem:[%s4364_s2 + $0x50] sm:$0xff]  }
  0x51   :  { %v3400_v4 = vld [vmem:[%s4364_s2 + $0xc0] sm:$0xff]   ;;  %3194 = vmatpush3.bf16.msra.mxu0 %v3399_v3  ;;  %v3403_v7 = vld [vmem:[%s4364_s2 + $0x8] sm:$0xff]   ;;  %v3407_v11 = vld [vmem:[%s4364_s2 + $0x10] sm:$0xff]  }
  0x52   :  { %v3401_v5 = vld [vmem:[%s4364_s2 + $0x80] sm:$0xff]   ;;  %3215 = vmatprep.subr.bf16.mxu1 %v3400_v4  ;;  %3195 = vmatprep.subr.bf16.mxu0 %v3402_v6  ;;  %v3404_v8 = vld [vmem:[%s4364_s2 + $0xc8] sm:$0xff]   ;;  %v3408_v12 = vld [vmem:[%s4364_s2 + $0xd0] sm:$0xff]  }
  0x53   :  { %3216 = vmatpush3.bf16.msra.mxu1 %v3401_v5  ;;  %v3405_v9 = vld [vmem:[%s4364_s2 + $0x88] sm:$0xff]   ;;  %v3409_v13 = vld [vmem:[%s4364_s2 + $0x90] sm:$0xff]   ;;  %v3410_v14 = vld [vmem:[%s4364_s2 + $0x58] sm:$0xff]  }
  0x54   :  { %3217 = vmatprep.subr.bf16.mxu1 %v3404_v8  ;;  %v3411_v15 = vld [vmem:[%s4364_s2 + $0x18] sm:$0xff]   ;;  %v3414_v18 = vld [vmem:[%s4364_s2 + $0x60] sm:$0xff]   ;;  %v3418_v22 = vld [vmem:[%s4364_s2 + $0x68] sm:$0xff]  }
  0x55   :  { %3196 = vmatpush3.bf16.msra.mxu0 %v3403_v7  ;;  %v3412_v16 = vld [vmem:[%s4364_s2 + $0xd8] sm:$0xff]   ;;  %v3415_v19 = vld [vmem:[%s4364_s2 + $0x20] sm:$0xff]   ;;  %v3419_v23 = vld [vmem:[%s4364_s2 + $0x28] sm:$0xff]   ;;  %s3956_s19 = sadd.s32 4294967293, %s3944_s12  ;;  %s3965_s22 = sadd.s32 4294967294, %s3944_s12 }
  0x56   :  { %3197 = vmatprep.subr.bf16.mxu0 %v3406_v10  ;;  %v3413_v17 = vld [vmem:[%s4364_s2 + $0x98] sm:$0xff]   ;;  %v3416_v20 = vld [vmem:[%s4364_s2 + $0xe0] sm:$0xff]   ;;  %v3420_v24 = vld [vmem:[%s4364_s2 + $0xe8] sm:$0xff]   ;;  %p1233_p7 = scmp.gt.s32.totalorder %s3956_s19, 0  ;;  %p1245_p8 = scmp.ge.s32.totalorder %s3956_s19, 0 }
  0x57   :  { %3218 = vmatpush3.bf16.msra.mxu1 %v3405_v9  ;;  %v3417_v21 = vld [vmem:[%s4364_s2 + $0xa0] sm:$0xff]   ;;  %v3421_v25 = vld [vmem:[%s4364_s2 + $0xa8] sm:$0xff]   ;;  %v3422_v26 = vld [vmem:[%s4364_s2 + $0x70] sm:$0xff]   ;;  %p1251_p9 = scmp.gt.s32.totalorder %s3965_s22, 0  ;;  %p1263_p11 = scmp.ge.s32.totalorder %s3965_s22, 0 }
  0x58   :  { %3219 = vmatprep.subr.bf16.mxu1 %v3408_v12  ;;  %v3423_v27 = vld [vmem:[%s4364_s2 + $0x30] sm:$0xff]   ;;  %v3426_v30 = vld [vmem:[%s4364_s2 + $0x78] sm:$0xff]   ;;  %v3433_v36 = vld [vmem:[%s4364_s2 + $0x140] sm:$0xff]  }
  0x59   :  { %3198 = vmatpush3.bf16.msra.mxu0 %v3407_v11  ;;  %v3424_v28 = vld [vmem:[%s4364_s2 + $0xf0] sm:$0xff]   ;;  %v3427_v31 = vld [vmem:[%s4364_s2 + $0x38] sm:$0xff]   ;;  %v3434_v37 = vld [vmem:[#allocation9 + $0x8] ss:$24 sps:$4 sm:$0xff]  }
  0x5a   :  { %3199 = vmatprep.subr.bf16.mxu0 %v3410_v14  ;;  %v3425_v29 = vld [vmem:[%s4364_s2 + $0xb0] sm:$0xff]   ;;  %v3428_v32 = vld [vmem:[%s4364_s2 + $0xf8] sm:$0xff]   ;;  %v3436_v38 = vld [vmem:[#allocation9 + $0xc] ss:$24 sps:$4 sm:$0xff]  }
  0x5b   :  { %3220 = vmatpush3.bf16.msra.mxu1 %v3409_v13  ;;  %v3429_v33 = vld [vmem:[#allocation9] ss:$24 sps:$4 sm:$0xff]   ;;  %v3431_v34 = vld [vmem:[#allocation9 + $0x4] ss:$24 sps:$4 sm:$0xff]   ;;  %614 = vmatprep.mubr.bf16.mxu1 %v3436_v38  ;;  %v3438_v40 = vld [vmem:[%s4364_s2 + $0x148] sm:$0xff]  }
  0x5c   :  { %3221 = vmatprep.subr.bf16.mxu1 %v3412_v16  ;;  %v3432_v35 = vld [vmem:[%s4364_s2 + $0xb8] sm:$0xff]   ;;  %573 = vmatprep.mubr.bf16.mxu0 %v3431_v34  ;;  %v3437_v39 = vld [vmem:[%s4364_s2 + $0x100] sm:$0xff]   ;;  %v3439_v41 = vld [vmem:[%s4364_s2 + $0x108] sm:$0xff]  }
  0x5d   :  { %3200 = vmatpush3.bf16.msra.mxu0 %v3411_v15  ;;  %v3440_v42 = vld [vmem:[%s4364_s2 + $0x150] sm:$0xff]   ;;  %v3442_v44 = vld [vmem:[%s4364_s2 + $0x158] sm:$0xff]   ;;  %v3444_v46 = vld [vmem:[%s4364_s2 + $0x160] sm:$0xff]  }
  0x5e   :  { %3201 = vmatprep.subr.bf16.mxu0 %v3414_v18  ;;  %v3441_v43 = vld [vmem:[%s4364_s2 + $0x110] sm:$0xff]   ;;  %v3443_v45 = vld [vmem:[%s4364_s2 + $0x118] sm:$0xff]   ;;  %v3445_v47 = vld [vmem:[%s4364_s2 + $0x120] sm:$0xff]  }
  0x5f   :  { %3222 = vmatpush3.bf16.msra.mxu1 %v3413_v17  ;;  %v3446_v48 = vld [vmem:[%s4364_s2 + $0x168] sm:$0xff]   ;;  %v3448_v51 = vld [vmem:[%s4364_s2 + $0x170] sm:$0xff]   ;;  %v3450_v53 = vld [vmem:[%s4364_s2 + $0x178] sm:$0xff]  }
  0x60   :  { %3223 = vmatprep.subr.bf16.mxu1 %v3416_v20  ;;  %v3454_v49 = vld [vmem:[#allocation9 + $0x14] ss:$24 sps:$4 sm:$0xff]   ;;  %v3451_v54 = vld [vmem:[%s4364_s2 + $0x138] sm:$0xff]   ;;  %v3452_v55 = vld [vmem:[#allocation9 + $0x10] ss:$24 sps:$4 sm:$0xff]  }
  0x61   :  { %3202 = vmatpush3.bf16.msra.mxu0 %v3415_v19  ;;  %v3447_v50 = vld [vmem:[%s4364_s2 + $0x128] sm:$0xff]   ;;  %v3449_v52 = vld [vmem:[%s4364_s2 + $0x130] sm:$0xff]   ;;  %s3663_s2 = smov 96  }
  0x62   :  { %3203 = vmatprep.subr.bf16.mxu0 %v3418_v22  ;;  %v3455_v56 = vld [vmem:[#allocation10] ss:$16 sps:$4 sm:$0xff]   ;;  %v3457_v57 = vld [vmem:[#allocation10 + $0x4] ss:$16 sps:$4 sm:$0xff]   ;;  %v3458_v58 = vld [vmem:[#allocation10 + $0x8] ss:$16 sps:$4 sm:$0xff]  }
  0x63   :  { %3224 = vmatpush3.bf16.msra.mxu1 %v3417_v21  ;;  %v3460_v59 = vld [vmem:[#allocation10 + $0xc] ss:$16 sps:$4 sm:$0xff]   ;;  %v3463_v60 = vld [vmem:[#allocation10 + $0x24] ss:$16 sps:$4 sm:$0xff]   ;;  %v3461_v62 = vld [vmem:[#allocation10 + $0x20] ss:$16 sps:$4 sm:$0xff]  }
  0x64   :  { %3225 = vmatprep.subr.bf16.mxu1 %v3420_v24  ;;  %v3466_v61 = vld [vmem:[#allocation10 + $0x2c] ss:$16 sps:$4 sm:$0xff]   ;;  %v3464_v63 = vld [vmem:[#allocation10 + $0x28] ss:$16 sps:$4 sm:$0xff]   ;;  %v3469_v2 = vld [vmem:[#allocation10 + $0x44] ss:$16 sps:$4 sm:$0xff]  }
  0x65   :  { %3204 = vmatpush3.bf16.msra.mxu0 %v3419_v23  ;;  %v3472_v3 = vld [vmem:[#allocation10 + $0x4c] ss:$16 sps:$4 sm:$0xff]   ;;  %v3467_v4 = vld [vmem:[#allocation10 + $0x40] ss:$16 sps:$4 sm:$0xff]   ;;  %v3470_v5 = vld [vmem:[#allocation10 + $0x48] ss:$16 sps:$4 sm:$0xff]  }
  0x66   :  { %3205 = vmatprep.subr.bf16.mxu0 %v3422_v26  ;;  %v3475_v6 = vld [vmem:[#allocation10 + $0x64] ss:$16 sps:$4 sm:$0xff]   ;;  %v3478_v7 = vld [vmem:[#allocation10 + $0x6c] ss:$16 sps:$4 sm:$0xff]   ;;  %v3473_v8 = vld [vmem:[#allocation10 + $0x60] ss:$16 sps:$4 sm:$0xff]  }
  0x67   :  { %3226 = vmatpush3.bf16.msra.mxu1 %v3421_v25  ;;  %v3476_v9 = vld [vmem:[#allocation10 + $0x68] ss:$16 sps:$4 sm:$0xff]   ;;  %v3481_v10 = vld [vmem:[#allocation10 + $0x84] ss:$16 sps:$4 sm:$0xff]   ;;  %v3484_v11 = vld [vmem:[#allocation10 + $0x8c] ss:$16 sps:$4 sm:$0xff]  }
  0x68   :  { %3227 = vmatprep.subr.bf16.mxu1 %v3424_v28  ;;  %v3479_v12 = vld [vmem:[#allocation10 + $0x80] ss:$16 sps:$4 sm:$0xff]   ;;  %v3482_v13 = vld [vmem:[#allocation10 + $0x88] ss:$16 sps:$4 sm:$0xff]   ;;  %v3487_v34 = vld [vmem:[#allocation10 + $0xa4] ss:$16 sps:$4 sm:$0xff]  }
  0x69   :  { %3206 = vmatpush3.bf16.msra.mxu0 %v3423_v27  ;;  %v3040_v15 = vld [vmem:[#allocation12] ss:$0 sm:$0xff] }
  0x6a   :  { %3207 = vmatprep.subr.bf16.mxu0 %v3426_v30 }
  0x6b   :  { %3228 = vmatpush3.bf16.msra.mxu1 %v3425_v29 }
  0x6c   :  { %3229 = vmatprep.subr.bf16.mxu1 %v3428_v32 }
  0x6d   :  { %3208 = vmatpush3.bf16.msra.mxu0 %v3427_v31  ;;  %v664_v31 = vlaneseq }
  0x6e   :  { %3237 = vmatprep.subr.bf16.mxu0 %v3433_v36 }
  0x6f   :  { %3230 = vmatpush3.bf16.msra.mxu1 %v3432_v35  ;;  %v3912_v32 = vshrl.u32 %v664_v31, 7  ;;  %v3488_v35 = vld [vmem:[#allocation10 + $0xa8] ss:$16 sps:$4 sm:$0xff]  }
  0x70   :  { %574 = vmatmul.mubr.bf16.vlgmr.msra.gmra.mrb[0].mxu0 %v3429_v33  ;;  %977 = vmatprep.subr.bf16.mxu1 %v3457_v57  ;;  %v3485_v33 = vld [vmem:[#allocation10 + $0xa0] ss:$16 sps:$4 sm:$0xff]  }
  0x71   :  { %3238 = vmatpush3.bf16.msra.mxu0 %v3437_v39  ;;  %655 = vmatprep.mubr.bf16.mxu0 %v3454_v49  ;;  %v666_v36 = vadd.s32 8, %v3912_v32  ;;  %v3494_v49 = vld [vmem:[#allocation10 + $0xc8] ss:$16 sps:$4 sm:$0xff]   ;;  %vm706_vm0 = vcmp.lt.s32.totalorder %v3912_v32, 2  ;;  %vm719_vm2 = vcmp.lt.s32.totalorder %v3912_v32, 1  ;;  %vm693_vm3 = vcmp.lt.s32.totalorder %v3912_v32, 3 }
  0x72   :  { %615 = vmatmul.mubr.bf16.vlgmr.msra.gmra.mrb[0].mxu1 %v3434_v37  ;;  %3239 = vmatprep.subr.bf16.mxu0 %v3438_v40  ;;  %v3490_v37 = vld [vmem:[#allocation10 + $0xac] ss:$16 sps:$4 sm:$0xff]   ;;  %v671_v40 = vand.u32 7, %v3912_v32 }
  0x73   :  { %978 = vmatpush1.bf16.msra.mxu1 %v3455_v56 }
  0x74   :  { %979 = vmatprep.subr.bf16.mxu1 %v3463_v60  ;;  %vm709_vm1 = vcmp.ge.s32.totalorder %v671_v40, 2  ;;  %vm722_vm5 = vcmp.ge.s32.totalorder %v671_v40, 1  ;;  %v3497_v60 = vld [vmem:[#allocation10 + $0xe0] ss:$16 sps:$4 sm:$0xff]   ;;  %vm696_vm7 = vcmp.ge.s32.totalorder %v671_v40, 3 }
  0x75   :  { %3240 = vmatpush3.bf16.msra.mxu0 %v3439_v41 }
  0x76   :  { %3241 = vmatprep.subr.bf16.mxu0 %v3440_v42 }
  0x77   :  { %980 = vmatpush1.bf16.msra.mxu1 %v3461_v62  ;;  %v3500_v62 = vld [vmem:[#allocation10 + $0xe8] ss:$16 sps:$4 sm:$0xff]  }
  0x78   :  { %981 = vmatprep.subr.bf16.mxu1 %v3469_v2 }
  0x79   :  { %3242 = vmatpush3.bf16.msra.mxu0 %v3441_v43  ;;  %v678_v43 = vand.u32 7, %v666_v36  ;;  %v112_v36 = vld [vmem:[#allocation12 + $0x1] sm:$0xf] }
  0x7a   :  { %3243 = vmatprep.subr.bf16.mxu0 %v3442_v44 }
  0x7b   :  { %982 = vmatpush1.bf16.msra.mxu1 %v3467_v4  ;;  %vm710_vm4 = vcmp.ge.s32.totalorder %v678_v43, 2  ;;  %vm723_vm6 = vcmp.ge.s32.totalorder %v678_v43, 1  ;;  %vm697_vm8 = vcmp.ge.s32.totalorder %v678_v43, 3 }
  0x7c   :  { %983 = vmatprep.subr.bf16.mxu1 %v3475_v6 }
  0x7d   :  { %3244 = vmatpush3.bf16.msra.mxu0 %v3443_v45  ;;  %v3491_v45 = vld [vmem:[#allocation10 + $0xc0] ss:$16 sps:$4 sm:$0xff]  }
  0x7e   :  { %3245 = vmatprep.subr.bf16.mxu0 %v3444_v46  ;;  %v3493_v46 = vld [vmem:[#allocation10 + $0xc4] ss:$16 sps:$4 sm:$0xff]  }
  0x7f   :  { %984 = vmatpush1.bf16.msra.mxu1 %v3473_v8 }
  0x80   :  { %985 = vmatprep.subr.bf16.mxu1 %v3481_v10 }
  0x81   :  { %3246 = vmatpush3.bf16.msra.mxu0 %v3445_v47 }
  0x82   :  { %3247 = vmatprep.subr.bf16.mxu0 %v3446_v48 }
  0x83   :  { %986 = vmatpush1.bf16.msra.mxu1 %v3479_v12 }
  0x84   :  { %987 = vmatprep.subr.bf16.mxu1 %v3487_v34  ;;  %v3981_v34 = vsub.s32 0, %v3912_v32 }
  0x85   :  { %3248 = vmatpush3.bf16.msra.mxu0 %v3447_v50  ;;  %v3496_v50 = vld [vmem:[#allocation10 + $0xcc] ss:$16 sps:$4 sm:$0xff]  }
  0x86   :  { %3249 = vmatprep.subr.bf16.mxu0 %v3448_v51 }
  0x87   :  { %988 = vmatpush1.bf16.msra.mxu1 %v3485_v33 }
  0x88   :  { %989 = vmatprep.subr.bf16.mxu1 %v3493_v46 }
  0x89   :  { %3250 = vmatpush3.bf16.msra.mxu0 %v3449_v52 }
  0x8a   :  { %3251 = vmatprep.subr.bf16.mxu0 %v3450_v53 }
  0x8b   :  { %990 = vmatpush1.bf16.msra.mxu1 %v3491_v45 }
  0x8d   :  { %3252 = vmatpush3.bf16.msra.mxu0 %v3451_v54  ;;  %v3499_v54 = vld [vmem:[#allocation10 + $0xe4] ss:$16 sps:$4 sm:$0xff]  }
  0x8e   :  { %1020 = vmatprep.subr.bf16.mxu0 %v3460_v59  ;;  %991 = vmatprep.subr.bf16.mxu1 %v3499_v54 }
  0x8f   :  { %992 = vmatpush1.bf16.msra.mxu1 %v3497_v60 }
  0x90   :  { %656 = vmatmul.mubr.bf16.vlgmr.msra.gmra.mrb[4].mxu0 %v3452_v55  ;;  %v3502_v55 = vld [vmem:[#allocation10 + $0xec] ss:$16 sps:$4 sm:$0xff]  }
  0x91   :  { %1021 = vmatpush1.bf16.msra.mxu0 %v3458_v58 }
  0x92   :  { %1022 = vmatprep.subr.bf16.mxu0 %v3466_v61 }
  0x95   :  { %1023 = vmatpush1.bf16.msra.mxu0 %v3464_v63 }
  0x96   :  { %1024 = vmatprep.subr.bf16.mxu0 %v3472_v3 }
  0x99   :  { %1025 = vmatpush1.bf16.msra.mxu0 %v3470_v5 }
  0x9a   :  { %1026 = vmatprep.subr.bf16.mxu0 %v3478_v7 }
  0x9d   :  { %1027 = vmatpush1.bf16.msra.mxu0 %v3476_v9 }
  0x9e   :  { %1028 = vmatprep.subr.bf16.mxu0 %v3484_v11 }
  0xa1   :  { %1029 = vmatpush1.bf16.msra.mxu0 %v3482_v13  ;;  %v3664_v13 = vmov 0  }
  0xa2   :  { %1030 = vmatprep.subr.bf16.mxu0 %v3490_v37  ;;  %1009 = vmatprep.mubr.bf16.mxu1 %v3664_v13  ;;  %v3990_v37 = vsub.s32 1, %v3912_v32 }
  0xa3   :  { %1052 = vmatprep.mubr.bf16.mxu0 %v3664_v13 }
  0xa5   :  { %1031 = vmatpush1.bf16.msra.mxu0 %v3488_v35  ;;  %v3984_v35 = vsub.s32 2, %v3912_v32 }
  0xa6   :  { %1032 = vmatprep.subr.bf16.mxu0 %v3496_v50 }
  0xa7   :  { %v808_v40 = vrot.slane %v112_v36, %v3984_v35 }
  0xa9   :  { %1033 = vmatpush1.bf16.msra.mxu0 %v3494_v49 }
  0xaa   :  { %1034 = vmatprep.subr.bf16.mxu0 %v3502_v55 }
  0xad   :  { %1035 = vmatpush1.bf16.msra.mxu0 %v3500_v62 }
 0x143   :  { %v3209_v14 = vpop.f32.mrb[0].mxu0 }
 0x144   :  { %v3210_v16 = vpop.f32.mrb[1].mxu0 }
 0x145   :  { %v3211_v17 = vadd.f32 %v3210_v16, %v3209_v14  ;;  %v3212_v18 = vpop.f32.mrb[2].mxu0  ;;  %v3231_v21 = vpop.f32.mrb[0].mxu1 }
 0x146   :  { %v3213_v19 = vpop.f32.mrb[3].mxu0  ;;  %v3232_v23 = vpop.f32.mrb[1].mxu1 }
 0x147   :  { %v576_v20 = vadd.f32 %v3211_v17, %v3040_v15  ;;  %v3214_v22 = vadd.f32 %v3213_v19, %v3212_v18  ;;  %v3233_v25 = vadd.f32 %v3232_v23, %v3231_v21  ;;  %v3234_v26 = vpop.f32.mrb[2].mxu1 }
 0x148   :  { %v3235_v27 = vpop.f32.mrb[3].mxu1 }
 0x149   :  { %v579_v24 = vadd.f32 %v3214_v22, %v3040_v15  ;;  %v617_v28 = vadd.f32 %v3233_v25, %v576_v20  ;;  %v3236_v29 = vadd.f32 %v3235_v27, %v3234_v26 }
 0x14b   :  { %v620_v30 = vadd.f32 %v3236_v29, %v579_v24 }
 0x163   :  { %v3253_v38 = vpop.f32.mrb[4].mxu0 }
 0x164   :  { %v3254_v39 = vpop.f32.mrb[5].mxu0 }
 0x165   :  { %v3255_v41 = vadd.f32 %v3254_v39, %v3253_v38  ;;  %v3256_v42 = vpop.f32.mrb[6].mxu0  ;;  %v3993_v38 = vsub.s32 3, %v3912_v32  ;;  %v800_v39 = vrot.slane %v112_v36, %v3981_v34  ;;  %v804_v32 = vrot.slane %v112_v36, %v3990_v37 }
 0x166   :  { %v3257_v44 = vpop.f32.mrb[7].mxu0 }
 0x167   :  { %v658_v47 = vadd.f32 %v3255_v41, %v617_v28  ;;  %v3258_v48 = vadd.f32 %v3257_v44, %v3256_v42  ;;  %v812_v41 = vrot.slane %v112_v36, %v3993_v38 }
 0x169   :  { %v661_v51 = vadd.f32 %v3258_v48, %v620_v30  ;;  %v704_v52 = vrot.slane %v658_v47, 6  ;;  %v717_v53 = vrot.slane %v658_v47, 7  ;;  %v691_v61 = vrot.slane %v658_v47, 5 }
 0x16b   :  { %v692_v56 = vrot.slane %v661_v51, 5  ;;  %v3393_v57 = vpack.i.bf16 %v661_v51, %v658_v47  ;;  %v705_v58 = vrot.slane %v661_v51, 6  ;;  %v718_v59 = vrot.slane %v661_v51, 7 }
 0x16d   :  { %3394 = vrot.lane.b32.xlu1 %v3393_v57, %s3663_s2  ;;  %v707_v63 = vsel %vm706_vm0, %v704_v52, %v705_v58  ;;  %v708_v2 = vsel %vm706_vm0, %v705_v58, %v704_v52  ;;  %v720_v3 = vsel %vm719_vm2, %v717_v53, %v718_v59  ;;  %v721_v4 = vsel %vm719_vm2, %v718_v59, %v717_v53  ;;  %s3970_s2 = sadd.s32 4294967295, %s3944_s12 }
 0x16e   :  { %v715_v5 = vsel %vm709_vm1, %v708_v2, 0.0  ;;  %v716_v6 = vsel %vm710_vm4, %v707_v63, 0.0  ;;  %v728_v7 = vsel %vm722_vm5, %v721_v4, 0.0  ;;  %v729_v8 = vsel %vm723_vm6, %v720_v3, 0.0  ;;  %p1269_p10 = scmp.gt.s32.totalorder %s3970_s2, 0  ;;  %p1281_p12 = scmp.ge.s32.totalorder %s3970_s2, 0 }
 0x16f   :  { %v3383_v9 = vpack.i.bf16 %v716_v6, %v715_v5  ;;  %v3388_v10 = vpack.i.bf16 %v729_v8, %v728_v7  ;;  %v694_v11 = vsel %vm693_vm3, %v691_v61, %v692_v56  ;;  %v695_v12 = vsel %vm693_vm3, %v692_v56, %v691_v61 }
 0x170   :  { %v702_v14 = vsel %vm696_vm7, %v695_v12, 0.0  ;;  %v703_v15 = vsel %vm697_vm8, %v694_v11, 0.0  ;;  %vm1403_vm4 = vcmask 1040384  }
 0x171   :  { %3384 = vrot.lane.b32.xlu0 %v3383_v9, %s3665_s26  ;;  %s1234_s26 = scalar_select %p1233_p7, %s3956_s19, 0 }
 0x175   :  { %3389 = vrot.lane.b32.xlu0 %v3388_v10, %s3658_s30  ;;  %s3938_s30 = sld [smem:[#allocation5]] }
 0x17b   :  { %s3127_s27 = sadd.s32 4294967293, %s3938_s30  ;;  %s3130_s29 = sadd.s32 4294967294, %s3938_s30 }
 0x17c   :  { %p1081_p13 = scmp.gt.s32.totalorder %s3127_s27, 0  ;;  %p1098_p0 = scmp.gt.s32.totalorder %s3130_s29, 0 }
 0x17d   :  { %s3133_s8 = sadd.s32 4294967295, %s3938_s30  ;;  %p1131_p1 = scmp.gt.s32.totalorder %s3938_s30, 0 }
 0x17e   :  { %s1082_s28 = scalar_select %p1081_p13, %s3127_s27, 0 }
 0x17f   :  { %s1099_s0 = scalar_select %p1098_p0, %s3130_s29, 0 }
 0x180   :  { %s1083_s6 = sshra.s32 %s1082_s28, 3  ;;  %s1086_s9 = sand.u32 7, %s1082_s28 }
 0x181   :  { %s3185_s10 = sshll.u32 %s1083_s6, 5  ;;  %p1092_p2 = scmp.ge.s32.totalorder %s3127_s27, 0 }
 0x182   :  { %s3946_s13 = sadd.s32 %s3185_s10, %s1086_s9  ;;  %p1109_p3 = scmp.ge.s32.totalorder %s3130_s29, 0 }
 0x183   :  { %p1115_p4 = scmp.gt.s32.totalorder %s3133_s8, 0  ;;  %s1100_s14 = sshra.s32 %s1099_s0, 3 }
 0x184   :  { %p1126_p5 = scmp.ge.s32.totalorder %s3133_s8, 0  ;;  %p1142_p6 = scmp.ge.s32.totalorder %s3938_s30, 0 }
 0x185   :  { %s3949_s15 = scalar_select %p1092_p2, 1, 0 }
 0x186   :  { %s1103_s16 = sand.u32 7, %s1099_s0  ;;  %s3186_s17 = sshll.u32 %s1100_s14, 5 }
 0x187   :  { %s3951_s18 = scalar_select %p1109_p3, 1, 0  ;;  %v1094_v4 = vstv %s3949_s15 }
 0x188   :  { %s4383_s8 = smov (!%p1115_p4, %s3133_s8), 0  ;;  %s3953_s11 = sadd.s32 %s3186_s17, %s1103_s16  ;;  %vm1095_vm12 = vcmp.eq.s32.totalorder %v1094_v4, 1 }
 0x189   :  { %s1132_s20 = scalar_select %p1131_p1, %s3938_s30, 0  ;;  %v1111_v5 = vstv %s3951_s18 }
 0x18a   :  { %s3961_s4 = scalar_select %p1126_p5, 1, 0  ;;  %vm1112_vm13 = vcmp.eq.s32.totalorder %v1111_v5, 1 }
 0x18b   :  { %s1117_s21 = sshra.s32 %s4383_s8, 3  ;;  %s1133_s23 = sshra.s32 %s1132_s20, 3 }
 0x18c   :  { %s1120_s24 = sand.u32 7, %s4383_s8  ;;  %s3187_s1 = sshll.u32 %s1117_s21, 5  ;;  %v1128_v6 = vstv %s3961_s4 }
 0x18d   :  { %s1136_s3 = sand.u32 7, %s1132_s20  ;;  %s3188_s25 = sshll.u32 %s1133_s23, 5  ;;  %vm4057_vm14 = vcmp.eq.s32.totalorder %v1128_v6, 1 }
 0x18e   :  { %s3975_s27 = scalar_select %p1142_p6, 1, 0 }
 0x18f   :  { %s3977_s28 = sadd.s32 %s3187_s1, %s1120_s24  ;;  %s3986_s29 = sadd.s32 %s3188_s25, %s1136_s3 }
 0x190   :  { %s1235_s30 = sadd.s32 8, %s1234_s26  ;;  %p1286_p13 = scmp.gt.s32.totalorder %s3944_s12, 0  ;;  %v1144_v7 = vstv %s3975_s27 }
 0x191   :  { %s3999_s6 = scalar_select %p1251_p9, %s3965_s22, 0  ;;  %vm4061_vm15 = vcmp.eq.s32.totalorder %v1144_v7, 1 }
 0x192   :  { %s4002_s8 = scalar_select %p1269_p10, %s3970_s2, 0 }
 0x193   :  { %s4006_s9 = sshra.s32 %s1235_s30, 3  ;;  %s4015_s0 = sand.u32 7, %s1235_s30 }
 0x194   :  { %s4013_s10 = scalar_select %p1245_p8, 1, 0 }
 0x195   :  { %s1253_s14 = sadd.s32 8, %s3999_s6  ;;  %s3189_s16 = sshll.u32 %s4006_s9, 5 }
 0x196   :  { %s1271_s17 = sadd.s32 8, %s4002_s8  ;;  %s4025_s19 = sshra.s32 %s1253_s14, 3  ;;  %v1247_v8 = vstv %s4013_s10 }
 0x197   :  { %s4023_s20 = scalar_select %p1286_p13, %s3944_s12, 0  ;;  %vm4065_vm0 = vcmp.eq.s32.totalorder %v1247_v8, 1 }
 0x198   :  { %p1298_p0 = scmp.ge.s32.totalorder %s3944_s12, 0  ;;  %s1257_s23 = sand.u32 7, %s1253_s14 }
 0x199   :  { %s4030_s21 = scalar_select %p1263_p11, 1, 0 }
 0x19a   :  { %s1272_s24 = sshra.s32 %s1271_s17, 3  ;;  %s3190_s1 = sshll.u32 %s4025_s19, 5 }
 0x19b   :  { %s1288_s22 = sadd.s32 8, %s4023_s20  ;;  %s1275_s25 = sand.u32 7, %s1271_s17  ;;  %v1265_v9 = vstv %s4030_s21 }
 0x19c   :  { %s1282_s3 = scalar_select %p1281_p12, 1, 0  ;;  %vm4069_vm1 = vcmp.eq.s32.totalorder %v1265_v9, 1 }
 0x19d   :  { %s3191_s26 = sshll.u32 %s1272_s24, 5  ;;  %s4043_s30 = sadd.s32 %s3189_s16, %s4015_s0 }
 0x19e   :  { %s1289_s6 = sshra.s32 %s1288_s22, 3  ;;  %s4050_s2 = sadd.s32 %s3190_s1, %s1257_s23  ;;  %v1283_v10 = vstv %s1282_s3 }
 0x19f   :  { %s1299_s14 = scalar_select %p1298_p0, 1, 0  ;;  %vm4073_vm2 = vcmp.eq.s32.totalorder %v1283_v10, 1 }
 0x1a0   :  { %s4052_s20 = sadd.s32 %s3191_s26, %s1275_s25  ;;  %s1292_s8 = sand.u32 7, %s1288_s22 }
 0x1a1   :  { %s3192_s9 = sshll.u32 %s1289_s6, 5  ;;  %v1300_v12 = vstv %s1299_s14  ;;  %s1090_s15 = scalar_lea.vmem [#allocation3], %s3946_s13 }
 0x1a2   :  { %s4077_s12 = sadd.s32 %s3192_s9, %s1292_s8  ;;  %s1107_s18 = scalar_lea.vmem [#allocation3], %s3953_s11  ;;  %vm4086_vm3 = vcmp.eq.s32.totalorder %v1300_v12, 1 }
 0x1a3   :  { %s1124_s4 = scalar_lea.vmem [#allocation3], %s3977_s28  ;;  %s1140_s13 = scalar_lea.vmem [#allocation3], %s3986_s29 }
 0x1a4   :  { %s1243_s11 = scalar_lea.vmem [#allocation3], %s4043_s30  ;;  %s1261_s27 = scalar_lea.vmem [#allocation3], %s4050_s2 }
 0x1a5   :  { %s1279_s28 = scalar_lea.vmem [#allocation3], %s4052_s20  ;;  %s1296_s29 = scalar_lea.vmem [#allocation3], %s4077_s12 }
 0x1df   :  { %v3395_v19 = vpop.permute.xlu1 %3394 }
 0x1e0   :  { %v3397_v23 = vunpack.i.h.bf16 %v3395_v19  ;;  %v3396_v24 = vunpack.i.l.bf16 %v3395_v19 }
 0x1e3   :  { %v3385_v16 = vpop.permute.xlu0 %3384 }
 0x1e4   :  { %v3387_v17 = vunpack.i.h.bf16 %v3385_v16  ;;  %v3386_v18 = vunpack.i.l.bf16 %v3385_v16 }
 0x1e6   :  { %v755_v25 = vsel %vm754_vm9, %v702_v14, %v3386_v18  ;;  %v756_v26 = vsel %vm754_vm9, %v703_v15, %v3387_v17 }
 0x1e7   :  { %v3390_v20 = vpop.permute.xlu0 %3389 }
 0x1e8   :  { %v3392_v21 = vunpack.i.h.bf16 %v3390_v20  ;;  %v3391_v22 = vunpack.i.l.bf16 %v3390_v20 }
 0x1ea   :  { %v758_v27 = vsel %vm757_vm10, %v755_v25, %v3391_v22  ;;  %v759_v28 = vsel %vm757_vm10, %v756_v26, %v3392_v21 }
 0x1eb   :  { %v761_v29 = vsel %vm760_vm11, %v758_v27, %v3396_v24  ;;  %v762_v30 = vsel %vm760_vm11, %v759_v28, %v3397_v23 }
 0x1ec   :  { %v763_v33 = vpack.c.bf16 %v762_v30, %v761_v29 }
 0x1ee   :  { %1010 = vmatmul.mubr.bf16.vlgmr.msra.gmra.mrb[4].mxu1 %v763_v33  ;;  %1053 = vmatmul.mubr.bf16.vlgmr.msra.gmra.mrb[8].mxu0 %v763_v33 }
 0x2c1   :  { %v1011_v42 = vpop.f32.mrb[4].mxu1  ;;  %v1054_v43 = vpop.f32.mrb[8].mxu0 }
 0x2c2   :  { %v1012_v44 = vadd.f32 %v1011_v42, %v800_v39  ;;  %v1055_v45 = vadd.f32 %v1054_v43, %v808_v40  ;;  %v1013_v46 = vpop.f32.mrb[5].mxu1  ;;  %v1056_v47 = vpop.f32.mrb[9].mxu0 }
 0x2c3   :  { %v1014_v48 = vadd.f32 %v1013_v46, %v804_v32  ;;  %v1057_v49 = vadd.f32 %v1056_v47, %v812_v41  ;;  %v1015_v50 = vpop.f32.mrb[6].mxu1  ;;  %v1058_v51 = vpop.f32.mrb[10].mxu0 }
 0x2c4   :  { %v1063_v52 = vmax.f32 %v1012_v44, 0.0  ;;  %v1065_v53 = vmax.f32 %v1055_v45, 0.0  ;;  %v1016_v54 = vadd.f32 %v1015_v50, %v800_v39  ;;  %v1059_v55 = vadd.f32 %v1058_v51, %v808_v40  ;;  %v1017_v56 = vpop.f32.mrb[7].mxu1  ;;  %v1060_v57 = vpop.f32.mrb[11].mxu0 }
 0x2c5   :  { %v1064_v58 = vmax.f32 %v1014_v48, 0.0  ;;  %v1066_v59 = vmax.f32 %v1057_v49, 0.0  ;;  %v1018_v60 = vadd.f32 %v1017_v56, %v804_v32  ;;  %v1061_v61 = vadd.f32 %v1060_v57, %v812_v41 }
 0x2c6   :  { %1071 = vst [vmem:[#allocation3] sm:$0xff] %v1063_v52  ;;  %1073 = vst [vmem:[#allocation3 + $0x10] sm:$0xff] %v1065_v53  ;;  %v1067_v62 = vmax.f32 %v1016_v54, 0.0  ;;  %v1069_v63 = vmax.f32 %v1059_v55, 0.0 }
 0x2c7   :  { %1072 = vst [vmem:[#allocation3 + $0x8] sm:$0xff] %v1064_v58  ;;  %1074 = vst [vmem:[#allocation3 + $0x18] sm:$0xff] %v1066_v59  ;;  %v1068_v2 = vmax.f32 %v1018_v60, 0.0  ;;  %v1070_v3 = vmax.f32 %v1061_v61, 0.0 }
 0x2c8   :  { %1075 = vst [vmem:[#allocation3 + $0x20] sm:$0xff] %v1067_v62  ;;  %1077 = vst [vmem:[#allocation3 + $0x30] sm:$0xff] %v1069_v63 }
 0x2c9   :  { %1076 = vst [vmem:[#allocation3 + $0x28] sm:$0xff] %v1068_v2  ;;  %1078 = vst [vmem:[#allocation3 + $0x38] sm:$0xff] %v1070_v3 }
 0x2d0   :  { %v1091_v17 = vld [vmem:[%s1090_s15] ss:$8 sm:$0xf] }
 0x2d1   :  { %v1108_v18 = vld [vmem:[%s1107_s18] ss:$8 sm:$0xf]  ;;  %v4081_v19 = vsel %vm1095_vm12, %v1091_v17, 0.0 }
 0x2d2   :  { %v4083_v20 = vsel %vm1112_vm13, %v1108_v18, 0.0  ;;  %v1125_v21 = vld [vmem:[%s1124_s4] ss:$8 sm:$0xf]  ;;  %v1151_v25 = vrot.slane %v4081_v19, %v3981_v34  ;;  %v1155_v26 = vrot.slane %v4081_v19, %v3990_v37  ;;  %v1159_v27 = vrot.slane %v4081_v19, %v3984_v35 }
 0x2d3   :  { %v4092_v23 = vsel %vm4057_vm14, %v1125_v21, 0.0  ;;  %v1141_v24 = vld [vmem:[%s1140_s13] ss:$8 sm:$0xf]  ;;  %v1163_v29 = vrot.slane %v4081_v19, %v3993_v38  ;;  %v1172_v30 = vrot.slane %v4083_v20, %v3981_v34  ;;  %v1176_v33 = vrot.slane %v4083_v20, %v3990_v37 }
 0x2d4   :  { %v4103_v28 = vsel %vm4061_vm15, %v1141_v24, 0.0  ;;  %v1244_v36 = vld [vmem:[%s1243_s11] ss:$8 sm:$0xf]  ;;  %v1180_v39 = vrot.slane %v4083_v20, %v3984_v35  ;;  %v1184_v40 = vrot.slane %v4083_v20, %v3993_v38  ;;  %v1193_v32 = vrot.slane %v4092_v23, %v3981_v34 }
 0x2d5   :  { %v1197_v41 = vrot.slane %v4092_v23, %v3990_v37  ;;  %v1262_v42 = vld [vmem:[%s1261_s27] ss:$8 sm:$0xf]  ;;  %v1201_v44 = vrot.slane %v4092_v23, %v3984_v35  ;;  %v1205_v45 = vrot.slane %v4092_v23, %v3993_v38  ;;  %v1214_v46 = vrot.slane %v4103_v28, %v3981_v34 }
 0x2d6   :  { %v1280_v43 = vld [vmem:[%s1279_s28] ss:$8 sm:$0xf]  ;;  %v1218_v47 = vrot.slane %v4103_v28, %v3990_v37  ;;  %v1222_v49 = vrot.slane %v4103_v28, %v3984_v35  ;;  %v1226_v50 = vrot.slane %v4103_v28, %v3993_v38  ;;  %v1249_v51 = vsel %vm4065_vm0, %v1244_v36, 0.0 }
 0x2d7   :  { %v1297_v48 = vld [vmem:[%s1296_s29] ss:$8 sm:$0xf]  ;;  %v1267_v52 = vsel %vm4069_vm1, %v1262_v42, 0.0  ;;  %v1285_v53 = vsel %vm4073_vm2, %v1280_v43, 0.0  ;;  %v1307_v55 = vrot.slane %v1249_v51, %v3981_v34  ;;  %v1311_v56 = vrot.slane %v1249_v51, %v3990_v37 }
 0x2d8   :  { %v1302_v54 = vsel %vm4086_vm3, %v1297_v48, 0.0  ;;  %v1315_v57 = vrot.slane %v1249_v51, %v3984_v35  ;;  %v1319_v58 = vrot.slane %v1249_v51, %v3993_v38  ;;  %v1324_v59 = vrot.slane %v1267_v52, %v3981_v34 }
 0x2d9   :  { %v1328_v60 = vrot.slane %v1267_v52, %v3990_v37  ;;  %v1332_v61 = vrot.slane %v1267_v52, %v3984_v35  ;;  %v1336_v62 = vrot.slane %v1267_v52, %v3993_v38  ;;  %v1341_v63 = vrot.slane %v1285_v53, %v3981_v34 }
 0x2da   :  { %v1345_v2 = vrot.slane %v1285_v53, %v3990_v37  ;;  %v1349_v3 = vrot.slane %v1285_v53, %v3984_v35  ;;  %v1353_v4 = vrot.slane %v1285_v53, %v3993_v38  ;;  %v1358_v5 = vrot.slane %v1302_v54, %v3981_v34 }
 0x2db   :  { %v1362_v6 = vrot.slane %v1302_v54, %v3990_v37  ;;  %v1366_v7 = vrot.slane %v1302_v54, %v3984_v35  ;;  %v1370_v8 = vrot.slane %v1302_v54, %v3993_v38  ;;  %v1371_v9 = vrot.slane %v1307_v55, 7 }
 0x2dc   :  { %v1372_v10 = vrot.slane %v1311_v56, 7  ;;  %v1373_v11 = vrot.slane %v1315_v57, 7  ;;  %v1374_v12 = vrot.slane %v1319_v58, 7  ;;  %v1375_v13 = vrot.slane %v1324_v59, 7 }
 0x2dd   :  { %v1376_v14 = vrot.slane %v1328_v60, 7  ;;  %v1377_v15 = vrot.slane %v1332_v61, 7  ;;  %v1378_v16 = vrot.slane %v1336_v62, 7  ;;  %v1379_v17 = vrot.slane %v1341_v63, 7 }
 0x2de   :  { %v1380_v18 = vrot.slane %v1345_v2, 7  ;;  %v1381_v20 = vrot.slane %v1349_v3, 7  ;;  %v1382_v21 = vrot.slane %v1353_v4, 7  ;;  %v1383_v22 = vrot.slane %v1358_v5, 7 }
 0x2df   :  { %v1384_v23 = vrot.slane %v1362_v6, 7  ;;  %v1385_v24 = vrot.slane %v1366_v7, 7  ;;  %v1386_v28 = vrot.slane %v1370_v8, 7  ;;  %v1404_v36 = vsel %vm1403_vm4, %v1151_v25, %v1371_v9 }
 0x2e0   :  { %v1405_v42 = vsel %vm1403_vm4, %v1155_v26, %v1372_v10  ;;  %v1406_v43 = vsel %vm1403_vm4, %v1159_v27, %v1373_v11  ;;  %v1407_v48 = vsel %vm1403_vm4, %v1163_v29, %v1374_v12  ;;  %v1408_v51 = vsel %vm1403_vm4, %v1172_v30, %v1375_v13 }
 0x2e1   :  { %v1409_v52 = vsel %vm1403_vm4, %v1176_v33, %v1376_v14  ;;  %v1410_v53 = vsel %vm1403_vm4, %v1180_v39, %v1377_v15  ;;  %v1411_v25 = vsel %vm1403_vm4, %v1184_v40, %v1378_v16  ;;  %v1412_v54 = vsel %vm1403_vm4, %v1193_v32, %v1379_v17 }
 0x2e2   :  { %v1413_v55 = vsel %vm1403_vm4, %v1197_v41, %v1380_v18  ;;  %v1414_v26 = vsel %vm1403_vm4, %v1201_v44, %v1381_v20  ;;  %v1415_v19 = vsel %vm1403_vm4, %v1205_v45, %v1382_v21  ;;  %v1416_v27 = vsel %vm1403_vm4, %v1214_v46, %v1383_v22 }
 0x2e3   :  { %v1417_v29 = vsel %vm1403_vm4, %v1218_v47, %v1384_v23  ;;  %v1418_v30 = vsel %vm1403_vm4, %v1222_v49, %v1385_v24  ;;  %v1419_v33 = vsel %vm1403_vm4, %v1226_v50, %v1386_v28  ;;  %v4184_v56 = vpack.c.bf16 %v1404_v36, %v1404_v36 }
 0x2e4   :  { %v1421_v39 = vpack.c.bf16 %v1405_v42, %v1405_v42  ;;  %v4186_v40 = vpack.c.bf16 %v1406_v43, %v1406_v43  ;;  %v4188_v32 = vpack.c.bf16 %v1407_v48, %v1407_v48  ;;  %v4190_v41 = vpack.c.bf16 %v1408_v51, %v1408_v51 }
 0x2e5   :  { %v4192_v44 = vpack.c.bf16 %v1409_v52, %v1409_v52  ;;  %v4194_v45 = vpack.c.bf16 %v1410_v53, %v1410_v53  ;;  %v4196_v46 = vpack.c.bf16 %v1411_v25, %v1411_v25  ;;  %v4198_v47 = vpack.c.bf16 %v1412_v54, %v1412_v54 }
 0x2e6   :  { %v4200_v49 = vpack.c.bf16 %v1413_v55, %v1413_v55  ;;  %v4202_v50 = vpack.c.bf16 %v1414_v26, %v1414_v26  ;;  %v4204_v57 = vpack.c.bf16 %v1415_v19, %v1415_v19  ;;  %v4206_v58 = vpack.c.bf16 %v1416_v27, %v1416_v27 }
 0x2e7   :  { %v4208_v59 = vpack.c.bf16 %v1417_v29, %v1417_v29  ;;  %v4210_v60 = vpack.c.bf16 %v1418_v30, %v1418_v30  ;;  %v4212_v61 = vpack.c.bf16 %v1419_v33, %v1419_v33 }
 0x2e8   :  { %3643 = dma.done.wait [#allocation4], 65536 }
 0x2e9   :  { %3644 = vsyncadd [#allocation4], 4294901760  ;;  %2005 = vmatprep.mubr.bf16.mxu1 %v1421_v39  ;;  %2333 = vmatprep.mubr.bf16.mxu0 %v1421_v39  ;;  %v1441_v62 = vld [vmem:[#allocation2 + $0x8] sm:$0xff]  ;;  %v1443_v63 = vld [vmem:[#allocation2 + $0x18] sm:$0xff]  ;;  %vm2989_vm6 = vcmask 82944  }
 0x2ea   :  { %v1440_v2 = vld [vmem:[#allocation2] sm:$0xff]  ;;  %1973 = vmatprep.subr.bf16.mxu1 %v1441_v62  ;;  %2301 = vmatprep.subr.bf16.mxu0 %v1443_v63  ;;  %v1442_v3 = vld [vmem:[#allocation2 + $0x10] sm:$0xff]  ;;  %v1445_v4 = vld [vmem:[#allocation2 + $0x28] sm:$0xff] }
 0x2eb   :  { %v1447_v5 = vld [vmem:[#allocation2 + $0x38] sm:$0xff]  ;;  %1974 = vmatpush1.bf16.msra.mxu1 %v1440_v2  ;;  %2302 = vmatpush1.bf16.msra.mxu0 %v1442_v3  ;;  %v1444_v6 = vld [vmem:[#allocation2 + $0x20] sm:$0xff]  ;;  %v1446_v7 = vld [vmem:[#allocation2 + $0x30] sm:$0xff] }
 0x2ec   :  { %1975 = vmatprep.subr.bf16.mxu1 %v1445_v4  ;;  %2303 = vmatprep.subr.bf16.mxu0 %v1447_v5  ;;  %v1449_v8 = vld [vmem:[#allocation2 + $0x48] sm:$0xff]  ;;  %v1451_v9 = vld [vmem:[#allocation2 + $0x58] sm:$0xff]  ;;  %v1448_v10 = vld [vmem:[#allocation2 + $0x40] sm:$0xff] }
 0x2ed   :  { %v1450_v11 = vld [vmem:[#allocation2 + $0x50] sm:$0xff]  ;;  %v1453_v12 = vld [vmem:[#allocation2 + $0x68] sm:$0xff]  ;;  %v1455_v13 = vld [vmem:[#allocation2 + $0x78] sm:$0xff] }
 0x2ee   :  { %v1452_v14 = vld [vmem:[#allocation2 + $0x60] sm:$0xff]  ;;  %v1454_v15 = vld [vmem:[#allocation2 + $0x70] sm:$0xff]  ;;  %v1457_v16 = vld [vmem:[#allocation2 + $0x88] sm:$0xff] }
 0x2ef   :  { %1976 = vmatpush1.bf16.msra.mxu1 %v1444_v6  ;;  %2304 = vmatpush1.bf16.msra.mxu0 %v1446_v7  ;;  %v1459_v17 = vld [vmem:[#allocation2 + $0x98] sm:$0xff]  ;;  %v1456_v18 = vld [vmem:[#allocation2 + $0x80] sm:$0xff]  ;;  %v1458_v20 = vld [vmem:[#allocation2 + $0x90] sm:$0xff] }
 0x2f0   :  { %1977 = vmatprep.subr.bf16.mxu1 %v1449_v8  ;;  %2305 = vmatprep.subr.bf16.mxu0 %v1451_v9  ;;  %v1461_v21 = vld [vmem:[#allocation2 + $0xa8] sm:$0xff]  ;;  %v1463_v22 = vld [vmem:[#allocation2 + $0xb8] sm:$0xff]  ;;  %v1460_v23 = vld [vmem:[#allocation2 + $0xa0] sm:$0xff] }
 0x2f1   :  { %v1462_v24 = vld [vmem:[#allocation2 + $0xb0] sm:$0xff]  ;;  %v1465_v28 = vld [vmem:[#allocation2 + $0xc8] sm:$0xff]  ;;  %v1467_v36 = vld [vmem:[#allocation2 + $0xd8] sm:$0xff] }
 0x2f2   :  { %v1464_v42 = vld [vmem:[#allocation2 + $0xc0] sm:$0xff]  ;;  %v1466_v43 = vld [vmem:[#allocation2 + $0xd0] sm:$0xff]  ;;  %v1469_v48 = vld [vmem:[#allocation2 + $0xe8] sm:$0xff] }
 0x2f3   :  { %1978 = vmatpush1.bf16.msra.mxu1 %v1448_v10  ;;  %2306 = vmatpush1.bf16.msra.mxu0 %v1450_v11  ;;  %v1471_v51 = vld [vmem:[#allocation2 + $0xf8] sm:$0xff]  ;;  %v1468_v52 = vld [vmem:[#allocation2 + $0xe0] sm:$0xff]  ;;  %v1470_v53 = vld [vmem:[#allocation2 + $0xf0] sm:$0xff] }
 0x2f4   :  { %1979 = vmatprep.subr.bf16.mxu1 %v1453_v12  ;;  %2307 = vmatprep.subr.bf16.mxu0 %v1455_v13  ;;  %v1473_v25 = vld [vmem:[#allocation2 + $0x108] sm:$0xff]  ;;  %v1475_v54 = vld [vmem:[#allocation2 + $0x118] sm:$0xff]  ;;  %v1472_v55 = vld [vmem:[#allocation2 + $0x100] sm:$0xff] }
 0x2f5   :  { %v1474_v26 = vld [vmem:[#allocation2 + $0x110] sm:$0xff]  ;;  %v1477_v19 = vld [vmem:[#allocation2 + $0x128] sm:$0xff]  ;;  %v1479_v27 = vld [vmem:[#allocation2 + $0x138] sm:$0xff] }
 0x2f6   :  { %v1476_v29 = vld [vmem:[#allocation2 + $0x120] sm:$0xff]  ;;  %v1478_v30 = vld [vmem:[#allocation2 + $0x130] sm:$0xff]  ;;  %v1481_v33 = vld [vmem:[#allocation2 + $0x148] sm:$0xff] }
 0x2f7   :  { %1980 = vmatpush1.bf16.msra.mxu1 %v1452_v14  ;;  %2308 = vmatpush1.bf16.msra.mxu0 %v1454_v15  ;;  %v1483_v39 = vld [vmem:[#allocation2 + $0x158] sm:$0xff]  ;;  %v1480_v62 = vld [vmem:[#allocation2 + $0x140] sm:$0xff]  ;;  %v1482_v63 = vld [vmem:[#allocation2 + $0x150] sm:$0xff] }
 0x2f8   :  { %1981 = vmatprep.subr.bf16.mxu1 %v1457_v16  ;;  %2309 = vmatprep.subr.bf16.mxu0 %v1459_v17  ;;  %v1485_v2 = vld [vmem:[#allocation2 + $0x168] sm:$0xff]  ;;  %v1487_v3 = vld [vmem:[#allocation2 + $0x178] sm:$0xff]  ;;  %v1484_v4 = vld [vmem:[#allocation2 + $0x160] sm:$0xff] }
 0x2f9   :  { %v1486_v5 = vld [vmem:[#allocation2 + $0x170] sm:$0xff]  ;;  %v1489_v6 = vld [vmem:[#allocation2 + $0x188] sm:$0xff]  ;;  %v1491_v7 = vld [vmem:[#allocation2 + $0x198] sm:$0xff] }
 0x2fa   :  { %v1488_v8 = vld [vmem:[#allocation2 + $0x180] sm:$0xff]  ;;  %v1490_v9 = vld [vmem:[#allocation2 + $0x190] sm:$0xff]  ;;  %v1493_v10 = vld [vmem:[#allocation2 + $0x1a8] sm:$0xff] }
 0x2fb   :  { %1982 = vmatpush1.bf16.msra.mxu1 %v1456_v18  ;;  %2310 = vmatpush1.bf16.msra.mxu0 %v1458_v20  ;;  %v1495_v11 = vld [vmem:[#allocation2 + $0x1b8] sm:$0xff]  ;;  %v1492_v12 = vld [vmem:[#allocation2 + $0x1a0] sm:$0xff]  ;;  %v1494_v13 = vld [vmem:[#allocation2 + $0x1b0] sm:$0xff] }
 0x2fc   :  { %1983 = vmatprep.subr.bf16.mxu1 %v1461_v21  ;;  %2311 = vmatprep.subr.bf16.mxu0 %v1463_v22  ;;  %v1497_v14 = vld [vmem:[#allocation2 + $0x1c8] sm:$0xff]  ;;  %v1499_v15 = vld [vmem:[#allocation2 + $0x1d8] sm:$0xff]  ;;  %v1496_v16 = vld [vmem:[#allocation2 + $0x1c0] sm:$0xff] }
 0x2fd   :  { %v1498_v17 = vld [vmem:[#allocation2 + $0x1d0] sm:$0xff]  ;;  %v1501_v18 = vld [vmem:[#allocation2 + $0x1e8] sm:$0xff]  ;;  %v1503_v20 = vld [vmem:[#allocation2 + $0x1f8] sm:$0xff] }
 0x2fe   :  { %v1500_v21 = vld [vmem:[#allocation2 + $0x1e0] sm:$0xff]  ;;  %v1502_v22 = vld [vmem:[#allocation2 + $0x1f0] sm:$0xff] }
 0x2ff   :  { %1984 = vmatpush1.bf16.msra.mxu1 %v1460_v23  ;;  %2312 = vmatpush1.bf16.msra.mxu0 %v1462_v24  ;;  %v1505_v23 = vld [vmem:[#allocation2 + $0x208] sm:$0xff]  ;;  %v1507_v24 = vld [vmem:[#allocation2 + $0x218] sm:$0xff] }
 0x300   :  { %1985 = vmatprep.subr.bf16.mxu1 %v1465_v28  ;;  %2313 = vmatprep.subr.bf16.mxu0 %v1467_v36  ;;  %v1504_v28 = vld [vmem:[#allocation2 + $0x200] sm:$0xff]  ;;  %v1506_v36 = vld [vmem:[#allocation2 + $0x210] sm:$0xff] }
 0x303   :  { %1986 = vmatpush1.bf16.msra.mxu1 %v1464_v42  ;;  %2314 = vmatpush1.bf16.msra.mxu0 %v1466_v43  ;;  %v1509_v42 = vld [vmem:[#allocation2 + $0x228] sm:$0xff]  ;;  %v1511_v43 = vld [vmem:[#allocation2 + $0x238] sm:$0xff] }
 0x304   :  { %1987 = vmatprep.subr.bf16.mxu1 %v1469_v48  ;;  %2315 = vmatprep.subr.bf16.mxu0 %v1471_v51  ;;  %v1508_v48 = vld [vmem:[#allocation2 + $0x220] sm:$0xff]  ;;  %v1510_v51 = vld [vmem:[#allocation2 + $0x230] sm:$0xff] }
 0x307   :  { %1988 = vmatpush1.bf16.msra.mxu1 %v1468_v52  ;;  %2316 = vmatpush1.bf16.msra.mxu0 %v1470_v53  ;;  %v1513_v52 = vld [vmem:[#allocation2 + $0x248] sm:$0xff]  ;;  %v1515_v53 = vld [vmem:[#allocation2 + $0x258] sm:$0xff] }
 0x308   :  { %1989 = vmatprep.subr.bf16.mxu1 %v1473_v25  ;;  %2317 = vmatprep.subr.bf16.mxu0 %v1475_v54  ;;  %v1512_v25 = vld [vmem:[#allocation2 + $0x240] sm:$0xff]  ;;  %v1514_v54 = vld [vmem:[#allocation2 + $0x250] sm:$0xff] }
 0x30b   :  { %1990 = vmatpush1.bf16.msra.mxu1 %v1472_v55  ;;  %2318 = vmatpush1.bf16.msra.mxu0 %v1474_v26  ;;  %v1517_v55 = vld [vmem:[#allocation2 + $0x268] sm:$0xff]  ;;  %v1516_v26 = vld [vmem:[#allocation2 + $0x260] sm:$0xff] }
 0x30c   :  { %1991 = vmatprep.subr.bf16.mxu1 %v1477_v19  ;;  %2319 = vmatprep.subr.bf16.mxu0 %v1479_v27  ;;  %v1518_v19 = vld [vmem:[#allocation2 + $0x270] sm:$0xff]  ;;  %v1521_v27 = vld [vmem:[#allocation2 + $0x288] sm:$0xff] }
 0x30f   :  { %1992 = vmatpush1.bf16.msra.mxu1 %v1476_v29  ;;  %2320 = vmatpush1.bf16.msra.mxu0 %v1478_v30  ;;  %v1523_v29 = vld [vmem:[#allocation2 + $0x298] sm:$0xff]  ;;  %v1520_v30 = vld [vmem:[#allocation2 + $0x280] sm:$0xff] }
 0x310   :  { %1993 = vmatprep.subr.bf16.mxu1 %v1481_v33  ;;  %2321 = vmatprep.subr.bf16.mxu0 %v1483_v39  ;;  %v1525_v33 = vld [vmem:[#allocation2 + $0x2a8] sm:$0xff]  ;;  %v1527_v39 = vld [vmem:[#allocation2 + $0x2b8] sm:$0xff] }
 0x313   :  { %1994 = vmatpush1.bf16.msra.mxu1 %v1480_v62  ;;  %2322 = vmatpush1.bf16.msra.mxu0 %v1482_v63  ;;  %v1524_v62 = vld [vmem:[#allocation2 + $0x2a0] sm:$0xff]  ;;  %v1526_v63 = vld [vmem:[#allocation2 + $0x2b0] sm:$0xff] }
 0x314   :  { %1995 = vmatprep.subr.bf16.mxu1 %v1485_v2  ;;  %2323 = vmatprep.subr.bf16.mxu0 %v1487_v3  ;;  %v1529_v2 = vld [vmem:[#allocation2 + $0x2c8] sm:$0xff]  ;;  %v1531_v3 = vld [vmem:[#allocation2 + $0x2d8] sm:$0xff] }
 0x317   :  { %1996 = vmatpush1.bf16.msra.mxu1 %v1484_v4  ;;  %2324 = vmatpush1.bf16.msra.mxu0 %v1486_v5  ;;  %v1528_v4 = vld [vmem:[#allocation2 + $0x2c0] sm:$0xff]  ;;  %v1530_v5 = vld [vmem:[#allocation2 + $0x2d0] sm:$0xff] }
 0x318   :  { %1997 = vmatprep.subr.bf16.mxu1 %v1489_v6  ;;  %2325 = vmatprep.subr.bf16.mxu0 %v1491_v7  ;;  %v1533_v6 = vld [vmem:[#allocation2 + $0x2e8] sm:$0xff]  ;;  %v1535_v7 = vld [vmem:[#allocation2 + $0x2f8] sm:$0xff] }
 0x31b   :  { %1998 = vmatpush1.bf16.msra.mxu1 %v1488_v8  ;;  %2326 = vmatpush1.bf16.msra.mxu0 %v1490_v9  ;;  %v1532_v8 = vld [vmem:[#allocation2 + $0x2e0] sm:$0xff]  ;;  %v1534_v9 = vld [vmem:[#allocation2 + $0x2f0] sm:$0xff] }
 0x31c   :  { %1999 = vmatprep.subr.bf16.mxu1 %v1493_v10  ;;  %2327 = vmatprep.subr.bf16.mxu0 %v1495_v11  ;;  %v1537_v10 = vld [vmem:[#allocation2 + $0x308] sm:$0xff]  ;;  %v1539_v11 = vld [vmem:[#allocation2 + $0x318] sm:$0xff] }
 0x31f   :  { %2000 = vmatpush1.bf16.msra.mxu1 %v1492_v12  ;;  %2328 = vmatpush1.bf16.msra.mxu0 %v1494_v13  ;;  %v1536_v12 = vld [vmem:[#allocation2 + $0x300] sm:$0xff]  ;;  %v1538_v13 = vld [vmem:[#allocation2 + $0x310] sm:$0xff] }
 0x320   :  { %2001 = vmatprep.subr.bf16.mxu1 %v1497_v14  ;;  %2329 = vmatprep.subr.bf16.mxu0 %v1499_v15  ;;  %v1541_v14 = vld [vmem:[#allocation2 + $0x328] sm:$0xff]  ;;  %v1543_v15 = vld [vmem:[#allocation2 + $0x338] sm:$0xff] }
 0x323   :  { %2002 = vmatpush1.bf16.msra.mxu1 %v1496_v16  ;;  %2330 = vmatpush1.bf16.msra.mxu0 %v1498_v17  ;;  %v1540_v16 = vld [vmem:[#allocation2 + $0x320] sm:$0xff]  ;;  %v1542_v17 = vld [vmem:[#allocation2 + $0x330] sm:$0xff] }
 0x324   :  { %2003 = vmatprep.subr.bf16.mxu1 %v1501_v18  ;;  %2331 = vmatprep.subr.bf16.mxu0 %v1503_v20  ;;  %v1545_v18 = vld [vmem:[#allocation2 + $0x348] sm:$0xff]  ;;  %v1547_v20 = vld [vmem:[#allocation2 + $0x358] sm:$0xff] }
 0x327   :  { %2004 = vmatpush1.bf16.msra.mxu1 %v1500_v21  ;;  %2332 = vmatpush1.bf16.msra.mxu0 %v1502_v22  ;;  %v1544_v21 = vld [vmem:[#allocation2 + $0x340] sm:$0xff]  ;;  %v1546_v22 = vld [vmem:[#allocation2 + $0x350] sm:$0xff] }
 0x328   :  { %2014 = vmatprep.subr.bf16.mxu1 %v1505_v23  ;;  %2342 = vmatprep.subr.bf16.mxu0 %v1507_v24  ;;  %v1549_v23 = vld [vmem:[#allocation2 + $0x368] sm:$0xff]  ;;  %v1551_v24 = vld [vmem:[#allocation2 + $0x378] sm:$0xff] }
 0x32a   :  { %2006 = vmatmul.mubr.bf16.vlgmr.msra.gmra.mrb[8].mxu1 %v4184_v56  ;;  %2334 = vmatmul.mubr.bf16.vlgmr.msra.gmra.mrb[12].mxu0 %v4184_v56  ;;  %v1519_v56 = vld [vmem:[#allocation2 + $0x278] sm:$0xff] }
 0x32b   :  { %2015 = vmatpush1.bf16.msra.mxu1 %v1504_v28  ;;  %2343 = vmatpush1.bf16.msra.mxu0 %v1506_v36  ;;  %v1548_v28 = vld [vmem:[#allocation2 + $0x360] sm:$0xff]  ;;  %v1550_v36 = vld [vmem:[#allocation2 + $0x370] sm:$0xff] }
 0x32c   :  { %2016 = vmatprep.subr.bf16.mxu1 %v1509_v42  ;;  %2344 = vmatprep.subr.bf16.mxu0 %v1511_v43  ;;  %v1553_v42 = vld [vmem:[#allocation2 + $0x388] sm:$0xff]  ;;  %v1555_v43 = vld [vmem:[#allocation2 + $0x398] sm:$0xff] }
 0x32d   :  { %2046 = vmatprep.mubr.bf16.mxu1 %v4188_v32  ;;  %2374 = vmatprep.mubr.bf16.mxu0 %v4188_v32  ;;  %v1522_v32 = vld [vmem:[#allocation2 + $0x290] sm:$0xff] }
 0x32f   :  { %2017 = vmatpush1.bf16.msra.mxu1 %v1508_v48  ;;  %2345 = vmatpush1.bf16.msra.mxu0 %v1510_v51  ;;  %v1552_v48 = vld [vmem:[#allocation2 + $0x380] sm:$0xff]  ;;  %v1554_v51 = vld [vmem:[#allocation2 + $0x390] sm:$0xff] }
 0x330   :  { %2018 = vmatprep.subr.bf16.mxu1 %v1513_v52  ;;  %2346 = vmatprep.subr.bf16.mxu0 %v1515_v53  ;;  %v1557_v52 = vld [vmem:[#allocation2 + $0x3a8] sm:$0xff]  ;;  %v1559_v53 = vld [vmem:[#allocation2 + $0x3b8] sm:$0xff] }
 0x333   :  { %2019 = vmatpush1.bf16.msra.mxu1 %v1512_v25  ;;  %2347 = vmatpush1.bf16.msra.mxu0 %v1514_v54  ;;  %v1556_v25 = vld [vmem:[#allocation2 + $0x3a0] sm:$0xff]  ;;  %v1558_v54 = vld [vmem:[#allocation2 + $0x3b0] sm:$0xff] }
 0x334   :  { %2020 = vmatprep.subr.bf16.mxu1 %v1517_v55  ;;  %2348 = vmatprep.subr.bf16.mxu0 %v1519_v56  ;;  %v1561_v55 = vld [vmem:[#allocation2 + $0x3c8] sm:$0xff]  ;;  %v1563_v56 = vld [vmem:[#allocation2 + $0x3d8] sm:$0xff] }
 0x337   :  { %2021 = vmatpush1.bf16.msra.mxu1 %v1516_v26  ;;  %2349 = vmatpush1.bf16.msra.mxu0 %v1518_v19  ;;  %v1560_v26 = vld [vmem:[#allocation2 + $0x3c0] sm:$0xff]  ;;  %v1562_v19 = vld [vmem:[#allocation2 + $0x3d0] sm:$0xff] }
 0x338   :  { %2022 = vmatprep.subr.bf16.mxu1 %v1521_v27  ;;  %2350 = vmatprep.subr.bf16.mxu0 %v1523_v29  ;;  %v1565_v27 = vld [vmem:[#allocation2 + $0x3e8] sm:$0xff]  ;;  %v1567_v29 = vld [vmem:[#allocation2 + $0x3f8] sm:$0xff] }
 0x33b   :  { %2023 = vmatpush1.bf16.msra.mxu1 %v1520_v30  ;;  %2351 = vmatpush1.bf16.msra.mxu0 %v1522_v32  ;;  %v1564_v30 = vld [vmem:[#allocation2 + $0x3e0] sm:$0xff]  ;;  %v1566_v32 = vld [vmem:[#allocation2 + $0x3f0] sm:$0xff] }
 0x33c   :  { %2024 = vmatprep.subr.bf16.mxu1 %v1525_v33  ;;  %2352 = vmatprep.subr.bf16.mxu0 %v1527_v39  ;;  %v1569_v33 = vld [vmem:[#allocation2 + $0x408] sm:$0xff]  ;;  %v1571_v39 = vld [vmem:[#allocation2 + $0x418] sm:$0xff] }
 0x33f   :  { %2025 = vmatpush1.bf16.msra.mxu1 %v1524_v62  ;;  %2353 = vmatpush1.bf16.msra.mxu0 %v1526_v63  ;;  %v1568_v62 = vld [vmem:[#allocation2 + $0x400] sm:$0xff]  ;;  %v1570_v63 = vld [vmem:[#allocation2 + $0x410] sm:$0xff] }
 0x340   :  { %2026 = vmatprep.subr.bf16.mxu1 %v1529_v2  ;;  %2354 = vmatprep.subr.bf16.mxu0 %v1531_v3  ;;  %v1573_v2 = vld [vmem:[#allocation2 + $0x428] sm:$0xff]  ;;  %v1575_v3 = vld [vmem:[#allocation2 + $0x438] sm:$0xff] }
 0x343   :  { %2027 = vmatpush1.bf16.msra.mxu1 %v1528_v4  ;;  %2355 = vmatpush1.bf16.msra.mxu0 %v1530_v5  ;;  %v1572_v4 = vld [vmem:[#allocation2 + $0x420] sm:$0xff]  ;;  %v1574_v5 = vld [vmem:[#allocation2 + $0x430] sm:$0xff] }
 0x344   :  { %2028 = vmatprep.subr.bf16.mxu1 %v1533_v6  ;;  %2356 = vmatprep.subr.bf16.mxu0 %v1535_v7  ;;  %v1577_v6 = vld [vmem:[#allocation2 + $0x448] sm:$0xff]  ;;  %v1579_v7 = vld [vmem:[#allocation2 + $0x458] sm:$0xff] }
 0x347   :  { %2029 = vmatpush1.bf16.msra.mxu1 %v1532_v8  ;;  %2357 = vmatpush1.bf16.msra.mxu0 %v1534_v9  ;;  %v1576_v8 = vld [vmem:[#allocation2 + $0x440] sm:$0xff]  ;;  %v1578_v9 = vld [vmem:[#allocation2 + $0x450] sm:$0xff] }
 0x348   :  { %2030 = vmatprep.subr.bf16.mxu1 %v1537_v10  ;;  %2358 = vmatprep.subr.bf16.mxu0 %v1539_v11  ;;  %v1581_v10 = vld [vmem:[#allocation2 + $0x468] sm:$0xff]  ;;  %v1580_v11 = vld [vmem:[#allocation2 + $0x460] sm:$0xff] }
 0x34b   :  { %2031 = vmatpush1.bf16.msra.mxu1 %v1536_v12  ;;  %2359 = vmatpush1.bf16.msra.mxu0 %v1538_v13  ;;  %v1582_v12 = vld [vmem:[#allocation2 + $0x470] sm:$0xff]  ;;  %v1585_v13 = vld [vmem:[#allocation2 + $0x488] sm:$0xff] }
 0x34c   :  { %2032 = vmatprep.subr.bf16.mxu1 %v1541_v14  ;;  %2360 = vmatprep.subr.bf16.mxu0 %v1543_v15  ;;  %v1587_v14 = vld [vmem:[#allocation2 + $0x498] sm:$0xff]  ;;  %v1586_v15 = vld [vmem:[#allocation2 + $0x490] sm:$0xff] }
 0x34f   :  { %2033 = vmatpush1.bf16.msra.mxu1 %v1540_v16  ;;  %2361 = vmatpush1.bf16.msra.mxu0 %v1542_v17  ;;  %v1589_v16 = vld [vmem:[#allocation2 + $0x4a8] sm:$0xff]  ;;  %v1591_v17 = vld [vmem:[#allocation2 + $0x4b8] sm:$0xff] }
 0x350   :  { %2034 = vmatprep.subr.bf16.mxu1 %v1545_v18  ;;  %2362 = vmatprep.subr.bf16.mxu0 %v1547_v20  ;;  %v1588_v18 = vld [vmem:[#allocation2 + $0x4a0] sm:$0xff]  ;;  %v1590_v20 = vld [vmem:[#allocation2 + $0x4b0] sm:$0xff] }
 0x353   :  { %2035 = vmatpush1.bf16.msra.mxu1 %v1544_v21  ;;  %2363 = vmatpush1.bf16.msra.mxu0 %v1546_v22  ;;  %v1593_v21 = vld [vmem:[#allocation2 + $0x4c8] sm:$0xff]  ;;  %v1595_v22 = vld [vmem:[#allocation2 + $0x4d8] sm:$0xff] }
 0x354   :  { %2036 = vmatprep.subr.bf16.mxu1 %v1549_v23  ;;  %2364 = vmatprep.subr.bf16.mxu0 %v1551_v24  ;;  %v1592_v23 = vld [vmem:[#allocation2 + $0x4c0] sm:$0xff]  ;;  %v1594_v24 = vld [vmem:[#allocation2 + $0x4d0] sm:$0xff] }
 0x357   :  { %2037 = vmatpush1.bf16.msra.mxu1 %v1548_v28  ;;  %2365 = vmatpush1.bf16.msra.mxu0 %v1550_v36  ;;  %v1597_v28 = vld [vmem:[#allocation2 + $0x4e8] sm:$0xff]  ;;  %v1599_v36 = vld [vmem:[#allocation2 + $0x4f8] sm:$0xff] }
 0x358   :  { %2038 = vmatprep.subr.bf16.mxu1 %v1553_v42  ;;  %2366 = vmatprep.subr.bf16.mxu0 %v1555_v43  ;;  %v1596_v42 = vld [vmem:[#allocation2 + $0x4e0] sm:$0xff]  ;;  %v1598_v43 = vld [vmem:[#allocation2 + $0x4f0] sm:$0xff] }
 0x35b   :  { %2039 = vmatpush1.bf16.msra.mxu1 %v1552_v48  ;;  %2367 = vmatpush1.bf16.msra.mxu0 %v1554_v51  ;;  %v1601_v48 = vld [vmem:[#allocation2 + $0x508] sm:$0xff]  ;;  %v1603_v51 = vld [vmem:[#allocation2 + $0x518] sm:$0xff] }
 0x35c   :  { %2040 = vmatprep.subr.bf16.mxu1 %v1557_v52  ;;  %2368 = vmatprep.subr.bf16.mxu0 %v1559_v53  ;;  %v1600_v52 = vld [vmem:[#allocation2 + $0x500] sm:$0xff]  ;;  %v1602_v53 = vld [vmem:[#allocation2 + $0x510] sm:$0xff] }
 0x35f   :  { %2041 = vmatpush1.bf16.msra.mxu1 %v1556_v25  ;;  %2369 = vmatpush1.bf16.msra.mxu0 %v1558_v54  ;;  %v1605_v25 = vld [vmem:[#allocation2 + $0x528] sm:$0xff]  ;;  %v1607_v54 = vld [vmem:[#allocation2 + $0x538] sm:$0xff] }
 0x360   :  { %2042 = vmatprep.subr.bf16.mxu1 %v1561_v55  ;;  %2370 = vmatprep.subr.bf16.mxu0 %v1563_v56  ;;  %v1604_v55 = vld [vmem:[#allocation2 + $0x520] sm:$0xff]  ;;  %v1606_v56 = vld [vmem:[#allocation2 + $0x530] sm:$0xff] }
 0x363   :  { %2043 = vmatpush1.bf16.msra.mxu1 %v1560_v26  ;;  %2371 = vmatpush1.bf16.msra.mxu0 %v1562_v19  ;;  %v1609_v26 = vld [vmem:[#allocation2 + $0x548] sm:$0xff]  ;;  %v1611_v19 = vld [vmem:[#allocation2 + $0x558] sm:$0xff] }
 0x364   :  { %2044 = vmatprep.subr.bf16.mxu1 %v1565_v27  ;;  %2372 = vmatprep.subr.bf16.mxu0 %v1567_v29  ;;  %v1608_v27 = vld [vmem:[#allocation2 + $0x540] sm:$0xff]  ;;  %v1610_v29 = vld [vmem:[#allocation2 + $0x550] sm:$0xff] }
 0x367   :  { %2045 = vmatpush1.bf16.msra.mxu1 %v1564_v30  ;;  %2373 = vmatpush1.bf16.msra.mxu0 %v1566_v32  ;;  %v1613_v30 = vld [vmem:[#allocation2 + $0x568] sm:$0xff]  ;;  %v1615_v32 = vld [vmem:[#allocation2 + $0x578] sm:$0xff] }
 0x368   :  { %2055 = vmatprep.subr.bf16.mxu1 %v1569_v33  ;;  %2383 = vmatprep.subr.bf16.mxu0 %v1571_v39  ;;  %v1612_v33 = vld [vmem:[#allocation2 + $0x560] sm:$0xff]  ;;  %v1614_v39 = vld [vmem:[#allocation2 + $0x570] sm:$0xff] }
 0x36a   :  { %2047 = vmatmul.mubr.bf16.vlgmr.msra.gmra.mrb[8].mxu1 %v4186_v40  ;;  %2375 = vmatmul.mubr.bf16.vlgmr.msra.gmra.mrb[12].mxu0 %v4186_v40  ;;  %v1583_v40 = vld [vmem:[#allocation2 + $0x478] sm:$0xff] }
 0x36b   :  { %2056 = vmatpush1.bf16.msra.mxu1 %v1568_v62  ;;  %2384 = vmatpush1.bf16.msra.mxu0 %v1570_v63  ;;  %v1617_v62 = vld [vmem:[#allocation2 + $0x588] sm:$0xff]  ;;  %v1619_v63 = vld [vmem:[#allocation2 + $0x598] sm:$0xff] }
 0x36c   :  { %2057 = vmatprep.subr.bf16.mxu1 %v1573_v2  ;;  %2385 = vmatprep.subr.bf16.mxu0 %v1575_v3  ;;  %v1616_v2 = vld [vmem:[#allocation2 + $0x580] sm:$0xff]  ;;  %v1618_v3 = vld [vmem:[#allocation2 + $0x590] sm:$0xff] }
 0x36d   :  { %2087 = vmatprep.mubr.bf16.mxu1 %v4192_v44  ;;  %2415 = vmatprep.mubr.bf16.mxu0 %v4192_v44  ;;  %v1584_v44 = vld [vmem:[#allocation2 + $0x480] sm:$0xff] }
 0x36f   :  { %2058 = vmatpush1.bf16.msra.mxu1 %v1572_v4  ;;  %2386 = vmatpush1.bf16.msra.mxu0 %v1574_v5  ;;  %v1621_v4 = vld [vmem:[#allocation2 + $0x5a8] sm:$0xff]  ;;  %v1623_v5 = vld [vmem:[#allocation2 + $0x5b8] sm:$0xff] }
 0x370   :  { %2059 = vmatprep.subr.bf16.mxu1 %v1577_v6  ;;  %2387 = vmatprep.subr.bf16.mxu0 %v1579_v7  ;;  %v1620_v6 = vld [vmem:[#allocation2 + $0x5a0] sm:$0xff]  ;;  %v1622_v7 = vld [vmem:[#allocation2 + $0x5b0] sm:$0xff] }
 0x373   :  { %2060 = vmatpush1.bf16.msra.mxu1 %v1576_v8  ;;  %2388 = vmatpush1.bf16.msra.mxu0 %v1578_v9  ;;  %v1625_v8 = vld [vmem:[#allocation2 + $0x5c8] sm:$0xff]  ;;  %v1627_v9 = vld [vmem:[#allocation2 + $0x5d8] sm:$0xff] }
 0x374   :  { %2061 = vmatprep.subr.bf16.mxu1 %v1581_v10  ;;  %2389 = vmatprep.subr.bf16.mxu0 %v1583_v40  ;;  %v1624_v10 = vld [vmem:[#allocation2 + $0x5c0] sm:$0xff]  ;;  %v1626_v40 = vld [vmem:[#allocation2 + $0x5d0] sm:$0xff] }
 0x377   :  { %2062 = vmatpush1.bf16.msra.mxu1 %v1580_v11  ;;  %2390 = vmatpush1.bf16.msra.mxu0 %v1582_v12  ;;  %v1629_v11 = vld [vmem:[#allocation2 + $0x5e8] sm:$0xff]  ;;  %v1631_v12 = vld [vmem:[#allocation2 + $0x5f8] sm:$0xff] }
 0x378   :  { %2063 = vmatprep.subr.bf16.mxu1 %v1585_v13  ;;  %2391 = vmatprep.subr.bf16.mxu0 %v1587_v14  ;;  %v1628_v13 = vld [vmem:[#allocation2 + $0x5e0] sm:$0xff]  ;;  %v1630_v14 = vld [vmem:[#allocation2 + $0x5f0] sm:$0xff] }
 0x37b   :  { %2064 = vmatpush1.bf16.msra.mxu1 %v1584_v44  ;;  %2392 = vmatpush1.bf16.msra.mxu0 %v1586_v15  ;;  %v1633_v44 = vld [vmem:[#allocation2 + $0x608] sm:$0xff]  ;;  %v1635_v15 = vld [vmem:[#allocation2 + $0x618] sm:$0xff] }
 0x37c   :  { %2065 = vmatprep.subr.bf16.mxu1 %v1589_v16  ;;  %2393 = vmatprep.subr.bf16.mxu0 %v1591_v17  ;;  %v1632_v16 = vld [vmem:[#allocation2 + $0x600] sm:$0xff]  ;;  %v1634_v17 = vld [vmem:[#allocation2 + $0x610] sm:$0xff] }
 0x37f   :  { %2066 = vmatpush1.bf16.msra.mxu1 %v1588_v18  ;;  %2394 = vmatpush1.bf16.msra.mxu0 %v1590_v20  ;;  %v1637_v18 = vld [vmem:[#allocation2 + $0x628] sm:$0xff]  ;;  %v1639_v20 = vld [vmem:[#allocation2 + $0x638] sm:$0xff] }
 0x380   :  { %2067 = vmatprep.subr.bf16.mxu1 %v1593_v21  ;;  %2395 = vmatprep.subr.bf16.mxu0 %v1595_v22  ;;  %v1636_v21 = vld [vmem:[#allocation2 + $0x620] sm:$0xff]  ;;  %v1638_v22 = vld [vmem:[#allocation2 + $0x630] sm:$0xff] }
 0x383   :  { %2068 = vmatpush1.bf16.msra.mxu1 %v1592_v23  ;;  %2396 = vmatpush1.bf16.msra.mxu0 %v1594_v24  ;;  %v1641_v23 = vld [vmem:[#allocation2 + $0x648] sm:$0xff]  ;;  %v1643_v24 = vld [vmem:[#allocation2 + $0x658] sm:$0xff] }
 0x384   :  { %2069 = vmatprep.subr.bf16.mxu1 %v1597_v28  ;;  %2397 = vmatprep.subr.bf16.mxu0 %v1599_v36  ;;  %v1640_v28 = vld [vmem:[#allocation2 + $0x640] sm:$0xff]  ;;  %v1642_v36 = vld [vmem:[#allocation2 + $0x650] sm:$0xff] }
 0x387   :  { %2070 = vmatpush1.bf16.msra.mxu1 %v1596_v42  ;;  %2398 = vmatpush1.bf16.msra.mxu0 %v1598_v43  ;;  %v1645_v42 = vld [vmem:[#allocation2 + $0x668] sm:$0xff]  ;;  %v1644_v43 = vld [vmem:[#allocation2 + $0x660] sm:$0xff] }
 0x388   :  { %2071 = vmatprep.subr.bf16.mxu1 %v1601_v48  ;;  %2399 = vmatprep.subr.bf16.mxu0 %v1603_v51  ;;  %v1646_v48 = vld [vmem:[#allocation2 + $0x670] sm:$0xff]  ;;  %v1649_v51 = vld [vmem:[#allocation2 + $0x688] sm:$0xff] }
 0x38b   :  { %2072 = vmatpush1.bf16.msra.mxu1 %v1600_v52  ;;  %2400 = vmatpush1.bf16.msra.mxu0 %v1602_v53  ;;  %v1651_v52 = vld [vmem:[#allocation2 + $0x698] sm:$0xff]  ;;  %v1650_v53 = vld [vmem:[#allocation2 + $0x690] sm:$0xff] }
 0x38c   :  { %2073 = vmatprep.subr.bf16.mxu1 %v1605_v25  ;;  %2401 = vmatprep.subr.bf16.mxu0 %v1607_v54  ;;  %v1653_v25 = vld [vmem:[#allocation2 + $0x6a8] sm:$0xff]  ;;  %v1655_v54 = vld [vmem:[#allocation2 + $0x6b8] sm:$0xff] }
 0x38f   :  { %2074 = vmatpush1.bf16.msra.mxu1 %v1604_v55  ;;  %2402 = vmatpush1.bf16.msra.mxu0 %v1606_v56  ;;  %v1652_v55 = vld [vmem:[#allocation2 + $0x6a0] sm:$0xff]  ;;  %v1654_v56 = vld [vmem:[#allocation2 + $0x6b0] sm:$0xff] }
 0x390   :  { %2075 = vmatprep.subr.bf16.mxu1 %v1609_v26  ;;  %2403 = vmatprep.subr.bf16.mxu0 %v1611_v19  ;;  %v1657_v26 = vld [vmem:[#allocation2 + $0x6c8] sm:$0xff]  ;;  %v1659_v19 = vld [vmem:[#allocation2 + $0x6d8] sm:$0xff] }
 0x393   :  { %2076 = vmatpush1.bf16.msra.mxu1 %v1608_v27  ;;  %2404 = vmatpush1.bf16.msra.mxu0 %v1610_v29  ;;  %v1656_v27 = vld [vmem:[#allocation2 + $0x6c0] sm:$0xff]  ;;  %v1658_v29 = vld [vmem:[#allocation2 + $0x6d0] sm:$0xff] }
 0x394   :  { %2077 = vmatprep.subr.bf16.mxu1 %v1613_v30  ;;  %2405 = vmatprep.subr.bf16.mxu0 %v1615_v32  ;;  %v1661_v30 = vld [vmem:[#allocation2 + $0x6e8] sm:$0xff]  ;;  %v1663_v32 = vld [vmem:[#allocation2 + $0x6f8] sm:$0xff] }
 0x397   :  { %2078 = vmatpush1.bf16.msra.mxu1 %v1612_v33  ;;  %2406 = vmatpush1.bf16.msra.mxu0 %v1614_v39  ;;  %v1660_v33 = vld [vmem:[#allocation2 + $0x6e0] sm:$0xff]  ;;  %v1662_v39 = vld [vmem:[#allocation2 + $0x6f0] sm:$0xff] }
 0x398   :  { %2079 = vmatprep.subr.bf16.mxu1 %v1617_v62  ;;  %2407 = vmatprep.subr.bf16.mxu0 %v1619_v63  ;;  %v1665_v62 = vld [vmem:[#allocation2 + $0x708] sm:$0xff]  ;;  %v1667_v63 = vld [vmem:[#allocation2 + $0x718] sm:$0xff] }
 0x39b   :  { %2080 = vmatpush1.bf16.msra.mxu1 %v1616_v2  ;;  %2408 = vmatpush1.bf16.msra.mxu0 %v1618_v3  ;;  %v1664_v2 = vld [vmem:[#allocation2 + $0x700] sm:$0xff]  ;;  %v1666_v3 = vld [vmem:[#allocation2 + $0x710] sm:$0xff] }
 0x39c   :  { %2081 = vmatprep.subr.bf16.mxu1 %v1621_v4  ;;  %2409 = vmatprep.subr.bf16.mxu0 %v1623_v5  ;;  %v1669_v4 = vld [vmem:[#allocation2 + $0x728] sm:$0xff]  ;;  %v1671_v5 = vld [vmem:[#allocation2 + $0x738] sm:$0xff] }
 0x39f   :  { %2082 = vmatpush1.bf16.msra.mxu1 %v1620_v6  ;;  %2410 = vmatpush1.bf16.msra.mxu0 %v1622_v7  ;;  %v1668_v6 = vld [vmem:[#allocation2 + $0x720] sm:$0xff]  ;;  %v1670_v7 = vld [vmem:[#allocation2 + $0x730] sm:$0xff] }
 0x3a0   :  { %2083 = vmatprep.subr.bf16.mxu1 %v1625_v8  ;;  %2411 = vmatprep.subr.bf16.mxu0 %v1627_v9  ;;  %v1673_v8 = vld [vmem:[#allocation2 + $0x748] sm:$0xff]  ;;  %v1675_v9 = vld [vmem:[#allocation2 + $0x758] sm:$0xff] }
 0x3a3   :  { %2084 = vmatpush1.bf16.msra.mxu1 %v1624_v10  ;;  %2412 = vmatpush1.bf16.msra.mxu0 %v1626_v40  ;;  %v1672_v10 = vld [vmem:[#allocation2 + $0x740] sm:$0xff]  ;;  %v1674_v40 = vld [vmem:[#allocation2 + $0x750] sm:$0xff] }
 0x3a4   :  { %2085 = vmatprep.subr.bf16.mxu1 %v1629_v11  ;;  %2413 = vmatprep.subr.bf16.mxu0 %v1631_v12  ;;  %v1677_v11 = vld [vmem:[#allocation2 + $0x768] sm:$0xff]  ;;  %v1679_v12 = vld [vmem:[#allocation2 + $0x778] sm:$0xff] }
 0x3a7   :  { %2086 = vmatpush1.bf16.msra.mxu1 %v1628_v13  ;;  %2414 = vmatpush1.bf16.msra.mxu0 %v1630_v14  ;;  %v1676_v13 = vld [vmem:[#allocation2 + $0x760] sm:$0xff]  ;;  %v1678_v14 = vld [vmem:[#allocation2 + $0x770] sm:$0xff] }
 0x3a8   :  { %2096 = vmatprep.subr.bf16.mxu1 %v1633_v44  ;;  %2424 = vmatprep.subr.bf16.mxu0 %v1635_v15  ;;  %v1681_v44 = vld [vmem:[#allocation2 + $0x788] sm:$0xff]  ;;  %v1683_v15 = vld [vmem:[#allocation2 + $0x798] sm:$0xff] }
 0x3aa   :  { %2088 = vmatmul.mubr.bf16.vlgmr.msra.gmra.mrb[8].mxu1 %v4190_v41  ;;  %2416 = vmatmul.mubr.bf16.vlgmr.msra.gmra.mrb[12].mxu0 %v4190_v41  ;;  %v1647_v41 = vld [vmem:[#allocation2 + $0x678] sm:$0xff] }
 0x3ab   :  { %2097 = vmatpush1.bf16.msra.mxu1 %v1632_v16  ;;  %2425 = vmatpush1.bf16.msra.mxu0 %v1634_v17  ;;  %v1680_v16 = vld [vmem:[#allocation2 + $0x780] sm:$0xff]  ;;  %v1682_v17 = vld [vmem:[#allocation2 + $0x790] sm:$0xff] }
 0x3ac   :  { %2098 = vmatprep.subr.bf16.mxu1 %v1637_v18  ;;  %2426 = vmatprep.subr.bf16.mxu0 %v1639_v20  ;;  %v1685_v18 = vld [vmem:[#allocation2 + $0x7a8] sm:$0xff]  ;;  %v1687_v20 = vld [vmem:[#allocation2 + $0x7b8] sm:$0xff] }
 0x3ad   :  { %2128 = vmatprep.mubr.bf16.mxu1 %v4196_v46  ;;  %2456 = vmatprep.mubr.bf16.mxu0 %v4196_v46  ;;  %v1648_v46 = vld [vmem:[#allocation2 + $0x680] sm:$0xff] }
 0x3af   :  { %2099 = vmatpush1.bf16.msra.mxu1 %v1636_v21  ;;  %2427 = vmatpush1.bf16.msra.mxu0 %v1638_v22  ;;  %v1684_v21 = vld [vmem:[#allocation2 + $0x7a0] sm:$0xff]  ;;  %v1686_v22 = vld [vmem:[#allocation2 + $0x7b0] sm:$0xff] }
 0x3b0   :  { %2100 = vmatprep.subr.bf16.mxu1 %v1641_v23  ;;  %2428 = vmatprep.subr.bf16.mxu0 %v1643_v24  ;;  %v1689_v23 = vld [vmem:[#allocation2 + $0x7c8] sm:$0xff]  ;;  %v1691_v24 = vld [vmem:[#allocation2 + $0x7d8] sm:$0xff] }
 0x3b3   :  { %2101 = vmatpush1.bf16.msra.mxu1 %v1640_v28  ;;  %2429 = vmatpush1.bf16.msra.mxu0 %v1642_v36  ;;  %v1688_v28 = vld [vmem:[#allocation2 + $0x7c0] sm:$0xff]  ;;  %v1690_v36 = vld [vmem:[#allocation2 + $0x7d0] sm:$0xff] }
 0x3b4   :  { %2102 = vmatprep.subr.bf16.mxu1 %v1645_v42  ;;  %2430 = vmatprep.subr.bf16.mxu0 %v1647_v41  ;;  %v1693_v42 = vld [vmem:[#allocation2 + $0x7e8] sm:$0xff]  ;;  %v1695_v41 = vld [vmem:[#allocation2 + $0x7f8] sm:$0xff] }
 0x3b7   :  { %2103 = vmatpush1.bf16.msra.mxu1 %v1644_v43  ;;  %2431 = vmatpush1.bf16.msra.mxu0 %v1646_v48  ;;  %v1692_v43 = vld [vmem:[#allocation2 + $0x7e0] sm:$0xff]  ;;  %v1694_v48 = vld [vmem:[#allocation2 + $0x7f0] sm:$0xff] }
 0x3b8   :  { %2104 = vmatprep.subr.bf16.mxu1 %v1649_v51  ;;  %2432 = vmatprep.subr.bf16.mxu0 %v1651_v52  ;;  %v1697_v51 = vld [vmem:[#allocation2 + $0x808] sm:$0xff]  ;;  %v1699_v52 = vld [vmem:[#allocation2 + $0x818] sm:$0xff] }
 0x3bb   :  { %2105 = vmatpush1.bf16.msra.mxu1 %v1648_v46  ;;  %2433 = vmatpush1.bf16.msra.mxu0 %v1650_v53  ;;  %v1696_v46 = vld [vmem:[#allocation2 + $0x800] sm:$0xff]  ;;  %v1698_v53 = vld [vmem:[#allocation2 + $0x810] sm:$0xff] }
 0x3bc   :  { %2106 = vmatprep.subr.bf16.mxu1 %v1653_v25  ;;  %2434 = vmatprep.subr.bf16.mxu0 %v1655_v54  ;;  %v1701_v25 = vld [vmem:[#allocation2 + $0x828] sm:$0xff]  ;;  %v1703_v54 = vld [vmem:[#allocation2 + $0x838] sm:$0xff] }
 0x3bf   :  { %2107 = vmatpush1.bf16.msra.mxu1 %v1652_v55  ;;  %2435 = vmatpush1.bf16.msra.mxu0 %v1654_v56  ;;  %v1700_v55 = vld [vmem:[#allocation2 + $0x820] sm:$0xff]  ;;  %v1702_v56 = vld [vmem:[#allocation2 + $0x830] sm:$0xff] }
 0x3c0   :  { %2108 = vmatprep.subr.bf16.mxu1 %v1657_v26  ;;  %2436 = vmatprep.subr.bf16.mxu0 %v1659_v19  ;;  %v1705_v26 = vld [vmem:[#allocation2 + $0x848] sm:$0xff]  ;;  %v1707_v19 = vld [vmem:[#allocation2 + $0x858] sm:$0xff] }
 0x3c3   :  { %2109 = vmatpush1.bf16.msra.mxu1 %v1656_v27  ;;  %2437 = vmatpush1.bf16.msra.mxu0 %v1658_v29  ;;  %v1704_v27 = vld [vmem:[#allocation2 + $0x840] sm:$0xff]  ;;  %v1706_v29 = vld [vmem:[#allocation2 + $0x850] sm:$0xff] }
 0x3c4   :  { %2110 = vmatprep.subr.bf16.mxu1 %v1661_v30  ;;  %2438 = vmatprep.subr.bf16.mxu0 %v1663_v32  ;;  %v1709_v30 = vld [vmem:[#allocation2 + $0x868] sm:$0xff]  ;;  %v1708_v32 = vld [vmem:[#allocation2 + $0x860] sm:$0xff] }
 0x3c7   :  { %2111 = vmatpush1.bf16.msra.mxu1 %v1660_v33  ;;  %2439 = vmatpush1.bf16.msra.mxu0 %v1662_v39  ;;  %v1710_v33 = vld [vmem:[#allocation2 + $0x870] sm:$0xff]  ;;  %v1713_v39 = vld [vmem:[#allocation2 + $0x888] sm:$0xff] }
 0x3c8   :  { %2112 = vmatprep.subr.bf16.mxu1 %v1665_v62  ;;  %2440 = vmatprep.subr.bf16.mxu0 %v1667_v63  ;;  %v1715_v62 = vld [vmem:[#allocation2 + $0x898] sm:$0xff]  ;;  %v1714_v63 = vld [vmem:[#allocation2 + $0x890] sm:$0xff] }
 0x3cb   :  { %2113 = vmatpush1.bf16.msra.mxu1 %v1664_v2  ;;  %2441 = vmatpush1.bf16.msra.mxu0 %v1666_v3  ;;  %v1717_v2 = vld [vmem:[#allocation2 + $0x8a8] sm:$0xff]  ;;  %v1719_v3 = vld [vmem:[#allocation2 + $0x8b8] sm:$0xff] }
 0x3cc   :  { %2114 = vmatprep.subr.bf16.mxu1 %v1669_v4  ;;  %2442 = vmatprep.subr.bf16.mxu0 %v1671_v5  ;;  %v1716_v4 = vld [vmem:[#allocation2 + $0x8a0] sm:$0xff]  ;;  %v1718_v5 = vld [vmem:[#allocation2 + $0x8b0] sm:$0xff] }
 0x3cf   :  { %2115 = vmatpush1.bf16.msra.mxu1 %v1668_v6  ;;  %2443 = vmatpush1.bf16.msra.mxu0 %v1670_v7  ;;  %v1721_v6 = vld [vmem:[#allocation2 + $0x8c8] sm:$0xff]  ;;  %v1723_v7 = vld [vmem:[#allocation2 + $0x8d8] sm:$0xff] }
 0x3d0   :  { %2116 = vmatprep.subr.bf16.mxu1 %v1673_v8  ;;  %2444 = vmatprep.subr.bf16.mxu0 %v1675_v9  ;;  %v1720_v8 = vld [vmem:[#allocation2 + $0x8c0] sm:$0xff]  ;;  %v1722_v9 = vld [vmem:[#allocation2 + $0x8d0] sm:$0xff] }
 0x3d3   :  { %2117 = vmatpush1.bf16.msra.mxu1 %v1672_v10  ;;  %2445 = vmatpush1.bf16.msra.mxu0 %v1674_v40  ;;  %v1725_v10 = vld [vmem:[#allocation2 + $0x8e8] sm:$0xff]  ;;  %v1727_v40 = vld [vmem:[#allocation2 + $0x8f8] sm:$0xff] }
 0x3d4   :  { %2118 = vmatprep.subr.bf16.mxu1 %v1677_v11  ;;  %2446 = vmatprep.subr.bf16.mxu0 %v1679_v12  ;;  %v1724_v11 = vld [vmem:[#allocation2 + $0x8e0] sm:$0xff]  ;;  %v1726_v12 = vld [vmem:[#allocation2 + $0x8f0] sm:$0xff] }
 0x3d7   :  { %2119 = vmatpush1.bf16.msra.mxu1 %v1676_v13  ;;  %2447 = vmatpush1.bf16.msra.mxu0 %v1678_v14  ;;  %v1729_v13 = vld [vmem:[#allocation2 + $0x908] sm:$0xff]  ;;  %v1731_v14 = vld [vmem:[#allocation2 + $0x918] sm:$0xff] }
 0x3d8   :  { %2120 = vmatprep.subr.bf16.mxu1 %v1681_v44  ;;  %2448 = vmatprep.subr.bf16.mxu0 %v1683_v15  ;;  %v1728_v44 = vld [vmem:[#allocation2 + $0x900] sm:$0xff]  ;;  %v1730_v15 = vld [vmem:[#allocation2 + $0x910] sm:$0xff] }
 0x3db   :  { %2121 = vmatpush1.bf16.msra.mxu1 %v1680_v16  ;;  %2449 = vmatpush1.bf16.msra.mxu0 %v1682_v17  ;;  %v1733_v16 = vld [vmem:[#allocation2 + $0x928] sm:$0xff]  ;;  %v1735_v17 = vld [vmem:[#allocation2 + $0x938] sm:$0xff] }
 0x3dc   :  { %2122 = vmatprep.subr.bf16.mxu1 %v1685_v18  ;;  %2450 = vmatprep.subr.bf16.mxu0 %v1687_v20  ;;  %v1732_v18 = vld [vmem:[#allocation2 + $0x920] sm:$0xff]  ;;  %v1734_v20 = vld [vmem:[#allocation2 + $0x930] sm:$0xff] }
 0x3df   :  { %2123 = vmatpush1.bf16.msra.mxu1 %v1684_v21  ;;  %2451 = vmatpush1.bf16.msra.mxu0 %v1686_v22  ;;  %v1737_v21 = vld [vmem:[#allocation2 + $0x948] sm:$0xff]  ;;  %v1739_v22 = vld [vmem:[#allocation2 + $0x958] sm:$0xff] }
 0x3e0   :  { %2124 = vmatprep.subr.bf16.mxu1 %v1689_v23  ;;  %2452 = vmatprep.subr.bf16.mxu0 %v1691_v24  ;;  %v1736_v23 = vld [vmem:[#allocation2 + $0x940] sm:$0xff]  ;;  %v1738_v24 = vld [vmem:[#allocation2 + $0x950] sm:$0xff] }
 0x3e3   :  { %2125 = vmatpush1.bf16.msra.mxu1 %v1688_v28  ;;  %2453 = vmatpush1.bf16.msra.mxu0 %v1690_v36  ;;  %v1741_v28 = vld [vmem:[#allocation2 + $0x968] sm:$0xff]  ;;  %v1743_v36 = vld [vmem:[#allocation2 + $0x978] sm:$0xff] }
 0x3e4   :  { %2126 = vmatprep.subr.bf16.mxu1 %v1693_v42  ;;  %2454 = vmatprep.subr.bf16.mxu0 %v1695_v41  ;;  %v1740_v42 = vld [vmem:[#allocation2 + $0x960] sm:$0xff]  ;;  %v1742_v41 = vld [vmem:[#allocation2 + $0x970] sm:$0xff] }
 0x3e7   :  { %2127 = vmatpush1.bf16.msra.mxu1 %v1692_v43  ;;  %2455 = vmatpush1.bf16.msra.mxu0 %v1694_v48  ;;  %v1745_v43 = vld [vmem:[#allocation2 + $0x988] sm:$0xff]  ;;  %v1747_v48 = vld [vmem:[#allocation2 + $0x998] sm:$0xff] }
 0x3e8   :  { %2137 = vmatprep.subr.bf16.mxu1 %v1697_v51  ;;  %2465 = vmatprep.subr.bf16.mxu0 %v1699_v52  ;;  %v1744_v51 = vld [vmem:[#allocation2 + $0x980] sm:$0xff]  ;;  %v1746_v52 = vld [vmem:[#allocation2 + $0x990] sm:$0xff] }
 0x3ea   :  { %2129 = vmatmul.mubr.bf16.vlgmr.msra.gmra.mrb[8].mxu1 %v4194_v45  ;;  %2457 = vmatmul.mubr.bf16.vlgmr.msra.gmra.mrb[12].mxu0 %v4194_v45  ;;  %v1711_v45 = vld [vmem:[#allocation2 + $0x878] sm:$0xff] }
 0x3eb   :  { %2138 = vmatpush1.bf16.msra.mxu1 %v1696_v46  ;;  %2466 = vmatpush1.bf16.msra.mxu0 %v1698_v53  ;;  %v1749_v46 = vld [vmem:[#allocation2 + $0x9a8] sm:$0xff]  ;;  %v1751_v53 = vld [vmem:[#allocation2 + $0x9b8] sm:$0xff] }
 0x3ec   :  { %2139 = vmatprep.subr.bf16.mxu1 %v1701_v25  ;;  %2467 = vmatprep.subr.bf16.mxu0 %v1703_v54  ;;  %v1748_v25 = vld [vmem:[#allocation2 + $0x9a0] sm:$0xff]  ;;  %v1750_v54 = vld [vmem:[#allocation2 + $0x9b0] sm:$0xff] }
 0x3ed   :  { %2169 = vmatprep.mubr.bf16.mxu1 %v4200_v49  ;;  %2497 = vmatprep.mubr.bf16.mxu0 %v4200_v49  ;;  %v1712_v49 = vld [vmem:[#allocation2 + $0x880] sm:$0xff] }
 0x3ef   :  { %2140 = vmatpush1.bf16.msra.mxu1 %v1700_v55  ;;  %2468 = vmatpush1.bf16.msra.mxu0 %v1702_v56  ;;  %v1753_v55 = vld [vmem:[#allocation2 + $0x9c8] sm:$0xff]  ;;  %v1755_v56 = vld [vmem:[#allocation2 + $0x9d8] sm:$0xff] }
 0x3f0   :  { %2141 = vmatprep.subr.bf16.mxu1 %v1705_v26  ;;  %2469 = vmatprep.subr.bf16.mxu0 %v1707_v19  ;;  %v1752_v26 = vld [vmem:[#allocation2 + $0x9c0] sm:$0xff]  ;;  %v1754_v19 = vld [vmem:[#allocation2 + $0x9d0] sm:$0xff] }
 0x3f3   :  { %2142 = vmatpush1.bf16.msra.mxu1 %v1704_v27  ;;  %2470 = vmatpush1.bf16.msra.mxu0 %v1706_v29  ;;  %v1757_v27 = vld [vmem:[#allocation2 + $0x9e8] sm:$0xff]  ;;  %v1759_v29 = vld [vmem:[#allocation2 + $0x9f8] sm:$0xff] }
 0x3f4   :  { %2143 = vmatprep.subr.bf16.mxu1 %v1709_v30  ;;  %2471 = vmatprep.subr.bf16.mxu0 %v1711_v45  ;;  %v1756_v30 = vld [vmem:[#allocation2 + $0x9e0] sm:$0xff]  ;;  %v1758_v45 = vld [vmem:[#allocation2 + $0x9f0] sm:$0xff] }
 0x3f7   :  { %2144 = vmatpush1.bf16.msra.mxu1 %v1708_v32  ;;  %2472 = vmatpush1.bf16.msra.mxu0 %v1710_v33  ;;  %v1761_v32 = vld [vmem:[#allocation2 + $0xa08] sm:$0xff]  ;;  %v1763_v33 = vld [vmem:[#allocation2 + $0xa18] sm:$0xff] }
 0x3f8   :  { %2145 = vmatprep.subr.bf16.mxu1 %v1713_v39  ;;  %2473 = vmatprep.subr.bf16.mxu0 %v1715_v62  ;;  %v1760_v39 = vld [vmem:[#allocation2 + $0xa00] sm:$0xff]  ;;  %v1762_v62 = vld [vmem:[#allocation2 + $0xa10] sm:$0xff] }
 0x3fb   :  { %2146 = vmatpush1.bf16.msra.mxu1 %v1712_v49  ;;  %2474 = vmatpush1.bf16.msra.mxu0 %v1714_v63  ;;  %v1765_v49 = vld [vmem:[#allocation2 + $0xa28] sm:$0xff]  ;;  %v1767_v63 = vld [vmem:[#allocation2 + $0xa38] sm:$0xff] }
 0x3fc   :  { %2147 = vmatprep.subr.bf16.mxu1 %v1717_v2  ;;  %2475 = vmatprep.subr.bf16.mxu0 %v1719_v3  ;;  %v1764_v2 = vld [vmem:[#allocation2 + $0xa20] sm:$0xff]  ;;  %v1766_v3 = vld [vmem:[#allocation2 + $0xa30] sm:$0xff] }
 0x3ff   :  { %2148 = vmatpush1.bf16.msra.mxu1 %v1716_v4  ;;  %2476 = vmatpush1.bf16.msra.mxu0 %v1718_v5  ;;  %v1769_v4 = vld [vmem:[#allocation2 + $0xa48] sm:$0xff]  ;;  %v1771_v5 = vld [vmem:[#allocation2 + $0xa58] sm:$0xff] }
 0x400   :  { %2149 = vmatprep.subr.bf16.mxu1 %v1721_v6  ;;  %2477 = vmatprep.subr.bf16.mxu0 %v1723_v7  ;;  %v1768_v6 = vld [vmem:[#allocation2 + $0xa40] sm:$0xff]  ;;  %v1770_v7 = vld [vmem:[#allocation2 + $0xa50] sm:$0xff] }
 0x403   :  { %2150 = vmatpush1.bf16.msra.mxu1 %v1720_v8  ;;  %2478 = vmatpush1.bf16.msra.mxu0 %v1722_v9  ;;  %v1773_v8 = vld [vmem:[#allocation2 + $0xa68] sm:$0xff]  ;;  %v1772_v9 = vld [vmem:[#allocation2 + $0xa60] sm:$0xff] }
 0x404   :  { %2151 = vmatprep.subr.bf16.mxu1 %v1725_v10  ;;  %2479 = vmatprep.subr.bf16.mxu0 %v1727_v40  ;;  %v1774_v10 = vld [vmem:[#allocation2 + $0xa70] sm:$0xff]  ;;  %v1777_v40 = vld [vmem:[#allocation2 + $0xa88] sm:$0xff] }
 0x407   :  { %2152 = vmatpush1.bf16.msra.mxu1 %v1724_v11  ;;  %2480 = vmatpush1.bf16.msra.mxu0 %v1726_v12  ;;  %v1779_v11 = vld [vmem:[#allocation2 + $0xa98] sm:$0xff]  ;;  %v1778_v12 = vld [vmem:[#allocation2 + $0xa90] sm:$0xff] }
 0x408   :  { %2153 = vmatprep.subr.bf16.mxu1 %v1729_v13  ;;  %2481 = vmatprep.subr.bf16.mxu0 %v1731_v14  ;;  %v1781_v13 = vld [vmem:[#allocation2 + $0xaa8] sm:$0xff]  ;;  %v1783_v14 = vld [vmem:[#allocation2 + $0xab8] sm:$0xff] }
 0x40b   :  { %2154 = vmatpush1.bf16.msra.mxu1 %v1728_v44  ;;  %2482 = vmatpush1.bf16.msra.mxu0 %v1730_v15  ;;  %v1780_v44 = vld [vmem:[#allocation2 + $0xaa0] sm:$0xff]  ;;  %v1782_v15 = vld [vmem:[#allocation2 + $0xab0] sm:$0xff] }
 0x40c   :  { %2155 = vmatprep.subr.bf16.mxu1 %v1733_v16  ;;  %2483 = vmatprep.subr.bf16.mxu0 %v1735_v17  ;;  %v1785_v16 = vld [vmem:[#allocation2 + $0xac8] sm:$0xff]  ;;  %v1787_v17 = vld [vmem:[#allocation2 + $0xad8] sm:$0xff] }
 0x40f   :  { %2156 = vmatpush1.bf16.msra.mxu1 %v1732_v18  ;;  %2484 = vmatpush1.bf16.msra.mxu0 %v1734_v20  ;;  %v1784_v18 = vld [vmem:[#allocation2 + $0xac0] sm:$0xff]  ;;  %v1786_v20 = vld [vmem:[#allocation2 + $0xad0] sm:$0xff] }
 0x410   :  { %2157 = vmatprep.subr.bf16.mxu1 %v1737_v21  ;;  %2485 = vmatprep.subr.bf16.mxu0 %v1739_v22  ;;  %v1789_v21 = vld [vmem:[#allocation2 + $0xae8] sm:$0xff]  ;;  %v1791_v22 = vld [vmem:[#allocation2 + $0xaf8] sm:$0xff] }
 0x413   :  { %2158 = vmatpush1.bf16.msra.mxu1 %v1736_v23  ;;  %2486 = vmatpush1.bf16.msra.mxu0 %v1738_v24  ;;  %v1788_v23 = vld [vmem:[#allocation2 + $0xae0] sm:$0xff]  ;;  %v1790_v24 = vld [vmem:[#allocation2 + $0xaf0] sm:$0xff] }
 0x414   :  { %2159 = vmatprep.subr.bf16.mxu1 %v1741_v28  ;;  %2487 = vmatprep.subr.bf16.mxu0 %v1743_v36  ;;  %v1793_v28 = vld [vmem:[#allocation2 + $0xb08] sm:$0xff]  ;;  %v1795_v36 = vld [vmem:[#allocation2 + $0xb18] sm:$0xff] }
 0x417   :  { %2160 = vmatpush1.bf16.msra.mxu1 %v1740_v42  ;;  %2488 = vmatpush1.bf16.msra.mxu0 %v1742_v41  ;;  %v1792_v42 = vld [vmem:[#allocation2 + $0xb00] sm:$0xff]  ;;  %v1794_v41 = vld [vmem:[#allocation2 + $0xb10] sm:$0xff] }
 0x418   :  { %2161 = vmatprep.subr.bf16.mxu1 %v1745_v43  ;;  %2489 = vmatprep.subr.bf16.mxu0 %v1747_v48  ;;  %v1797_v43 = vld [vmem:[#allocation2 + $0xb28] sm:$0xff]  ;;  %v1799_v48 = vld [vmem:[#allocation2 + $0xb38] sm:$0xff] }
 0x41b   :  { %2162 = vmatpush1.bf16.msra.mxu1 %v1744_v51  ;;  %2490 = vmatpush1.bf16.msra.mxu0 %v1746_v52  ;;  %v1796_v51 = vld [vmem:[#allocation2 + $0xb20] sm:$0xff]  ;;  %v1798_v52 = vld [vmem:[#allocation2 + $0xb30] sm:$0xff] }
 0x41c   :  { %2163 = vmatprep.subr.bf16.mxu1 %v1749_v46  ;;  %2491 = vmatprep.subr.bf16.mxu0 %v1751_v53  ;;  %v1801_v46 = vld [vmem:[#allocation2 + $0xb48] sm:$0xff]  ;;  %v1803_v53 = vld [vmem:[#allocation2 + $0xb58] sm:$0xff] }
 0x41f   :  { %2164 = vmatpush1.bf16.msra.mxu1 %v1748_v25  ;;  %2492 = vmatpush1.bf16.msra.mxu0 %v1750_v54  ;;  %v1800_v25 = vld [vmem:[#allocation2 + $0xb40] sm:$0xff]  ;;  %v1802_v54 = vld [vmem:[#allocation2 + $0xb50] sm:$0xff] }
 0x420   :  { %2165 = vmatprep.subr.bf16.mxu1 %v1753_v55  ;;  %2493 = vmatprep.subr.bf16.mxu0 %v1755_v56  ;;  %v1805_v55 = vld [vmem:[#allocation2 + $0xb68] sm:$0xff]  ;;  %v1807_v56 = vld [vmem:[#allocation2 + $0xb78] sm:$0xff] }
 0x423   :  { %2166 = vmatpush1.bf16.msra.mxu1 %v1752_v26  ;;  %2494 = vmatpush1.bf16.msra.mxu0 %v1754_v19  ;;  %v1804_v26 = vld [vmem:[#allocation2 + $0xb60] sm:$0xff]  ;;  %v1806_v19 = vld [vmem:[#allocation2 + $0xb70] sm:$0xff] }
 0x424   :  { %2167 = vmatprep.subr.bf16.mxu1 %v1757_v27  ;;  %2495 = vmatprep.subr.bf16.mxu0 %v1759_v29  ;;  %v1809_v27 = vld [vmem:[#allocation2 + $0xb88] sm:$0xff]  ;;  %v1811_v29 = vld [vmem:[#allocation2 + $0xb98] sm:$0xff] }
 0x427   :  { %2168 = vmatpush1.bf16.msra.mxu1 %v1756_v30  ;;  %2496 = vmatpush1.bf16.msra.mxu0 %v1758_v45  ;;  %v1808_v30 = vld [vmem:[#allocation2 + $0xb80] sm:$0xff]  ;;  %v1810_v45 = vld [vmem:[#allocation2 + $0xb90] sm:$0xff] }
 0x428   :  { %2178 = vmatprep.subr.bf16.mxu1 %v1761_v32  ;;  %2506 = vmatprep.subr.bf16.mxu0 %v1763_v33  ;;  %v1813_v32 = vld [vmem:[#allocation2 + $0xba8] sm:$0xff]  ;;  %v1815_v33 = vld [vmem:[#allocation2 + $0xbb8] sm:$0xff] }
 0x42a   :  { %2170 = vmatmul.mubr.bf16.vlgmr.msra.gmra.mrb[8].mxu1 %v4198_v47  ;;  %2498 = vmatmul.mubr.bf16.vlgmr.msra.gmra.mrb[12].mxu0 %v4198_v47  ;;  %v1775_v47 = vld [vmem:[#allocation2 + $0xa78] sm:$0xff] }
 0x42b   :  { %2179 = vmatpush1.bf16.msra.mxu1 %v1760_v39  ;;  %2507 = vmatpush1.bf16.msra.mxu0 %v1762_v62  ;;  %v1812_v39 = vld [vmem:[#allocation2 + $0xba0] sm:$0xff]  ;;  %v1814_v62 = vld [vmem:[#allocation2 + $0xbb0] sm:$0xff] }
 0x42c   :  { %2180 = vmatprep.subr.bf16.mxu1 %v1765_v49  ;;  %2508 = vmatprep.subr.bf16.mxu0 %v1767_v63  ;;  %v1817_v49 = vld [vmem:[#allocation2 + $0xbc8] sm:$0xff]  ;;  %v1819_v63 = vld [vmem:[#allocation2 + $0xbd8] sm:$0xff] }
 0x42d   :  { %2210 = vmatprep.mubr.bf16.mxu1 %v4204_v57  ;;  %2538 = vmatprep.mubr.bf16.mxu0 %v4204_v57  ;;  %v1776_v57 = vld [vmem:[#allocation2 + $0xa80] sm:$0xff] }
 0x42f   :  { %2181 = vmatpush1.bf16.msra.mxu1 %v1764_v2  ;;  %2509 = vmatpush1.bf16.msra.mxu0 %v1766_v3  ;;  %v1816_v2 = vld [vmem:[#allocation2 + $0xbc0] sm:$0xff]  ;;  %v1818_v3 = vld [vmem:[#allocation2 + $0xbd0] sm:$0xff] }
 0x430   :  { %2182 = vmatprep.subr.bf16.mxu1 %v1769_v4  ;;  %2510 = vmatprep.subr.bf16.mxu0 %v1771_v5  ;;  %v1821_v4 = vld [vmem:[#allocation2 + $0xbe8] sm:$0xff]  ;;  %v1823_v5 = vld [vmem:[#allocation2 + $0xbf8] sm:$0xff] }
 0x433   :  { %2183 = vmatpush1.bf16.msra.mxu1 %v1768_v6  ;;  %2511 = vmatpush1.bf16.msra.mxu0 %v1770_v7  ;;  %v1820_v6 = vld [vmem:[#allocation2 + $0xbe0] sm:$0xff]  ;;  %v1822_v7 = vld [vmem:[#allocation2 + $0xbf0] sm:$0xff] }
 0x434   :  { %2184 = vmatprep.subr.bf16.mxu1 %v1773_v8  ;;  %2512 = vmatprep.subr.bf16.mxu0 %v1775_v47  ;;  %v1825_v8 = vld [vmem:[#allocation2 + $0xc08] sm:$0xff]  ;;  %v1827_v47 = vld [vmem:[#allocation2 + $0xc18] sm:$0xff] }
 0x437   :  { %2185 = vmatpush1.bf16.msra.mxu1 %v1772_v9  ;;  %2513 = vmatpush1.bf16.msra.mxu0 %v1774_v10  ;;  %v1824_v9 = vld [vmem:[#allocation2 + $0xc00] sm:$0xff]  ;;  %v1826_v10 = vld [vmem:[#allocation2 + $0xc10] sm:$0xff] }
 0x438   :  { %2186 = vmatprep.subr.bf16.mxu1 %v1777_v40  ;;  %2514 = vmatprep.subr.bf16.mxu0 %v1779_v11  ;;  %v1829_v40 = vld [vmem:[#allocation2 + $0xc28] sm:$0xff]  ;;  %v1831_v11 = vld [vmem:[#allocation2 + $0xc38] sm:$0xff] }
 0x43b   :  { %2187 = vmatpush1.bf16.msra.mxu1 %v1776_v57  ;;  %2515 = vmatpush1.bf16.msra.mxu0 %v1778_v12  ;;  %v1828_v57 = vld [vmem:[#allocation2 + $0xc20] sm:$0xff]  ;;  %v1830_v12 = vld [vmem:[#allocation2 + $0xc30] sm:$0xff] }
 0x43c   :  { %2188 = vmatprep.subr.bf16.mxu1 %v1781_v13  ;;  %2516 = vmatprep.subr.bf16.mxu0 %v1783_v14  ;;  %v1833_v13 = vld [vmem:[#allocation2 + $0xc48] sm:$0xff]  ;;  %v1835_v14 = vld [vmem:[#allocation2 + $0xc58] sm:$0xff] }
 0x43f   :  { %2189 = vmatpush1.bf16.msra.mxu1 %v1780_v44  ;;  %2517 = vmatpush1.bf16.msra.mxu0 %v1782_v15  ;;  %v1832_v44 = vld [vmem:[#allocation2 + $0xc40] sm:$0xff]  ;;  %v1834_v15 = vld [vmem:[#allocation2 + $0xc50] sm:$0xff] }
 0x440   :  { %2190 = vmatprep.subr.bf16.mxu1 %v1785_v16  ;;  %2518 = vmatprep.subr.bf16.mxu0 %v1787_v17  ;;  %v1837_v16 = vld [vmem:[#allocation2 + $0xc68] sm:$0xff]  ;;  %v1836_v17 = vld [vmem:[#allocation2 + $0xc60] sm:$0xff] }
 0x443   :  { %2191 = vmatpush1.bf16.msra.mxu1 %v1784_v18  ;;  %2519 = vmatpush1.bf16.msra.mxu0 %v1786_v20  ;;  %v1838_v18 = vld [vmem:[#allocation2 + $0xc70] sm:$0xff]  ;;  %v1841_v20 = vld [vmem:[#allocation2 + $0xc88] sm:$0xff] }
 0x444   :  { %2192 = vmatprep.subr.bf16.mxu1 %v1789_v21  ;;  %2520 = vmatprep.subr.bf16.mxu0 %v1791_v22  ;;  %v1843_v21 = vld [vmem:[#allocation2 + $0xc98] sm:$0xff]  ;;  %v1842_v22 = vld [vmem:[#allocation2 + $0xc90] sm:$0xff] }
 0x447   :  { %2193 = vmatpush1.bf16.msra.mxu1 %v1788_v23  ;;  %2521 = vmatpush1.bf16.msra.mxu0 %v1790_v24  ;;  %v1845_v23 = vld [vmem:[#allocation2 + $0xca8] sm:$0xff]  ;;  %v1847_v24 = vld [vmem:[#allocation2 + $0xcb8] sm:$0xff] }
 0x448   :  { %2194 = vmatprep.subr.bf16.mxu1 %v1793_v28  ;;  %2522 = vmatprep.subr.bf16.mxu0 %v1795_v36  ;;  %v1844_v28 = vld [vmem:[#allocation2 + $0xca0] sm:$0xff]  ;;  %v1846_v36 = vld [vmem:[#allocation2 + $0xcb0] sm:$0xff] }
 0x44b   :  { %2195 = vmatpush1.bf16.msra.mxu1 %v1792_v42  ;;  %2523 = vmatpush1.bf16.msra.mxu0 %v1794_v41  ;;  %v1849_v42 = vld [vmem:[#allocation2 + $0xcc8] sm:$0xff]  ;;  %v1851_v41 = vld [vmem:[#allocation2 + $0xcd8] sm:$0xff] }
 0x44c   :  { %2196 = vmatprep.subr.bf16.mxu1 %v1797_v43  ;;  %2524 = vmatprep.subr.bf16.mxu0 %v1799_v48  ;;  %v1848_v43 = vld [vmem:[#allocation2 + $0xcc0] sm:$0xff]  ;;  %v1850_v48 = vld [vmem:[#allocation2 + $0xcd0] sm:$0xff] }
 0x44f   :  { %2197 = vmatpush1.bf16.msra.mxu1 %v1796_v51  ;;  %2525 = vmatpush1.bf16.msra.mxu0 %v1798_v52  ;;  %v1853_v51 = vld [vmem:[#allocation2 + $0xce8] sm:$0xff]  ;;  %v1855_v52 = vld [vmem:[#allocation2 + $0xcf8] sm:$0xff] }
 0x450   :  { %2198 = vmatprep.subr.bf16.mxu1 %v1801_v46  ;;  %2526 = vmatprep.subr.bf16.mxu0 %v1803_v53  ;;  %v1852_v46 = vld [vmem:[#allocation2 + $0xce0] sm:$0xff]  ;;  %v1854_v53 = vld [vmem:[#allocation2 + $0xcf0] sm:$0xff] }
 0x453   :  { %2199 = vmatpush1.bf16.msra.mxu1 %v1800_v25  ;;  %2527 = vmatpush1.bf16.msra.mxu0 %v1802_v54  ;;  %v1857_v25 = vld [vmem:[#allocation2 + $0xd08] sm:$0xff]  ;;  %v1859_v54 = vld [vmem:[#allocation2 + $0xd18] sm:$0xff] }
 0x454   :  { %2200 = vmatprep.subr.bf16.mxu1 %v1805_v55  ;;  %2528 = vmatprep.subr.bf16.mxu0 %v1807_v56  ;;  %v1856_v55 = vld [vmem:[#allocation2 + $0xd00] sm:$0xff]  ;;  %v1858_v56 = vld [vmem:[#allocation2 + $0xd10] sm:$0xff] }
 0x457   :  { %2201 = vmatpush1.bf16.msra.mxu1 %v1804_v26  ;;  %2529 = vmatpush1.bf16.msra.mxu0 %v1806_v19  ;;  %v1861_v26 = vld [vmem:[#allocation2 + $0xd28] sm:$0xff]  ;;  %v1863_v19 = vld [vmem:[#allocation2 + $0xd38] sm:$0xff] }
 0x458   :  { %2202 = vmatprep.subr.bf16.mxu1 %v1809_v27  ;;  %2530 = vmatprep.subr.bf16.mxu0 %v1811_v29  ;;  %v1860_v27 = vld [vmem:[#allocation2 + $0xd20] sm:$0xff]  ;;  %v1862_v29 = vld [vmem:[#allocation2 + $0xd30] sm:$0xff] }
 0x45b   :  { %2203 = vmatpush1.bf16.msra.mxu1 %v1808_v30  ;;  %2531 = vmatpush1.bf16.msra.mxu0 %v1810_v45  ;;  %v1865_v30 = vld [vmem:[#allocation2 + $0xd48] sm:$0xff]  ;;  %v1867_v45 = vld [vmem:[#allocation2 + $0xd58] sm:$0xff] }
 0x45c   :  { %2204 = vmatprep.subr.bf16.mxu1 %v1813_v32  ;;  %2532 = vmatprep.subr.bf16.mxu0 %v1815_v33  ;;  %v1864_v32 = vld [vmem:[#allocation2 + $0xd40] sm:$0xff]  ;;  %v1866_v33 = vld [vmem:[#allocation2 + $0xd50] sm:$0xff] }
 0x45f   :  { %2205 = vmatpush1.bf16.msra.mxu1 %v1812_v39  ;;  %2533 = vmatpush1.bf16.msra.mxu0 %v1814_v62  ;;  %v1869_v39 = vld [vmem:[#allocation2 + $0xd68] sm:$0xff]  ;;  %v1871_v62 = vld [vmem:[#allocation2 + $0xd78] sm:$0xff] }
 0x460   :  { %2206 = vmatprep.subr.bf16.mxu1 %v1817_v49  ;;  %2534 = vmatprep.subr.bf16.mxu0 %v1819_v63  ;;  %v1868_v49 = vld [vmem:[#allocation2 + $0xd60] sm:$0xff]  ;;  %v1870_v63 = vld [vmem:[#allocation2 + $0xd70] sm:$0xff] }
 0x463   :  { %2207 = vmatpush1.bf16.msra.mxu1 %v1816_v2  ;;  %2535 = vmatpush1.bf16.msra.mxu0 %v1818_v3  ;;  %v1873_v2 = vld [vmem:[#allocation2 + $0xd88] sm:$0xff]  ;;  %v1875_v3 = vld [vmem:[#allocation2 + $0xd98] sm:$0xff] }
 0x464   :  { %2208 = vmatprep.subr.bf16.mxu1 %v1821_v4  ;;  %2536 = vmatprep.subr.bf16.mxu0 %v1823_v5  ;;  %v1872_v4 = vld [vmem:[#allocation2 + $0xd80] sm:$0xff]  ;;  %v1874_v5 = vld [vmem:[#allocation2 + $0xd90] sm:$0xff] }
 0x467   :  { %2209 = vmatpush1.bf16.msra.mxu1 %v1820_v6  ;;  %2537 = vmatpush1.bf16.msra.mxu0 %v1822_v7  ;;  %v1877_v6 = vld [vmem:[#allocation2 + $0xda8] sm:$0xff]  ;;  %v1879_v7 = vld [vmem:[#allocation2 + $0xdb8] sm:$0xff] }
 0x468   :  { %2219 = vmatprep.subr.bf16.mxu1 %v1825_v8  ;;  %2547 = vmatprep.subr.bf16.mxu0 %v1827_v47  ;;  %v1876_v8 = vld [vmem:[#allocation2 + $0xda0] sm:$0xff]  ;;  %v1878_v47 = vld [vmem:[#allocation2 + $0xdb0] sm:$0xff] }
 0x46a   :  { %2211 = vmatmul.mubr.bf16.vlgmr.msra.gmra.mrb[8].mxu1 %v4202_v50  ;;  %2539 = vmatmul.mubr.bf16.vlgmr.msra.gmra.mrb[12].mxu0 %v4202_v50  ;;  %v1839_v50 = vld [vmem:[#allocation2 + $0xc78] sm:$0xff] }
 0x46b   :  { %2220 = vmatpush1.bf16.msra.mxu1 %v1824_v9  ;;  %2548 = vmatpush1.bf16.msra.mxu0 %v1826_v10  ;;  %v1881_v9 = vld [vmem:[#allocation2 + $0xdc8] sm:$0xff]  ;;  %v1883_v10 = vld [vmem:[#allocation2 + $0xdd8] sm:$0xff] }
 0x46c   :  { %2221 = vmatprep.subr.bf16.mxu1 %v1829_v40  ;;  %2549 = vmatprep.subr.bf16.mxu0 %v1831_v11  ;;  %v1880_v40 = vld [vmem:[#allocation2 + $0xdc0] sm:$0xff]  ;;  %v1882_v11 = vld [vmem:[#allocation2 + $0xdd0] sm:$0xff] }
 0x46d   :  { %2251 = vmatprep.mubr.bf16.mxu1 %v4208_v59  ;;  %2579 = vmatprep.mubr.bf16.mxu0 %v4208_v59  ;;  %v1840_v59 = vld [vmem:[#allocation2 + $0xc80] sm:$0xff] }
 0x46f   :  { %2222 = vmatpush1.bf16.msra.mxu1 %v1828_v57  ;;  %2550 = vmatpush1.bf16.msra.mxu0 %v1830_v12  ;;  %v1885_v57 = vld [vmem:[#allocation2 + $0xde8] sm:$0xff]  ;;  %v1887_v12 = vld [vmem:[#allocation2 + $0xdf8] sm:$0xff] }
 0x470   :  { %2223 = vmatprep.subr.bf16.mxu1 %v1833_v13  ;;  %2551 = vmatprep.subr.bf16.mxu0 %v1835_v14  ;;  %v1884_v13 = vld [vmem:[#allocation2 + $0xde0] sm:$0xff]  ;;  %v1886_v14 = vld [vmem:[#allocation2 + $0xdf0] sm:$0xff] }
 0x473   :  { %2224 = vmatpush1.bf16.msra.mxu1 %v1832_v44  ;;  %2552 = vmatpush1.bf16.msra.mxu0 %v1834_v15  ;;  %v1889_v44 = vld [vmem:[#allocation2 + $0xe08] sm:$0xff]  ;;  %v1891_v15 = vld [vmem:[#allocation2 + $0xe18] sm:$0xff] }
 0x474   :  { %2225 = vmatprep.subr.bf16.mxu1 %v1837_v16  ;;  %2553 = vmatprep.subr.bf16.mxu0 %v1839_v50  ;;  %v1888_v16 = vld [vmem:[#allocation2 + $0xe00] sm:$0xff]  ;;  %v1890_v50 = vld [vmem:[#allocation2 + $0xe10] sm:$0xff] }
 0x477   :  { %2226 = vmatpush1.bf16.msra.mxu1 %v1836_v17  ;;  %2554 = vmatpush1.bf16.msra.mxu0 %v1838_v18  ;;  %v1893_v17 = vld [vmem:[#allocation2 + $0xe28] sm:$0xff]  ;;  %v1895_v18 = vld [vmem:[#allocation2 + $0xe38] sm:$0xff] }
 0x478   :  { %2227 = vmatprep.subr.bf16.mxu1 %v1841_v20  ;;  %2555 = vmatprep.subr.bf16.mxu0 %v1843_v21  ;;  %v1892_v20 = vld [vmem:[#allocation2 + $0xe20] sm:$0xff]  ;;  %v1894_v21 = vld [vmem:[#allocation2 + $0xe30] sm:$0xff] }
 0x47b   :  { %2228 = vmatpush1.bf16.msra.mxu1 %v1840_v59  ;;  %2556 = vmatpush1.bf16.msra.mxu0 %v1842_v22  ;;  %v1897_v59 = vld [vmem:[#allocation2 + $0xe48] sm:$0xff]  ;;  %v1899_v22 = vld [vmem:[#allocation2 + $0xe58] sm:$0xff] }
 0x47c   :  { %2229 = vmatprep.subr.bf16.mxu1 %v1845_v23  ;;  %2557 = vmatprep.subr.bf16.mxu0 %v1847_v24  ;;  %v1896_v23 = vld [vmem:[#allocation2 + $0xe40] sm:$0xff]  ;;  %v1898_v24 = vld [vmem:[#allocation2 + $0xe50] sm:$0xff] }
 0x47f   :  { %2230 = vmatpush1.bf16.msra.mxu1 %v1844_v28  ;;  %2558 = vmatpush1.bf16.msra.mxu0 %v1846_v36  ;;  %v1901_v28 = vld [vmem:[#allocation2 + $0xe68] sm:$0xff]  ;;  %v1900_v36 = vld [vmem:[#allocation2 + $0xe60] sm:$0xff] }
 0x480   :  { %2231 = vmatprep.subr.bf16.mxu1 %v1849_v42  ;;  %2559 = vmatprep.subr.bf16.mxu0 %v1851_v41  ;;  %v1902_v42 = vld [vmem:[#allocation2 + $0xe70] sm:$0xff]  ;;  %v1905_v41 = vld [vmem:[#allocation2 + $0xe88] sm:$0xff] }
 0x483   :  { %2232 = vmatpush1.bf16.msra.mxu1 %v1848_v43  ;;  %2560 = vmatpush1.bf16.msra.mxu0 %v1850_v48  ;;  %v1907_v43 = vld [vmem:[#allocation2 + $0xe98] sm:$0xff]  ;;  %v1906_v48 = vld [vmem:[#allocation2 + $0xe90] sm:$0xff] }
 0x484   :  { %2233 = vmatprep.subr.bf16.mxu1 %v1853_v51  ;;  %2561 = vmatprep.subr.bf16.mxu0 %v1855_v52  ;;  %v1909_v51 = vld [vmem:[#allocation2 + $0xea8] sm:$0xff]  ;;  %v1911_v52 = vld [vmem:[#allocation2 + $0xeb8] sm:$0xff] }
 0x487   :  { %2234 = vmatpush1.bf16.msra.mxu1 %v1852_v46  ;;  %2562 = vmatpush1.bf16.msra.mxu0 %v1854_v53  ;;  %v1908_v46 = vld [vmem:[#allocation2 + $0xea0] sm:$0xff]  ;;  %v1910_v53 = vld [vmem:[#allocation2 + $0xeb0] sm:$0xff] }
 0x488   :  { %2235 = vmatprep.subr.bf16.mxu1 %v1857_v25  ;;  %2563 = vmatprep.subr.bf16.mxu0 %v1859_v54  ;;  %v1913_v25 = vld [vmem:[#allocation2 + $0xec8] sm:$0xff]  ;;  %v1915_v54 = vld [vmem:[#allocation2 + $0xed8] sm:$0xff] }
 0x48b   :  { %2236 = vmatpush1.bf16.msra.mxu1 %v1856_v55  ;;  %2564 = vmatpush1.bf16.msra.mxu0 %v1858_v56  ;;  %v1912_v55 = vld [vmem:[#allocation2 + $0xec0] sm:$0xff]  ;;  %v1914_v56 = vld [vmem:[#allocation2 + $0xed0] sm:$0xff] }
 0x48c   :  { %2237 = vmatprep.subr.bf16.mxu1 %v1861_v26  ;;  %2565 = vmatprep.subr.bf16.mxu0 %v1863_v19  ;;  %v1917_v26 = vld [vmem:[#allocation2 + $0xee8] sm:$0xff]  ;;  %v1919_v19 = vld [vmem:[#allocation2 + $0xef8] sm:$0xff] }
 0x48f   :  { %2238 = vmatpush1.bf16.msra.mxu1 %v1860_v27  ;;  %2566 = vmatpush1.bf16.msra.mxu0 %v1862_v29  ;;  %v1916_v27 = vld [vmem:[#allocation2 + $0xee0] sm:$0xff]  ;;  %v1918_v29 = vld [vmem:[#allocation2 + $0xef0] sm:$0xff] }
 0x490   :  { %2239 = vmatprep.subr.bf16.mxu1 %v1865_v30  ;;  %2567 = vmatprep.subr.bf16.mxu0 %v1867_v45  ;;  %v1921_v30 = vld [vmem:[#allocation2 + $0xf08] sm:$0xff]  ;;  %v1923_v45 = vld [vmem:[#allocation2 + $0xf18] sm:$0xff] }
 0x493   :  { %2240 = vmatpush1.bf16.msra.mxu1 %v1864_v32  ;;  %2568 = vmatpush1.bf16.msra.mxu0 %v1866_v33  ;;  %v1920_v32 = vld [vmem:[#allocation2 + $0xf00] sm:$0xff]  ;;  %v1922_v33 = vld [vmem:[#allocation2 + $0xf10] sm:$0xff] }
 0x494   :  { %2241 = vmatprep.subr.bf16.mxu1 %v1869_v39  ;;  %2569 = vmatprep.subr.bf16.mxu0 %v1871_v62  ;;  %v1925_v39 = vld [vmem:[#allocation2 + $0xf28] sm:$0xff]  ;;  %v1927_v62 = vld [vmem:[#allocation2 + $0xf38] sm:$0xff] }
 0x497   :  { %2242 = vmatpush1.bf16.msra.mxu1 %v1868_v49  ;;  %2570 = vmatpush1.bf16.msra.mxu0 %v1870_v63  ;;  %v1924_v49 = vld [vmem:[#allocation2 + $0xf20] sm:$0xff]  ;;  %v1926_v63 = vld [vmem:[#allocation2 + $0xf30] sm:$0xff] }
 0x498   :  { %2243 = vmatprep.subr.bf16.mxu1 %v1873_v2  ;;  %2571 = vmatprep.subr.bf16.mxu0 %v1875_v3  ;;  %v1929_v2 = vld [vmem:[#allocation2 + $0xf48] sm:$0xff]  ;;  %v1931_v3 = vld [vmem:[#allocation2 + $0xf58] sm:$0xff] }
 0x49b   :  { %2244 = vmatpush1.bf16.msra.mxu1 %v1872_v4  ;;  %2572 = vmatpush1.bf16.msra.mxu0 %v1874_v5  ;;  %v1928_v4 = vld [vmem:[#allocation2 + $0xf40] sm:$0xff]  ;;  %v1930_v5 = vld [vmem:[#allocation2 + $0xf50] sm:$0xff] }
 0x49c   :  { %2245 = vmatprep.subr.bf16.mxu1 %v1877_v6  ;;  %2573 = vmatprep.subr.bf16.mxu0 %v1879_v7  ;;  %v1933_v6 = vld [vmem:[#allocation2 + $0xf68] sm:$0xff]  ;;  %v1935_v7 = vld [vmem:[#allocation2 + $0xf78] sm:$0xff] }
 0x49f   :  { %2246 = vmatpush1.bf16.msra.mxu1 %v1876_v8  ;;  %2574 = vmatpush1.bf16.msra.mxu0 %v1878_v47  ;;  %v1932_v8 = vld [vmem:[#allocation2 + $0xf60] sm:$0xff]  ;;  %v1934_v47 = vld [vmem:[#allocation2 + $0xf70] sm:$0xff] }
 0x4a0   :  { %2247 = vmatprep.subr.bf16.mxu1 %v1881_v9  ;;  %2575 = vmatprep.subr.bf16.mxu0 %v1883_v10  ;;  %v1937_v9 = vld [vmem:[#allocation2 + $0xf88] sm:$0xff]  ;;  %v1939_v10 = vld [vmem:[#allocation2 + $0xf98] sm:$0xff] }
 0x4a3   :  { %2248 = vmatpush1.bf16.msra.mxu1 %v1880_v40  ;;  %2576 = vmatpush1.bf16.msra.mxu0 %v1882_v11  ;;  %v1936_v40 = vld [vmem:[#allocation2 + $0xf80] sm:$0xff]  ;;  %v1938_v11 = vld [vmem:[#allocation2 + $0xf90] sm:$0xff] }
 0x4a4   :  { %2249 = vmatprep.subr.bf16.mxu1 %v1885_v57  ;;  %2577 = vmatprep.subr.bf16.mxu0 %v1887_v12  ;;  %v1941_v57 = vld [vmem:[#allocation2 + $0xfa8] sm:$0xff]  ;;  %v1943_v12 = vld [vmem:[#allocation2 + $0xfb8] sm:$0xff] }
 0x4a7   :  { %2250 = vmatpush1.bf16.msra.mxu1 %v1884_v13  ;;  %2578 = vmatpush1.bf16.msra.mxu0 %v1886_v14  ;;  %v1940_v13 = vld [vmem:[#allocation2 + $0xfa0] sm:$0xff]  ;;  %v1942_v14 = vld [vmem:[#allocation2 + $0xfb0] sm:$0xff] }
 0x4a8   :  { %2260 = vmatprep.subr.bf16.mxu1 %v1889_v44  ;;  %2588 = vmatprep.subr.bf16.mxu0 %v1891_v15  ;;  %v1945_v44 = vld [vmem:[#allocation2 + $0xfc8] sm:$0xff]  ;;  %v1947_v15 = vld [vmem:[#allocation2 + $0xfd8] sm:$0xff] }
 0x4aa   :  { %2252 = vmatmul.mubr.bf16.vlgmr.msra.gmra.mrb[8].mxu1 %v4206_v58  ;;  %2580 = vmatmul.mubr.bf16.vlgmr.msra.gmra.mrb[12].mxu0 %v4206_v58  ;;  %v1903_v58 = vld [vmem:[#allocation2 + $0xe78] sm:$0xff] }
 0x4ab   :  { %2261 = vmatpush1.bf16.msra.mxu1 %v1888_v16  ;;  %2589 = vmatpush1.bf16.msra.mxu0 %v1890_v50  ;;  %v1944_v16 = vld [vmem:[#allocation2 + $0xfc0] sm:$0xff]  ;;  %v1946_v50 = vld [vmem:[#allocation2 + $0xfd0] sm:$0xff] }
 0x4ac   :  { %2262 = vmatprep.subr.bf16.mxu1 %v1893_v17  ;;  %2590 = vmatprep.subr.bf16.mxu0 %v1895_v18  ;;  %v1949_v17 = vld [vmem:[#allocation2 + $0xfe8] sm:$0xff]  ;;  %v1951_v18 = vld [vmem:[#allocation2 + $0xff8] sm:$0xff] }
 0x4ad   :  { %2292 = vmatprep.mubr.bf16.mxu1 %v4212_v61  ;;  %2620 = vmatprep.mubr.bf16.mxu0 %v4212_v61  ;;  %v1904_v61 = vld [vmem:[#allocation2 + $0xe80] sm:$0xff] }
 0x4af   :  { %2263 = vmatpush1.bf16.msra.mxu1 %v1892_v20  ;;  %2591 = vmatpush1.bf16.msra.mxu0 %v1894_v21  ;;  %v1948_v20 = vld [vmem:[#allocation2 + $0xfe0] sm:$0xff]  ;;  %v1950_v21 = vld [vmem:[#allocation2 + $0xff0] sm:$0xff] }
 0x4b0   :  { %2264 = vmatprep.subr.bf16.mxu1 %v1897_v59  ;;  %2592 = vmatprep.subr.bf16.mxu0 %v1899_v22  ;;  %v3503_v59 = vld [vmem:[%s4367_s5 + $0x40] sm:$0xff]  }
 0x4b1   :  { %v3504_v22 = vld [vmem:[%s4367_s5 + $0xc0] sm:$0xff]  }
 0x4b3   :  { %2265 = vmatpush1.bf16.msra.mxu1 %v1896_v23  ;;  %2593 = vmatpush1.bf16.msra.mxu0 %v1898_v24  ;;  %v3505_v23 = vld [vmem:[%s4367_s5] sm:$0xff]  }
 0x4b4   :  { %2266 = vmatprep.subr.bf16.mxu1 %v1901_v28  ;;  %2594 = vmatprep.subr.bf16.mxu0 %v1903_v58  ;;  %v3506_v24 = vld [vmem:[%s4367_s5 + $0x80] sm:$0xff]   ;;  %v3507_v28 = vld [vmem:[%s4367_s5 + $0x48] sm:$0xff]  }
 0x4b5   :  { %v3508_v58 = vld [vmem:[%s4367_s5 + $0xc8] sm:$0xff]  }
 0x4b7   :  { %2267 = vmatpush1.bf16.msra.mxu1 %v1900_v36  ;;  %2595 = vmatpush1.bf16.msra.mxu0 %v1902_v42  ;;  %v3509_v36 = vld [vmem:[%s4367_s5 + $0x8] sm:$0xff]  }
 0x4b8   :  { %2268 = vmatprep.subr.bf16.mxu1 %v1905_v41  ;;  %2596 = vmatprep.subr.bf16.mxu0 %v1907_v43  ;;  %v3510_v42 = vld [vmem:[%s4367_s5 + $0x88] sm:$0xff]   ;;  %v3511_v41 = vld [vmem:[%s4367_s5 + $0x50] sm:$0xff]  }
 0x4b9   :  { %v3513_v43 = vld [vmem:[%s4367_s5 + $0x10] sm:$0xff]  }
 0x4bb   :  { %2269 = vmatpush1.bf16.msra.mxu1 %v1904_v61  ;;  %2597 = vmatpush1.bf16.msra.mxu0 %v1906_v48  ;;  %v3514_v61 = vld [vmem:[%s4367_s5 + $0x90] sm:$0xff]   ;;  %v3515_v48 = vld [vmem:[%s4367_s5 + $0x58] sm:$0xff]  }
 0x4bc   :  { %2270 = vmatprep.subr.bf16.mxu1 %v1909_v51  ;;  %2598 = vmatprep.subr.bf16.mxu0 %v1911_v52  ;;  %v3516_v51 = vld [vmem:[%s4367_s5 + $0xd8] sm:$0xff]  }
 0x4bd   :  { %v3517_v52 = vld [vmem:[%s4367_s5 + $0x18] sm:$0xff]  }
 0x4bf   :  { %2271 = vmatpush1.bf16.msra.mxu1 %v1908_v46  ;;  %2599 = vmatpush1.bf16.msra.mxu0 %v1910_v53  ;;  %v3518_v46 = vld [vmem:[%s4367_s5 + $0x98] sm:$0xff]   ;;  %v3519_v53 = vld [vmem:[%s4367_s5 + $0x60] sm:$0xff]  }
 0x4c0   :  { %2272 = vmatprep.subr.bf16.mxu1 %v1913_v25  ;;  %2600 = vmatprep.subr.bf16.mxu0 %v1915_v54  ;;  %v3520_v25 = vld [vmem:[%s4367_s5 + $0xe0] sm:$0xff]  }
 0x4c1   :  { %v3521_v54 = vld [vmem:[%s4367_s5 + $0x20] sm:$0xff]  }
 0x4c3   :  { %2273 = vmatpush1.bf16.msra.mxu1 %v1912_v55  ;;  %2601 = vmatpush1.bf16.msra.mxu0 %v1914_v56  ;;  %v3522_v55 = vld [vmem:[%s4367_s5 + $0xa0] sm:$0xff]   ;;  %v3523_v56 = vld [vmem:[%s4367_s5 + $0x68] sm:$0xff]  }
 0x4c4   :  { %2274 = vmatprep.subr.bf16.mxu1 %v1917_v26  ;;  %2602 = vmatprep.subr.bf16.mxu0 %v1919_v19  ;;  %v3524_v26 = vld [vmem:[%s4367_s5 + $0xe8] sm:$0xff]  }
 0x4c5   :  { %v3525_v19 = vld [vmem:[%s4367_s5 + $0x28] sm:$0xff]  }
 0x4c7   :  { %2275 = vmatpush1.bf16.msra.mxu1 %v1916_v27  ;;  %2603 = vmatpush1.bf16.msra.mxu0 %v1918_v29  ;;  %v3526_v27 = vld [vmem:[%s4367_s5 + $0xa8] sm:$0xff]   ;;  %v3527_v29 = vld [vmem:[%s4367_s5 + $0x70] sm:$0xff]  }
 0x4c8   :  { %2276 = vmatprep.subr.bf16.mxu1 %v1921_v30  ;;  %2604 = vmatprep.subr.bf16.mxu0 %v1923_v45  ;;  %v3528_v30 = vld [vmem:[%s4367_s5 + $0xf0] sm:$0xff]  }
 0x4c9   :  { %v3529_v45 = vld [vmem:[%s4367_s5 + $0x30] sm:$0xff]  }
 0x4cb   :  { %2277 = vmatpush1.bf16.msra.mxu1 %v1920_v32  ;;  %2605 = vmatpush1.bf16.msra.mxu0 %v1922_v33  ;;  %v3530_v32 = vld [vmem:[%s4367_s5 + $0xb0] sm:$0xff]   ;;  %v3531_v33 = vld [vmem:[%s4367_s5 + $0x78] sm:$0xff]  }
 0x4cc   :  { %2278 = vmatprep.subr.bf16.mxu1 %v1925_v39  ;;  %2606 = vmatprep.subr.bf16.mxu0 %v1927_v62  ;;  %v3532_v39 = vld [vmem:[%s4367_s5 + $0xf8] sm:$0xff]  }
 0x4cd   :  { %v3533_v62 = vld [vmem:[%s4367_s5 + $0x38] sm:$0xff]  }
 0x4cf   :  { %2279 = vmatpush1.bf16.msra.mxu1 %v1924_v49  ;;  %2607 = vmatpush1.bf16.msra.mxu0 %v1926_v63  ;;  %v3534_v49 = vld [vmem:[%s4367_s5 + $0xb8] sm:$0xff]   ;;  %v1956_v63 = vrot.slane %v3763_v0, %v3981_v34 }
 0x4d0   :  { %2280 = vmatprep.subr.bf16.mxu1 %v1929_v2  ;;  %2608 = vmatprep.subr.bf16.mxu0 %v1931_v3  ;;  %v1964_v2 = vrot.slane %v3763_v0, %v3984_v35  ;;  %v1960_v3 = vrot.slane %v3763_v0, %v3990_v37 }
 0x4d3   :  { %2281 = vmatpush1.bf16.msra.mxu1 %v1928_v4  ;;  %2609 = vmatpush1.bf16.msra.mxu0 %v1930_v5  ;;  %v1968_v4 = vrot.slane %v3763_v0, %v3993_v38 }
 0x4d4   :  { %2282 = vmatprep.subr.bf16.mxu1 %v1933_v6  ;;  %2610 = vmatprep.subr.bf16.mxu0 %v1935_v7 }
 0x4d7   :  { %2283 = vmatpush1.bf16.msra.mxu1 %v1932_v8  ;;  %2611 = vmatpush1.bf16.msra.mxu0 %v1934_v47 }
 0x4d8   :  { %2284 = vmatprep.subr.bf16.mxu1 %v1937_v9  ;;  %2612 = vmatprep.subr.bf16.mxu0 %v1939_v10 }
 0x4db   :  { %2285 = vmatpush1.bf16.msra.mxu1 %v1936_v40  ;;  %2613 = vmatpush1.bf16.msra.mxu0 %v1938_v11 }
 0x4dc   :  { %2286 = vmatprep.subr.bf16.mxu1 %v1941_v57  ;;  %2614 = vmatprep.subr.bf16.mxu0 %v1943_v12 }
 0x4df   :  { %2287 = vmatpush1.bf16.msra.mxu1 %v1940_v13  ;;  %2615 = vmatpush1.bf16.msra.mxu0 %v1942_v14 }
 0x4e0   :  { %2288 = vmatprep.subr.bf16.mxu1 %v1945_v44  ;;  %2616 = vmatprep.subr.bf16.mxu0 %v1947_v15 }
 0x4e3   :  { %2289 = vmatpush1.bf16.msra.mxu1 %v1944_v16  ;;  %2617 = vmatpush1.bf16.msra.mxu0 %v1946_v50 }
 0x4e4   :  { %2290 = vmatprep.subr.bf16.mxu1 %v1949_v17  ;;  %2618 = vmatprep.subr.bf16.mxu0 %v1951_v18 }
 0x4e7   :  { %2291 = vmatpush1.bf16.msra.mxu1 %v1948_v20  ;;  %2619 = vmatpush1.bf16.msra.mxu0 %v1950_v21 }
 0x4e8   :  { %3259 = vmatprep.subr.bf16.mxu1 %v3503_v59  ;;  %3281 = vmatprep.subr.bf16.mxu0 %v3504_v22 }
 0x4ea   :  { %2293 = vmatmul.mubr.bf16.vlgmr.msra.gmra.mrb[8].mxu1 %v4210_v60  ;;  %2621 = vmatmul.mubr.bf16.vlgmr.msra.gmra.mrb[12].mxu0 %v4210_v60  ;;  %v3512_v60 = vld [vmem:[%s4367_s5 + $0xd0] sm:$0xff]   ;;  %s3666_s5 = smov [#allocation13]  }
 0x4eb   :  { %3260 = vmatpush3.bf16.msra.mxu1 %v3505_v23  ;;  %3282 = vmatpush3.bf16.msra.mxu0 %v3506_v24  ;;  %s2997_s23 = sshll.u32 %s3666_s5, 4  ;;  %s2998_s23 = int_to_ptr.vmem [resolvable:$true] %s2997_s23 }
 0x4ec   :  { %3261 = vmatprep.subr.bf16.mxu1 %v3507_v28  ;;  %3283 = vmatprep.subr.bf16.mxu0 %v3508_v58  ;;  %s3615_s24 = scalar_lea.vmem %s2998_s23, 32  ;;  %p3620_p2 = scmp.lt.s32.totalorder %s2998_s23, %s2998_s23 }
 0x4ed   :  { %p3616_p1 = scmp.ne.s32.totalorder %s2998_s23, %s3615_s24  ;;  %p3621_p3 = scmp.lt.s32.totalorder %s3615_s24, %s3615_s24 }
 0x4ef   :  { %3262 = vmatpush3.bf16.msra.mxu1 %v3509_v36  ;;  %3284 = vmatpush3.bf16.msra.mxu0 %v3510_v42  ;;  %p3622_p4 = por %p3621_p3, %p3620_p2 }
 0x4f0   :  { %3263 = vmatprep.subr.bf16.mxu1 %v3511_v41  ;;  %3285 = vmatprep.subr.bf16.mxu0 %v3512_v60  ;;  %v2980_v60 = vand.u32 127, %v664_v31 }
 0x4f1   :  { %p3623_p5 = pnand %p3622_p4, %p3616_p1 }
 0x4f2   :  { %vm2981_vm5 = vcmp.eq.s32.totalorder %v2980_v60, 0 }
 0x4f3   :  { %3264 = vmatpush3.bf16.msra.mxu1 %v3513_v43  ;;  %3286 = vmatpush3.bf16.msra.mxu0 %v3514_v61 }
 0x4f4   :  { %3265 = vmatprep.subr.bf16.mxu1 %v3515_v48  ;;  %3287 = vmatprep.subr.bf16.mxu0 %v3516_v51 }
 0x4f7   :  { %3266 = vmatpush3.bf16.msra.mxu1 %v3517_v52  ;;  %3288 = vmatpush3.bf16.msra.mxu0 %v3518_v46 }
 0x4f8   :  { %3267 = vmatprep.subr.bf16.mxu1 %v3519_v53  ;;  %3289 = vmatprep.subr.bf16.mxu0 %v3520_v25 }
 0x4fb   :  { %3268 = vmatpush3.bf16.msra.mxu1 %v3521_v54  ;;  %3290 = vmatpush3.bf16.msra.mxu0 %v3522_v55 }
 0x4fc   :  { %3269 = vmatprep.subr.bf16.mxu1 %v3523_v56  ;;  %3291 = vmatprep.subr.bf16.mxu0 %v3524_v26 }
 0x4ff   :  { %3270 = vmatpush3.bf16.msra.mxu1 %v3525_v19  ;;  %3292 = vmatpush3.bf16.msra.mxu0 %v3526_v27 }
 0x500   :  { %3271 = vmatprep.subr.bf16.mxu1 %v3527_v29  ;;  %3293 = vmatprep.subr.bf16.mxu0 %v3528_v30 }
 0x503   :  { %3272 = vmatpush3.bf16.msra.mxu1 %v3529_v45  ;;  %3294 = vmatpush3.bf16.msra.mxu0 %v3530_v32 }
 0x504   :  { %3273 = vmatprep.subr.bf16.mxu1 %v3531_v33  ;;  %3295 = vmatprep.subr.bf16.mxu0 %v3532_v39 }
 0x507   :  { %3274 = vmatpush3.bf16.msra.mxu1 %v3533_v62  ;;  %3296 = vmatpush3.bf16.msra.mxu0 %v3534_v49 }
 0x5bd   :  { %v2294_v5 = vpop.f32.mrb[8].mxu1  ;;  %v2622_v6 = vpop.f32.mrb[12].mxu0 }
 0x5be   :  { %v3303_v7 = vadd.f32 %v2294_v5, %v1956_v63  ;;  %v3305_v8 = vadd.f32 %v2622_v6, %v1964_v2  ;;  %v2296_v47 = vpop.f32.mrb[9].mxu1  ;;  %v2624_v9 = vpop.f32.mrb[13].mxu0 }
 0x5bf   :  { %v3304_v10 = vadd.f32 %v2296_v47, %v1960_v3  ;;  %v3306_v40 = vadd.f32 %v2624_v9, %v1968_v4  ;;  %v2298_v11 = vpop.f32.mrb[10].mxu1  ;;  %v2626_v57 = vpop.f32.mrb[14].mxu0 }
 0x5c0   :  { %v2629_v34 = vmax.f32 %v3303_v7, 0.0  ;;  %v2631_v12 = vmax.f32 %v3305_v8, 0.0  ;;  %v2299_v13 = vpop.f32.mrb[11].mxu1  ;;  %v2627_v35 = vpop.f32.mrb[15].mxu0 }
 0x5c1   :  { %v2630_v14 = vmax.f32 %v3304_v10, 0.0  ;;  %v2632_v44 = vmax.f32 %v3306_v40, 0.0 }
 0x5c2   :  { %v2633_v16 = vpack.c.bf16 %v2629_v34, %v2629_v34  ;;  %v2635_v0 = vpack.c.bf16 %v2631_v12, %v2631_v12 }
 0x5c3   :  { %v2634_v37 = vpack.c.bf16 %v2630_v14, %v2630_v14  ;;  %v2636_v15 = vpack.c.bf16 %v2632_v44, %v2632_v44 }
 0x5c5   :  { %2931 = vmatprep.mubr.bf16.mxu1 %v2634_v37  ;;  %2971 = vmatprep.mubr.bf16.mxu0 %v2636_v15 }
 0x5c6   :  { %2932 = vmatmul.mubr.bf16.vlgmr.msra.gmra.mrb[12].mxu1 %v2633_v16  ;;  %2972 = vmatmul.mubr.bf16.vlgmr.msra.gmra.mrb[16].mxu0 %v2635_v0 }
 0x699   :  { %v3275_v38 = vpop.f32.mrb[12].mxu1  ;;  %v3297_v50 = vpop.f32.mrb[16].mxu0 }
 0x69a   :  { %v3276_v17 = vpop.f32.mrb[13].mxu1  ;;  %v3298_v18 = vpop.f32.mrb[17].mxu0 }
 0x69b   :  { %v3277_v20 = vadd.f32 %v3276_v17, %v3275_v38  ;;  %v3299_v21 = vadd.f32 %v3298_v18, %v3297_v50  ;;  %v3278_v59 = vpop.f32.mrb[14].mxu1  ;;  %v3300_v22 = vpop.f32.mrb[18].mxu0 }
 0x69c   :  { %v3279_v23 = vpop.f32.mrb[15].mxu1  ;;  %v3301_v24 = vpop.f32.mrb[19].mxu0 }
 0x69d   :  { %v2934_v28 = vadd.f32 %v3277_v20, %v3765_v1 }
 0x69f   :  { %v2974_v58 = vadd.f32 %v3299_v21, %v2934_v28 }
 0x6a1   :  { %v3183_v36 = vmul.f32 -1.442695, %v2974_v58 }
 0x6a3   :  { %3535 = vpow2.f32 %v3183_v36 }
 0x6ad   :  { %v3536_v42 = vpop.eup %3535 }
 0x6ae   :  { %v2985_v41 = vadd.f32 1.0, %v3536_v42 }
 0x6b0   :  { %3537 = vrcp.f32 %v2985_v41 }
 0x6ba   :  { %v3538_v43 = vpop.eup %3537 }
 0x6bb   :  { %v2988_v61 = vsel %vm2981_vm5, %v3538_v43, %v2974_v58 }
 0x6bc   :  { %2990 = vst.msk [vmem:[#allocation13] sm:$0x3] %vm2989_vm6, %v2988_v61 }
 0x6bd   :  { %3626 = shalt.err (!%p3623_p5)
}
 0x6be   :  { %s3627_s3 = scalar_lea.hbm %s4369_s7, 32 }
 0x6bf   :  { %p3628_p6 = scmp.ne.s32.totalorder %s4369_s7, %s3627_s3  ;;  %p3631_p7 = scmp.lt.u32.totalorder %s3627_s3, %s4369_s7 }
 0x6c1   :  { %p3633_p8 = pnand %p3631_p7, %p3628_p6 }
 0x6c3   :  { %3636 = shalt.err (!%p3633_p8)
}
 0x6c4   :  { %3000 = dma.vmem_to_hbm [thread:$0]  %s2998_s23, 32, %s4369_s7, [#allocation7]  }
 0x6c5   :  { %3645 = dma.done.wait [#allocation7], 32  }
 0x6c6   :  { %3646 = vsyncadd [#allocation7], 4294967264 }
 0x6c7   :  { %3004 = vsyncpa [#allocation6], 1 }
 0x6c8   :  { %3005 = vsyncpa [#allocation11], 1 }
 0x6c9   :  { %3006 = vsyncpa [#allocation7], 1 }
 0x6ca   :  { %3007 = vsyncpa [#allocation8], 1 }
 0x6cb   :  { %3008 = vsyncmov [#allocation4] }
 0x6ce   :  { %s3009_s20 = vpop.sfrf %3008 }
 0x6cf   :  { %p3184_p9 = scmp.ne.s32.totalorder %s3009_s20, 0 }
 0x6d1   :  { %3013 = shalt.err (%p3184_p9)  }

</bundles_post_ra>
